<compile_context>
chip_gen: v7x
topology: tpu7x:2x2x1
jax: 0.10.0
libtpu: 0.0.40
codegen_flags: <defaults>
</compile_context>

<pallas_src>
import jax
import jax.numpy as jnp
from jax.experimental import pallas as pl
from jax.experimental.pallas import tpu as pltpu

D_IN = 768
D_HID = 768
D_OUT = 512


def _round_up(n, m):
    return ((n + m - 1) // m) * m


def _mlp_kernel(x_ref, w1_ref, b1_ref, w2_ref, b2_ref, o_ref):
    # x_ref: (TB, D_IN) caller dtype, w1_ref: (D_IN, D_HID) bf16, b1_ref: (1, D_HID) f32
    # w2_ref: (D_HID, D_OUT) bf16, b2_ref: (1, D_OUT) f32, o_ref: (TB, D_OUT) caller dtype
    x = x_ref[...].astype(jnp.bfloat16)                      # cast after DMA, in-kernel
    h = jnp.dot(x, w1_ref[...], preferred_element_type=jnp.float32)
    h = jnp.maximum(h + b1_ref[...], 0.0)                    # bias + ReLU in f32
    # Hidden act goes straight into the second MXU pass (no scratch round-trip).
    y = jnp.dot(h.astype(jnp.bfloat16), w2_ref[...],
                preferred_element_type=jnp.float32)
    o_ref[...] = (y + b2_ref[...]).astype(o_ref.dtype)       # emit caller's dtype


def prepare_params(w1, b1, w2, b2, *, weight_dtype=jnp.bfloat16):
    """One-time parameter prep (hoisted out of the per-call path):
    transpose PyTorch (out, in) weights to (in, out) and cast to bf16;
    reshape biases to 2-D (kept in f32 for the accumulator epilogue)."""
    w1_t = jnp.transpose(w1).astype(weight_dtype)       # (768, 768)
    w2_t = jnp.transpose(w2).astype(weight_dtype)       # (768, 512)
    b1_2d = b1.reshape(1, D_HID).astype(jnp.float32)
    b2_2d = b2.reshape(1, D_OUT).astype(jnp.float32)
    return w1_t, b1_2d, w2_t, b2_2d


def _choose_tb(batch, tb):
    """Effective batch tile (multiple of 16: native bf16 sublane packing).

    Small batches (<256 rows) run as a single tile.  Anything >=256 rows is
    split into >=2 grid steps so v7x's second TensorCore gets work on the
    "parallel" axis; large batches use ~tb-row tiles so the ~0.35us per-step
    overhead stays amortized on v6e/v7x.  (On v5e the step is MXU-bound at
    either tile size, so this choice is also fine there.)"""
    tb = max(16, _round_up(tb, 16))
    b16 = _round_up(batch, 16)
    if b16 < 256:
        return min(b16, tb)
    steps = max(2, pl.cdiv(b16, tb))
    return _round_up(pl.cdiv(b16, steps), 16)


def _build_in_specs(tb_eff, single_buffer_params):
    # Constant-index_map params are DMA'd once; Buffered(1) drops the unused
    # second buffer (~1.9 MiB VMEM) to keep headroom for larger batch tiles.
    pkw = {"pipeline_mode": pl.Buffered(1)} if single_buffer_params else {}
    in_specs = [
        pl.BlockSpec((tb_eff, D_IN), lambda i: (i, 0)),            # x tile (pipelined)
        pl.BlockSpec((D_IN, D_HID), lambda i: (0, 0), **pkw),      # W1.T (resident)
        pl.BlockSpec((1, D_HID), lambda i: (0, 0), **pkw),         # b1
        pl.BlockSpec((D_HID, D_OUT), lambda i: (0, 0), **pkw),     # W2.T (resident)
        pl.BlockSpec((1, D_OUT), lambda i: (0, 0), **pkw),         # b2
    ]
    out_spec = pl.BlockSpec((tb_eff, D_OUT), lambda i: (i, 0))
    return in_specs, out_spec


def _run(x, params, tb_eff, single_buffer_params):
    w1_t, b1_2d, w2_t, b2_2d = params
    B = x.shape[0]
    in_specs, out_spec = _build_in_specs(tb_eff, single_buffer_params)
    return pl.pallas_call(
        _mlp_kernel,
        out_shape=jax.ShapeDtypeStruct((B, D_OUT), x.dtype),
        grid_spec=pltpu.PrefetchScalarGridSpec(
            num_scalar_prefetch=0,
            grid=(pl.cdiv(B, tb_eff),),      # ragged: last partial block is masked
            in_specs=in_specs,
            out_specs=out_spec,
        ),
        compiler_params=pltpu.CompilerParams(
            dimension_semantics=("parallel",),
            vmem_limit_bytes=32 * 1024 * 1024,   # covers v5e's 16 MiB scoped default
        ),
    )(x, w1_t, b1_2d, w2_t, b2_2d)


def tsfm_forward_prepared(x, params, *, tb=512):
    """Forward pass given already-prepared (transposed, bf16) params.
    x: (B, 768), any float dtype; output is (B, 512) in x.dtype."""
    tb_eff = _choose_tb(x.shape[0], tb)
    try:
        return _run(x, params, tb_eff, single_buffer_params=True)
    except Exception:
        # Fallback for jax builds where pipeline_mode=pl.Buffered(1) is not
        # supported by the main TPU pipeline; default double-buffering still
        # fits comfortably (<10 MiB at tb=512).
        return _run(x, params, tb_eff, single_buffer_params=False)


def tsfm_forward(x, w1, b1, w2, b2, *, tb=512):
    """Convenience wrapper taking raw PyTorch-layout params.
    For repeated calls, call prepare_params() once and reuse the result."""
    return tsfm_forward_prepared(x, prepare_params(w1, b1, w2, b2), tb=tb)


def _init_params(key):
    """Deterministic synthetic init matching nn.Linear shapes (out, in)."""
    k1, k2, k3, k4 = jax.random.split(key, 4)
    s1 = 1.0 / jnp.sqrt(jnp.float32(D_IN))
    s2 = 1.0 / jnp.sqrt(jnp.float32(D_HID))
    w1 = jax.random.uniform(k1, (D_HID, D_IN), jnp.float32, -s1, s1)
    b1 = jax.random.uniform(k2, (D_HID,), jnp.float32, -s1, s1)
    w2 = jax.random.uniform(k3, (D_OUT, D_HID), jnp.float32, -s2, s2)
    b2 = jax.random.uniform(k4, (D_OUT,), jnp.float32, -s2, s2)
    return w1, b1, w2, b2


if __name__ == "__main__":
    key = jax.random.PRNGKey(0)
    kx, kp = jax.random.split(key)

    w1, b1, w2, b2 = _init_params(kp)
    params = prepare_params(w1, b1, w2, b2)   # transpose + bf16 cast, once

    def ref_bf16(x):
        # Reference matching the kernel's bf16 rounding of x / weights / hidden act
        # (MXU computes bf16 products exactly and accumulates in f32).
        xb = x.astype(jnp.bfloat16).astype(jnp.float32)
        w1b = w1.astype(jnp.bfloat16).astype(jnp.float32)
        w2b = w2.astype(jnp.bfloat16).astype(jnp.float32)
        h = jnp.maximum(xb @ w1b.T + b1, 0.0).astype(jnp.bfloat16).astype(jnp.float32)
        return h @ w2b.T + b2

    def ref_f32(x):
        return jnp.maximum(x @ w1.T + b1, 0.0) @ w2.T + b2

    # --- exact-tile batch ---
    B = 16
    x = jax.random.normal(kx, (B, D_IN), jnp.float32)
    out = jax.block_until_ready(tsfm_forward_prepared(x, params))
    assert out.shape == (B, D_OUT) and out.dtype == x.dtype
    err_b = float(jnp.max(jnp.abs(out - ref_bf16(x))))
    assert jnp.allclose(out, ref_bf16(x), atol=2e-3, rtol=2e-3), err_b
    # Loose parity against the pure-f32 PyTorch semantics (bf16 quantization error).
    err_f = float(jnp.max(jnp.abs(out - ref_f32(x))))
    assert jnp.allclose(out, ref_f32(x), atol=6e-2, rtol=0.0), err_f

    # --- ragged batch (not a multiple of the 16-row tile) exercises block masking ---
    B2 = 20
    x2 = jax.random.normal(kx, (B2, D_IN), jnp.float32)
    out2 = jax.block_until_ready(tsfm_forward_prepared(x2, params))
    assert out2.shape == (B2, D_OUT)
    assert jnp.allclose(out2, ref_bf16(x2), atol=2e-3, rtol=2e-3), float(
        jnp.max(jnp.abs(out2 - ref_bf16(x2)))
    )

    print("KERNEL_OK")
</pallas_src>

<mosaic_0001>
module attributes {stable_mosaic.version = 11 : i64} {
  func.func @_mlp_kernel(%arg0: i32, %arg1: memref<16x768xf32, #tpu.memory_space<vmem>>, %arg2: memref<768x768xbf16, #tpu.memory_space<vmem>>, %arg3: memref<1x768xf32, #tpu.memory_space<vmem>>, %arg4: memref<768x512xbf16, #tpu.memory_space<vmem>>, %arg5: memref<1x512xf32, #tpu.memory_space<vmem>>, %arg6: memref<16x512xf32, #tpu.memory_space<vmem>>) attributes {dimension_semantics = [#tpu.dimension_semantics<parallel>], iteration_bounds = array<i64: 1>, scalar_prefetch = 0 : i64, scratch_operands = 0 : i64, tpu.core_type = #tpu.core_type<tc>, window_params = [{transform_indices = @transform_0, window_bounds = array<i64: 16, 768>}, {pipeline_mode = #tpu.pipeline_mode<synchronous>, transform_indices = @transform_1, window_bounds = array<i64: 768, 768>}, {pipeline_mode = #tpu.pipeline_mode<synchronous>, transform_indices = @transform_2, window_bounds = array<i64: 1, 768>}, {pipeline_mode = #tpu.pipeline_mode<synchronous>, transform_indices = @transform_3, window_bounds = array<i64: 768, 512>}, {pipeline_mode = #tpu.pipeline_mode<synchronous>, transform_indices = @transform_4, window_bounds = array<i64: 1, 512>}, {transform_indices = @transform_5, window_bounds = array<i64: 16, 512>}]} {
    %c0 = arith.constant 0 : index
    %c0_0 = arith.constant 0 : index
    %0 = vector.load %arg1[%c0, %c0_0] : memref<16x768xf32, #tpu.memory_space<vmem>>, vector<16x768xf32>
    %1 = arith.truncf %0 : vector<16x768xf32> to vector<16x768xbf16>
    %c0_1 = arith.constant 0 : index
    %c0_2 = arith.constant 0 : index
    %2 = vector.load %arg2[%c0_1, %c0_2] : memref<768x768xbf16, #tpu.memory_space<vmem>>, vector<768x768xbf16>
    %cst = arith.constant dense<0.000000e+00> : vector<16x768xf32>
    %3 = tpu.matmul %1, %2, %cst {dimension_numbers = #tpu.dot_dimension_numbers<[1], [0], [0], [1], [0, 0, 1, 1], [], []>} : vector<16x768xbf16>, vector<768x768xbf16>, vector<16x768xf32> -> vector<16x768xf32>
    %c0_3 = arith.constant 0 : index
    %c0_4 = arith.constant 0 : index
    %4 = vector.load %arg3[%c0_3, %c0_4] : memref<1x768xf32, #tpu.memory_space<vmem>>, vector<1x768xf32>
    %5 = vector.broadcast %4 : vector<1x768xf32> to vector<16x768xf32>
    %6 = arith.addf %3, %5 : vector<16x768xf32>
    %cst_5 = arith.constant 0.000000e+00 : f32
    %7 = vector.broadcast %cst_5 : f32 to vector<16x768xf32>
    %8 = arith.maximumf %6, %7 : vector<16x768xf32>
    %9 = arith.truncf %8 : vector<16x768xf32> to vector<16x768xbf16>
    %c0_6 = arith.constant 0 : index
    %c0_7 = arith.constant 0 : index
    %10 = vector.load %arg4[%c0_6, %c0_7] : memref<768x512xbf16, #tpu.memory_space<vmem>>, vector<768x512xbf16>
    %cst_8 = arith.constant dense<0.000000e+00> : vector<16x512xf32>
    %11 = tpu.matmul %9, %10, %cst_8 {dimension_numbers = #tpu.dot_dimension_numbers<[1], [0], [0], [1], [0, 0, 1, 1], [], []>} : vector<16x768xbf16>, vector<768x512xbf16>, vector<16x512xf32> -> vector<16x512xf32>
    %c0_9 = arith.constant 0 : index
    %c0_10 = arith.constant 0 : index
    %12 = vector.load %arg5[%c0_9, %c0_10] : memref<1x512xf32, #tpu.memory_space<vmem>>, vector<1x512xf32>
    %13 = vector.broadcast %12 : vector<1x512xf32> to vector<16x512xf32>
    %14 = arith.addf %11, %13 : vector<16x512xf32>
    %c0_11 = arith.constant 0 : index
    %c0_12 = arith.constant 0 : index
    %15 = vector.load %arg6[%c0_11, %c0_12] : memref<16x512xf32, #tpu.memory_space<vmem>>, vector<16x512xf32>
    tpu.vector_store %arg6[%c0_11, %c0_12], %14 {strides = array<i32>} : memref<16x512xf32, #tpu.memory_space<vmem>>, vector<16x512xf32>,
    return
  }
  func.func @transform_0(%arg0: i32) -> (i32, i32) {
    %c0_i32 = arith.constant 0 : i32
    %c0_i32_0 = arith.constant 0 : i32
    return %arg0, %c0_i32 : i32, i32
  }
  func.func @transform_1(%arg0: i32) -> (i32, i32) {
    %c0_i32 = arith.constant 0 : i32
    %c0_i32_0 = arith.constant 0 : i32
    %c0_i32_1 = arith.constant 0 : i32
    return %c0_i32, %c0_i32_0 : i32, i32
  }
  func.func @transform_2(%arg0: i32) -> (i32, i32) {
    %c0_i32 = arith.constant 0 : i32
    %c0_i32_0 = arith.constant 0 : i32
    %c0_i32_1 = arith.constant 0 : i32
    return %c0_i32, %c0_i32_0 : i32, i32
  }
  func.func @transform_3(%arg0: i32) -> (i32, i32) {
    %c0_i32 = arith.constant 0 : i32
    %c0_i32_0 = arith.constant 0 : i32
    %c0_i32_1 = arith.constant 0 : i32
    return %c0_i32, %c0_i32_0 : i32, i32
  }
  func.func @transform_4(%arg0: i32) -> (i32, i32) {
    %c0_i32 = arith.constant 0 : i32
    %c0_i32_0 = arith.constant 0 : i32
    %c0_i32_1 = arith.constant 0 : i32
    return %c0_i32, %c0_i32_0 : i32, i32
  }
  func.func @transform_5(%arg0: i32) -> (i32, i32) {
    %c0_i32 = arith.constant 0 : i32
    %c0_i32_0 = arith.constant 0 : i32
    return %arg0, %c0_i32 : i32, i32
  }
}

module attributes {stable_mosaic.version = 11 : i64} {
  func.func @_mlp_kernel(%arg0: i32, %arg1: memref<16x768xf32, #tpu.memory_space<vmem>>, %arg2: memref<768x768xbf16, #tpu.memory_space<vmem>>, %arg3: memref<1x768xf32, #tpu.memory_space<vmem>>, %arg4: memref<768x512xbf16, #tpu.memory_space<vmem>>, %arg5: memref<1x512xf32, #tpu.memory_space<vmem>>, %arg6: memref<16x512xf32, #tpu.memory_space<vmem>>) attributes {dimension_semantics = [#tpu.dimension_semantics<parallel>], iteration_bounds = array<i64: 1>, scalar_prefetch = 0 : i64, scratch_operands = 0 : i64, tpu.core_type = #tpu.core_type<tc>, window_params = [{transform_indices = @transform_0, window_bounds = array<i64: 16, 768>}, {pipeline_mode = #tpu.pipeline_mode<synchronous>, transform_indices = @transform_1, window_bounds = array<i64: 768, 768>}, {pipeline_mode = #tpu.pipeline_mode<synchronous>, transform_indices = @transform_2, window_bounds = array<i64: 1, 768>}, {pipeline_mode = #tpu.pipeline_mode<synchronous>, transform_indices = @transform_3, window_bounds = array<i64: 768, 512>}, {pipeline_mode = #tpu.pipeline_mode<synchronous>, transform_indices = @transform_4, window_bounds = array<i64: 1, 512>}, {transform_indices = @transform_5, window_bounds = array<i64: 16, 512>}]} {
    %c0 = arith.constant 0 : index
    %c0_0 = arith.constant 0 : index
    %0 = vector.load %arg1[%c0, %c0_0] : memref<16x768xf32, #tpu.memory_space<vmem>>, vector<16x768xf32>
    %1 = arith.truncf %0 : vector<16x768xf32> to vector<16x768xbf16>
    %c0_1 = arith.constant 0 : index
    %c0_2 = arith.constant 0 : index
    %2 = vector.load %arg2[%c0_1, %c0_2] : memref<768x768xbf16, #tpu.memory_space<vmem>>, vector<768x768xbf16>
    %cst = arith.constant dense<0.000000e+00> : vector<16x768xf32>
    %3 = tpu.matmul %1, %2, %cst {dimension_numbers = #tpu.dot_dimension_numbers<[1], [0], [0], [1], [0, 0, 1, 1], [], []>} : vector<16x768xbf16>, vector<768x768xbf16>, vector<16x768xf32> -> vector<16x768xf32>
    %c0_3 = arith.constant 0 : index
    %c0_4 = arith.constant 0 : index
    %4 = vector.load %arg3[%c0_3, %c0_4] : memref<1x768xf32, #tpu.memory_space<vmem>>, vector<1x768xf32>
    %5 = vector.broadcast %4 : vector<1x768xf32> to vector<16x768xf32>
    %6 = arith.addf %3, %5 : vector<16x768xf32>
    %cst_5 = arith.constant 0.000000e+00 : f32
    %7 = vector.broadcast %cst_5 : f32 to vector<16x768xf32>
    %8 = arith.maximumf %6, %7 : vector<16x768xf32>
    %9 = arith.truncf %8 : vector<16x768xf32> to vector<16x768xbf16>
    %c0_6 = arith.constant 0 : index
    %c0_7 = arith.constant 0 : index
    %10 = vector.load %arg4[%c0_6, %c0_7] : memref<768x512xbf16, #tpu.memory_space<vmem>>, vector<768x512xbf16>
    %cst_8 = arith.constant dense<0.000000e+00> : vector<16x512xf32>
    %11 = tpu.matmul %9, %10, %cst_8 {dimension_numbers = #tpu.dot_dimension_numbers<[1], [0], [0], [1], [0, 0, 1, 1], [], []>} : vector<16x768xbf16>, vector<768x512xbf16>, vector<16x512xf32> -> vector<16x512xf32>
    %c0_9 = arith.constant 0 : index
    %c0_10 = arith.constant 0 : index
    %12 = vector.load %arg5[%c0_9, %c0_10] : memref<1x512xf32, #tpu.memory_space<vmem>>, vector<1x512xf32>
    %13 = vector.broadcast %12 : vector<1x512xf32> to vector<16x512xf32>
    %14 = arith.addf %11, %13 : vector<16x512xf32>
    %c0_11 = arith.constant 0 : index
    %c0_12 = arith.constant 0 : index
    %15 = vector.load %arg6[%c0_11, %c0_12] : memref<16x512xf32, #tpu.memory_space<vmem>>, vector<16x512xf32>
    tpu.vector_store %arg6[%c0_11, %c0_12], %14 {strides = array<i32>} : memref<16x512xf32, #tpu.memory_space<vmem>>, vector<16x512xf32>,
    return
  }
  func.func @transform_0(%arg0: i32) -> (i32, i32) {
    %c0_i32 = arith.constant 0 : i32
    %c0_i32_0 = arith.constant 0 : i32
    return %arg0, %c0_i32 : i32, i32
  }
  func.func @transform_1(%arg0: i32) -> (i32, i32) {
    %c0_i32 = arith.constant 0 : i32
    %c0_i32_0 = arith.constant 0 : i32
    %c0_i32_1 = arith.constant 0 : i32
    return %c0_i32, %c0_i32_0 : i32, i32
  }
  func.func @transform_2(%arg0: i32) -> (i32, i32) {
    %c0_i32 = arith.constant 0 : i32
    %c0_i32_0 = arith.constant 0 : i32
    %c0_i32_1 = arith.constant 0 : i32
    return %c0_i32, %c0_i32_0 : i32, i32
  }
  func.func @transform_3(%arg0: i32) -> (i32, i32) {
    %c0_i32 = arith.constant 0 : i32
    %c0_i32_0 = arith.constant 0 : i32
    %c0_i32_1 = arith.constant 0 : i32
    return %c0_i32, %c0_i32_0 : i32, i32
  }
  func.func @transform_4(%arg0: i32) -> (i32, i32) {
    %c0_i32 = arith.constant 0 : i32
    %c0_i32_0 = arith.constant 0 : i32
    %c0_i32_1 = arith.constant 0 : i32
    return %c0_i32, %c0_i32_0 : i32, i32
  }
  func.func @transform_5(%arg0: i32) -> (i32, i32) {
    %c0_i32 = arith.constant 0 : i32
    %c0_i32_0 = arith.constant 0 : i32
    return %arg0, %c0_i32 : i32, i32
  }
}

</mosaic_0001>

<bundles_post_ra>
// kernel: tpu_custom_call.1
= control target key start
LH: loop header
LB: loop body
LE: loop exit
PB: predicated region body
PF: predicated region fallthrough
CT: control target
= control target key end

     0   :  { %10 = vsyncpa [#allocation3], 0  ;;  %s5335_s0 = inlined_call_operand.hbm [shape: f32[16,768], index: 0, kind: input, shape index: {}]   ;;  %s5336_s1 = inlined_call_operand.hbm [shape: bf16[768,768], index: 1, kind: input, shape index: {}]   ;;  %s5337_s2 = inlined_call_operand.hbm [shape: f32[1,768], index: 2, kind: input, shape index: {}]   ;;  %s5338_s3 = inlined_call_operand.hbm [shape: bf16[768,512], index: 3, kind: input, shape index: {}]   ;;  %s5339_s4 = inlined_call_operand.hbm [shape: f32[1,512], index: 4, kind: input, shape index: {}]   ;;  %s5340_s5 = inlined_call_operand.hbm [shape: f32[16,512], index: 5, kind: output, shape index: {}]  }
   0x1   :  { %11 = vsyncpa [#allocation6], 0 }
   0x2   :  { %12 = vsyncpa [#allocation9], 0 }
   0x3   :  { %13 = vsyncpa [#allocation4], 0  ;;  %s5141_s18 = smov [#allocation5]   ;;  %s5001_s22 = scalar_lea.hbm %s5336_s1, 36864 }
   0x4   :  { %s31_s19 = sshll.u32 %s5141_s18, 4  ;;  %p5002_p0 = scmp.ne.s32.totalorder %s5336_s1, %s5001_s22  ;;  %s32_s19 = int_to_ptr.vmem [resolvable:$true] %s31_s19 }
   0x5   :  { %p5005_p1 = scmp.lt.u32.totalorder %s5001_s22, %s5336_s1 }
   0x7   :  { %p5007_p2 = pnand %p5005_p1, %p5002_p0 }
   0x9   :  { %5010 = shalt.err (!%p5007_p2)
}
   0xa   :  { %s5011_s27 = scalar_lea.vmem %s32_s19, 36864  ;;  %p5016_p4 = scmp.lt.s32.totalorder %s32_s19, %s32_s19 }
   0xb   :  { %p5012_p3 = scmp.ne.s32.totalorder %s32_s19, %s5011_s27  ;;  %p5017_p5 = scmp.lt.s32.totalorder %s5011_s27, %s5011_s27 }
   0xd   :  { %p5018_p6 = por %p5017_p5, %p5016_p4 }
   0xf   :  { %p5019_p7 = pnand %p5018_p6, %p5012_p3 }
  0x11   :  { %5022 = shalt.err (!%p5019_p7)
}
  0x12   :  { %s5142_s28 = smov 384   ;;  %s5143_s29 = smov 24  }
  0x13   :  { %37 = dma.hbm_to_vmem [thread:$0]  %s5336_s1, 36864, %s32_s19, [#allocation6], %s5142_s28, %s5142_s28, %s5143_s29  }
  0x14   :  { %s5144_s7 = smov [#allocation8]   ;;  %s5023_s11 = scalar_lea.hbm %s5338_s3, 24576 }
  0x15   :  { %s53_s8 = sshll.u32 %s5144_s7, 4  ;;  %p5024_p8 = scmp.ne.s32.totalorder %s5338_s3, %s5023_s11  ;;  %s54_s8 = int_to_ptr.vmem [resolvable:$true] %s53_s8 }
  0x16   :  { %p5027_p9 = scmp.lt.u32.totalorder %s5023_s11, %s5338_s3 }
  0x18   :  { %p5029_p10 = pnand %p5027_p9, %p5024_p8 }
  0x1a   :  { %5032 = shalt.err (!%p5029_p10)
}
  0x1b   :  { %s5033_s16 = scalar_lea.vmem %s54_s8, 24576  ;;  %p5038_p12 = scmp.lt.s32.totalorder %s54_s8, %s54_s8 }
  0x1c   :  { %p5034_p11 = scmp.ne.s32.totalorder %s54_s8, %s5033_s16  ;;  %p5039_p13 = scmp.lt.s32.totalorder %s5033_s16, %s5033_s16 }
  0x1e   :  { %p5040_p0 = por %p5039_p13, %p5038_p12 }
  0x20   :  { %p5041_p1 = pnand %p5040_p0, %p5034_p11 }
  0x22   :  { %5044 = shalt.err (!%p5041_p1)
}
  0x23   :  { %s5145_s1 = smov 256   ;;  %s5146_s17 = smov 16  }
  0x24   :  { %59 = dma.hbm_to_vmem [thread:$0]  %s5338_s3, 24576, %s54_s8, [#allocation9], %s5145_s1, %s5145_s1, %s5146_s17  }
  0x25   :  { %s5147_s20 = smov [#allocation2]   ;;  %s5045_s24 = scalar_lea.hbm %s5335_s0, 1536 }
  0x26   :  { %s19_s21 = sshll.u32 %s5147_s20, 4  ;;  %p5046_p2 = scmp.ne.s32.totalorder %s5335_s0, %s5045_s24  ;;  %s20_s21 = int_to_ptr.vmem [resolvable:$true] %s19_s21 }
  0x27   :  { %p5049_p3 = scmp.lt.u32.totalorder %s5045_s24, %s5335_s0 }
  0x29   :  { %p5051_p4 = pnand %p5049_p3, %p5046_p2 }
  0x2b   :  { %5054 = shalt.err (!%p5051_p4)
}
  0x2c   :  { %s5055_s29 = scalar_lea.vmem %s20_s21, 1536  ;;  %p5060_p6 = scmp.lt.s32.totalorder %s20_s21, %s20_s21 }
  0x2d   :  { %p5056_p5 = scmp.ne.s32.totalorder %s20_s21, %s5055_s29  ;;  %p5061_p7 = scmp.lt.s32.totalorder %s5055_s29, %s5055_s29 }
  0x2f   :  { %p5062_p8 = por %p5061_p7, %p5060_p6 }
  0x31   :  { %p5063_p9 = pnand %p5062_p8, %p5056_p5 }
  0x33   :  { %5066 = shalt.err (!%p5063_p9)
}
  0x34   :  { %s5148_s3 = smov 768   ;;  %s5149_s30 = smov 48  }
  0x35   :  { %25 = dma.hbm_to_vmem [thread:$0]  %s5335_s0, 1536, %s20_s21, [#allocation3], %s5148_s3, %s5148_s3, %s5149_s30  }
  0x36   :  { %s5150_s8 = smov [#allocation7]   ;;  %s5151_s10 = smov [#allocation10]  }
  0x37   :  { %s44_s9 = sshll.u32 %s5150_s8, 4  ;;  %s66_s11 = sshll.u32 %s5151_s10, 4  ;;  %s45_s9 = int_to_ptr.vmem [resolvable:$true] %s44_s9  ;;  %s67_s11 = int_to_ptr.vmem [resolvable:$true] %s66_s11 }
  0x38   :  { %s5067_s14 = scalar_lea.hbm %s5337_s2, 96 }
  0x39   :  { %p5068_p10 = scmp.ne.s32.totalorder %s5337_s2, %s5067_s14  ;;  %p5071_p11 = scmp.lt.u32.totalorder %s5067_s14, %s5337_s2 }
  0x3b   :  { %p5073_p12 = pnand %p5071_p11, %p5068_p10 }
  0x3d   :  { %5076 = shalt.err (!%p5073_p12)
}
  0x3e   :  { %s5077_s0 = scalar_lea.vmem %s45_s9, 96  ;;  %p5082_p0 = scmp.lt.s32.totalorder %s45_s9, %s45_s9 }
  0x3f   :  { %p5078_p13 = scmp.ne.s32.totalorder %s45_s9, %s5077_s0  ;;  %p5083_p1 = scmp.lt.s32.totalorder %s5077_s0, %s5077_s0 }
  0x41   :  { %p5084_p2 = por %p5083_p1, %p5082_p0 }
  0x43   :  { %p5085_p3 = pnand %p5084_p2, %p5078_p13 }
  0x45   :  { %5088 = shalt.err (!%p5085_p3)
}
  0x46   :  { %47 = dma.hbm_to_vmem [thread:$0]  %s5337_s2, 96, %s45_s9, [#allocation6]  }
  0x47   :  { %s5089_s22 = scalar_lea.hbm %s5339_s4, 64 }
  0x48   :  { %p5090_p4 = scmp.ne.s32.totalorder %s5339_s4, %s5089_s22  ;;  %p5093_p5 = scmp.lt.u32.totalorder %s5089_s22, %s5339_s4 }
  0x4a   :  { %p5095_p6 = pnand %p5093_p5, %p5090_p4 }
  0x4c   :  { %5098 = shalt.err (!%p5095_p6)
}
  0x4d   :  { %s5099_s27 = scalar_lea.vmem %s67_s11, 64  ;;  %p5104_p8 = scmp.lt.s32.totalorder %s67_s11, %s67_s11 }
  0x4e   :  { %p5100_p7 = scmp.ne.s32.totalorder %s67_s11, %s5099_s27  ;;  %p5105_p9 = scmp.lt.s32.totalorder %s5099_s27, %s5099_s27 }
  0x50   :  { %p5106_p10 = por %p5105_p9, %p5104_p8 }
  0x52   :  { %p5107_p11 = pnand %p5106_p10, %p5100_p7 }
  0x54   :  { %5110 = shalt.err (!%p5107_p11)
}
  0x55   :  { %69 = dma.hbm_to_vmem [thread:$0]  %s5339_s4, 64, %s67_s11, [#allocation9]  }
  0x56   :  { %5133 = dma.done.wait [#allocation3], 1536  }
  0x57   :  { %5134 = vsyncadd [#allocation3], 4294965760 }
  0x58   :  { %5135 = dma.done.wait [#allocation6], 36960  }
  0x59   :  { %5136 = vsyncadd [#allocation6], 4294930336 }
  0x5a   :  { %5137 = dma.done.wait [#allocation9], 24640  }
  0x5b   :  { %5138 = vsyncadd [#allocation9], 4294942656  ;;  %v4281_v0 = vld [vmem:[#allocation5 + $0x4] ss:$24 sps:$4 sm:$0xff]   ;;  %v4285_v2 = vld [vmem:[#allocation5] ss:$24 sps:$4 sm:$0xff]  }
  0x5c   :  { %v4283_v1 = vld [vmem:[#allocation5 + $0x304] ss:$24 sps:$4 sm:$0xff]   ;;  %1863 = vmatprep.subr.bf16.mxu1 %v4281_v0  ;;  %v4286_v3 = vld [vmem:[#allocation5 + $0x300] ss:$24 sps:$4 sm:$0xff]   ;;  %v4287_v4 = vld [vmem:[#allocation5 + $0x34] ss:$24 sps:$4 sm:$0xff]  }
  0x5d   :  { %1906 = vmatprep.subr.bf16.mxu0 %v4283_v1  ;;  %1864 = vmatpush1.bf16.msra.mxu1 %v4285_v2  ;;  %v4289_v5 = vld [vmem:[#allocation5 + $0x334] ss:$24 sps:$4 sm:$0xff]   ;;  %v4291_v6 = vld [vmem:[#allocation5 + $0x30] ss:$24 sps:$4 sm:$0xff]   ;;  %v4293_v8 = vld [vmem:[#allocation5 + $0x64] ss:$24 sps:$4 sm:$0xff]  }
  0x5e   :  { %1907 = vmatpush1.bf16.msra.mxu0 %v4286_v3  ;;  %1865 = vmatprep.subr.bf16.mxu1 %v4287_v4  ;;  %v4292_v7 = vld [vmem:[#allocation5 + $0x330] ss:$24 sps:$4 sm:$0xff]   ;;  %v4295_v9 = vld [vmem:[#allocation5 + $0x364] ss:$24 sps:$4 sm:$0xff]   ;;  %v4297_v10 = vld [vmem:[#allocation5 + $0x60] ss:$24 sps:$4 sm:$0xff]  }
  0x5f   :  { %1908 = vmatprep.subr.bf16.mxu0 %v4289_v5  ;;  %v4298_v11 = vld [vmem:[#allocation5 + $0x360] ss:$24 sps:$4 sm:$0xff]   ;;  %v4299_v12 = vld [vmem:[#allocation5 + $0x94] ss:$24 sps:$4 sm:$0xff]   ;;  %v4303_v14 = vld [vmem:[#allocation5 + $0x90] ss:$24 sps:$4 sm:$0xff]  }
  0x60   :  { %v4301_v13 = vld [vmem:[#allocation5 + $0x394] ss:$24 sps:$4 sm:$0xff]   ;;  %v4304_v15 = vld [vmem:[#allocation5 + $0x390] ss:$24 sps:$4 sm:$0xff]   ;;  %v4305_v16 = vld [vmem:[#allocation5 + $0xc4] ss:$24 sps:$4 sm:$0xff]  }
  0x61   :  { %1866 = vmatpush1.bf16.msra.mxu1 %v4291_v6  ;;  %v4307_v17 = vld [vmem:[#allocation5 + $0x3c4] ss:$24 sps:$4 sm:$0xff]   ;;  %v4309_v18 = vld [vmem:[#allocation5 + $0xc0] ss:$24 sps:$4 sm:$0xff]   ;;  %v4311_v20 = vld [vmem:[#allocation5 + $0xf4] ss:$24 sps:$4 sm:$0xff]  }
  0x62   :  { %1909 = vmatpush1.bf16.msra.mxu0 %v4292_v7  ;;  %1867 = vmatprep.subr.bf16.mxu1 %v4293_v8  ;;  %v4310_v19 = vld [vmem:[#allocation5 + $0x3c0] ss:$24 sps:$4 sm:$0xff]   ;;  %v4313_v21 = vld [vmem:[#allocation5 + $0x3f4] ss:$24 sps:$4 sm:$0xff]   ;;  %v4315_v22 = vld [vmem:[#allocation5 + $0xf0] ss:$24 sps:$4 sm:$0xff]  }
  0x63   :  { %1910 = vmatprep.subr.bf16.mxu0 %v4295_v9  ;;  %v4316_v23 = vld [vmem:[#allocation5 + $0x3f0] ss:$24 sps:$4 sm:$0xff]   ;;  %v4317_v24 = vld [vmem:[#allocation5 + $0x124] ss:$24 sps:$4 sm:$0xff]   ;;  %v4321_v26 = vld [vmem:[#allocation5 + $0x120] ss:$24 sps:$4 sm:$0xff]  }
  0x64   :  { %v4319_v25 = vld [vmem:[#allocation5 + $0x424] ss:$24 sps:$4 sm:$0xff]   ;;  %v4322_v27 = vld [vmem:[#allocation5 + $0x420] ss:$24 sps:$4 sm:$0xff]   ;;  %v4323_v28 = vld [vmem:[#allocation5 + $0x154] ss:$24 sps:$4 sm:$0xff]  }
  0x65   :  { %1868 = vmatpush1.bf16.msra.mxu1 %v4297_v10  ;;  %v4325_v29 = vld [vmem:[#allocation5 + $0x454] ss:$24 sps:$4 sm:$0xff]   ;;  %v4327_v30 = vld [vmem:[#allocation5 + $0x150] ss:$24 sps:$4 sm:$0xff]   ;;  %v4329_v32 = vld [vmem:[#allocation5 + $0x184] ss:$24 sps:$4 sm:$0xff]  }
  0x66   :  { %1911 = vmatpush1.bf16.msra.mxu0 %v4298_v11  ;;  %1869 = vmatprep.subr.bf16.mxu1 %v4299_v12  ;;  %v4328_v31 = vld [vmem:[#allocation5 + $0x450] ss:$24 sps:$4 sm:$0xff]   ;;  %v4331_v33 = vld [vmem:[#allocation5 + $0x484] ss:$24 sps:$4 sm:$0xff]   ;;  %v4333_v34 = vld [vmem:[#allocation5 + $0x180] ss:$24 sps:$4 sm:$0xff]  }
  0x67   :  { %1912 = vmatprep.subr.bf16.mxu0 %v4301_v13  ;;  %v4334_v35 = vld [vmem:[#allocation5 + $0x480] ss:$24 sps:$4 sm:$0xff]   ;;  %v4335_v36 = vld [vmem:[#allocation5 + $0x1b4] ss:$24 sps:$4 sm:$0xff]   ;;  %v4339_v38 = vld [vmem:[#allocation5 + $0x1b0] ss:$24 sps:$4 sm:$0xff]  }
  0x68   :  { %v4337_v37 = vld [vmem:[#allocation5 + $0x4b4] ss:$24 sps:$4 sm:$0xff]   ;;  %v4340_v39 = vld [vmem:[#allocation5 + $0x4b0] ss:$24 sps:$4 sm:$0xff]   ;;  %v4341_v40 = vld [vmem:[#allocation5 + $0x1e4] ss:$24 sps:$4 sm:$0xff]  }
  0x69   :  { %1870 = vmatpush1.bf16.msra.mxu1 %v4303_v14  ;;  %v4343_v41 = vld [vmem:[#allocation5 + $0x4e4] ss:$24 sps:$4 sm:$0xff]   ;;  %v4345_v42 = vld [vmem:[#allocation5 + $0x1e0] ss:$24 sps:$4 sm:$0xff]   ;;  %v4347_v44 = vld [vmem:[#allocation5 + $0x214] ss:$24 sps:$4 sm:$0xff]  }
  0x6a   :  { %1913 = vmatpush1.bf16.msra.mxu0 %v4304_v15  ;;  %1871 = vmatprep.subr.bf16.mxu1 %v4305_v16  ;;  %v4346_v43 = vld [vmem:[#allocation5 + $0x4e0] ss:$24 sps:$4 sm:$0xff]   ;;  %v4349_v45 = vld [vmem:[#allocation5 + $0x514] ss:$24 sps:$4 sm:$0xff]   ;;  %v4351_v47 = vld [vmem:[#allocation5 + $0x210] ss:$24 sps:$4 sm:$0xff]  }
  0x6b   :  { %1914 = vmatprep.subr.bf16.mxu0 %v4307_v17  ;;  %v86_v46 = vld [vmem:[#allocation2 + $0x8] sm:$0xff]  ;;  %v92_v49 = vld [vmem:[#allocation2 + $0x38] sm:$0xff]  ;;  %v85_v6 = vld [vmem:[#allocation2] sm:$0xff]  ;;  %s5152_s4 = smov [#allocation11]  }
  0x6c   :  { %v4352_v48 = vld [vmem:[#allocation5 + $0x510] ss:$24 sps:$4 sm:$0xff]   ;;  %v5245_v50 = vpack.c.bf16 %v92_v49, %v86_v46  ;;  %v88_v51 = vld [vmem:[#allocation2 + $0x18] sm:$0xff]  ;;  %v4359_v58 = vld [vmem:[#allocation5 + $0x274] ss:$24 sps:$4 sm:$0xff]   ;;  %s3713_s29 = sshll.u32 %s5152_s4, 4  ;;  %s3714_s29 = int_to_ptr.vmem [resolvable:$true] %s3713_s29 }
  0x6d   :  { %1872 = vmatpush1.bf16.msra.mxu1 %v4309_v18  ;;  %v94_v52 = vld [vmem:[#allocation2 + $0x48] sm:$0xff]  ;;  %v4353_v53 = vld [vmem:[#allocation5 + $0x244] ss:$24 sps:$4 sm:$0xff]   ;;  %v4357_v56 = vld [vmem:[#allocation5 + $0x240] ss:$24 sps:$4 sm:$0xff]   ;;  %s5111_s3 = scalar_lea.vmem %s3714_s29, 1024  ;;  %p5116_p13 = scmp.lt.s32.totalorder %s3714_s29, %s3714_s29 }
  0x6e   :  { %1915 = vmatpush1.bf16.msra.mxu0 %v4310_v19  ;;  %1873 = vmatprep.subr.bf16.mxu1 %v4311_v20  ;;  %v4355_v54 = vld [vmem:[#allocation5 + $0x544] ss:$24 sps:$4 sm:$0xff]   ;;  %v5247_v55 = vpack.c.bf16 %v94_v52, %v88_v51  ;;  %v4358_v57 = vld [vmem:[#allocation5 + $0x540] ss:$24 sps:$4 sm:$0xff]   ;;  %v4361_v59 = vld [vmem:[#allocation5 + $0x574] ss:$24 sps:$4 sm:$0xff]   ;;  %p5112_p12 = scmp.ne.s32.totalorder %s3714_s29, %s5111_s3  ;;  %p5117_p0 = scmp.lt.s32.totalorder %s5111_s3, %s5111_s3 }
  0x6f   :  { %1916 = vmatprep.subr.bf16.mxu0 %v4313_v21  ;;  %1895 = vmatprep.mubr.bf16.mxu1 %v5245_v50  ;;  %v4363_v60 = vld [vmem:[#allocation5 + $0x270] ss:$24 sps:$4 sm:$0xff]   ;;  %v4365_v62 = vld [vmem:[#allocation5 + $0x2a4] ss:$24 sps:$4 sm:$0xff]   ;;  %v4369_v0 = vld [vmem:[#allocation5 + $0x2a0] ss:$24 sps:$4 sm:$0xff]  }
  0x70   :  { %1938 = vmatprep.mubr.bf16.mxu0 %v5247_v55  ;;  %v4364_v61 = vld [vmem:[#allocation5 + $0x570] ss:$24 sps:$4 sm:$0xff]   ;;  %v4367_v63 = vld [vmem:[#allocation5 + $0x5a4] ss:$24 sps:$4 sm:$0xff]   ;;  %v4370_v1 = vld [vmem:[#allocation5 + $0x5a0] ss:$24 sps:$4 sm:$0xff]   ;;  %p5118_p1 = por %p5117_p0, %p5116_p13 }
  0x71   :  { %1874 = vmatpush1.bf16.msra.mxu1 %v4315_v22  ;;  %v4371_v2 = vld [vmem:[#allocation5 + $0x2d4] ss:$24 sps:$4 sm:$0xff]   ;;  %v4375_v4 = vld [vmem:[#allocation5 + $0x2d0] ss:$24 sps:$4 sm:$0xff]   ;;  %v4379_v8 = vld [vmem:[#allocation5 + $0x604] ss:$24 sps:$4 sm:$0xff]  }
  0x72   :  { %1917 = vmatpush1.bf16.msra.mxu0 %v4316_v23  ;;  %1875 = vmatprep.subr.bf16.mxu1 %v4317_v24  ;;  %v4373_v3 = vld [vmem:[#allocation5 + $0x5d4] ss:$24 sps:$4 sm:$0xff]   ;;  %v4376_v5 = vld [vmem:[#allocation5 + $0x5d0] ss:$24 sps:$4 sm:$0xff]   ;;  %v93_v10 = vld [vmem:[#allocation2 + $0x40] sm:$0xff]  ;;  %p5119_p2 = pnand %p5118_p1, %p5112_p12 }
  0x73   :  { %1918 = vmatprep.subr.bf16.mxu0 %v4319_v25  ;;  %v91_v7 = vld [vmem:[#allocation2 + $0x30] sm:$0xff]  ;;  %v4382_v11 = vld [vmem:[#allocation5 + $0xc] ss:$24 sps:$4 sm:$0xff]   ;;  %v4377_v13 = vld [vmem:[#allocation5 + $0x600] ss:$24 sps:$4 sm:$0xff]  }
  0x74   :  { %v87_v9 = vld [vmem:[#allocation2 + $0x10] sm:$0xff]  ;;  %v5251_v12 = vpack.c.bf16 %v91_v7, %v85_v6  ;;  %v4380_v14 = vld [vmem:[#allocation5 + $0x8] ss:$24 sps:$4 sm:$0xff]   ;;  %v4391_v20 = vld [vmem:[#allocation5 + $0x664] ss:$24 sps:$4 sm:$0xff]  }
  0x75   :  { %1876 = vmatpush1.bf16.msra.mxu1 %v4321_v26  ;;  %v5253_v15 = vpack.c.bf16 %v93_v10, %v87_v9  ;;  %v4385_v16 = vld [vmem:[#allocation5 + $0x634] ss:$24 sps:$4 sm:$0xff]   ;;  %v4383_v18 = vld [vmem:[#allocation5 + $0x630] ss:$24 sps:$4 sm:$0xff]   ;;  %v4389_v22 = vld [vmem:[#allocation5 + $0x660] ss:$24 sps:$4 sm:$0xff]  }
  0x76   :  { %1919 = vmatpush1.bf16.msra.mxu0 %v4322_v27  ;;  %1877 = vmatprep.subr.bf16.mxu1 %v4323_v28  ;;  %v4388_v17 = vld [vmem:[#allocation5 + $0x3c] ss:$24 sps:$4 sm:$0xff]   ;;  %v4386_v19 = vld [vmem:[#allocation5 + $0x38] ss:$24 sps:$4 sm:$0xff]   ;;  %v4394_v21 = vld [vmem:[#allocation5 + $0x6c] ss:$24 sps:$4 sm:$0xff]  }
  0x77   :  { %1920 = vmatprep.subr.bf16.mxu0 %v4325_v29  ;;  %v4392_v23 = vld [vmem:[#allocation5 + $0x68] ss:$24 sps:$4 sm:$0xff]   ;;  %v4397_v24 = vld [vmem:[#allocation5 + $0x694] ss:$24 sps:$4 sm:$0xff]   ;;  %v4398_v27 = vld [vmem:[#allocation5 + $0x98] ss:$24 sps:$4 sm:$0xff]  }
  0x78   :  { %v4400_v25 = vld [vmem:[#allocation5 + $0x9c] ss:$24 sps:$4 sm:$0xff]   ;;  %v4395_v26 = vld [vmem:[#allocation5 + $0x690] ss:$24 sps:$4 sm:$0xff]   ;;  %v4406_v29 = vld [vmem:[#allocation5 + $0xcc] ss:$24 sps:$4 sm:$0xff]  }
  0x79   :  { %1878 = vmatpush1.bf16.msra.mxu1 %v4327_v30  ;;  %v4403_v28 = vld [vmem:[#allocation5 + $0x6c4] ss:$24 sps:$4 sm:$0xff]   ;;  %v4401_v30 = vld [vmem:[#allocation5 + $0x6c0] ss:$24 sps:$4 sm:$0xff]   ;;  %v4433_v52 = vld [vmem:[#allocation5 + $0x7b4] ss:$24 sps:$4 sm:$0xff]  }
  0x7a   :  { %1921 = vmatpush1.bf16.msra.mxu0 %v4328_v31  ;;  %1879 = vmatprep.subr.bf16.mxu1 %v4329_v32  ;;  %v4404_v31 = vld [vmem:[#allocation5 + $0xc8] ss:$24 sps:$4 sm:$0xff]   ;;  %v4409_v32 = vld [vmem:[#allocation5 + $0x6f4] ss:$24 sps:$4 sm:$0xff]   ;;  %v4422_v46 = vld [vmem:[#allocation5 + $0x158] ss:$24 sps:$4 sm:$0xff]  }
  0x7b   :  { %1922 = vmatprep.subr.bf16.mxu0 %v4331_v33  ;;  %v4412_v33 = vld [vmem:[#allocation5 + $0xfc] ss:$24 sps:$4 sm:$0xff]   ;;  %v4425_v49 = vld [vmem:[#allocation5 + $0x780] ss:$24 sps:$4 sm:$0xff]   ;;  %v4455_v7 = vld [vmem:[#allocation5 + $0x870] ss:$24 sps:$4 sm:$0xff]  }
  0x7c   :  { %v4428_v51 = vld [vmem:[#allocation5 + $0x188] ss:$24 sps:$4 sm:$0xff]   ;;  %v4460_v6 = vld [vmem:[#allocation5 + $0x27c] ss:$24 sps:$4 sm:$0xff]   ;;  %v4466_v10 = vld [vmem:[#allocation5 + $0x2ac] ss:$24 sps:$4 sm:$0xff]  }
  0x7d   :  { %1880 = vmatpush1.bf16.msra.mxu1 %v4333_v34  ;;  %v4407_v34 = vld [vmem:[#allocation5 + $0x6f0] ss:$24 sps:$4 sm:$0xff]   ;;  %v4463_v9 = vld [vmem:[#allocation5 + $0x8a4] ss:$24 sps:$4 sm:$0xff]  }
  0x7e   :  { %1923 = vmatpush1.bf16.msra.mxu0 %v4334_v35  ;;  %1881 = vmatprep.subr.bf16.mxu1 %v4335_v36  ;;  %v4410_v35 = vld [vmem:[#allocation5 + $0xf8] ss:$24 sps:$4 sm:$0xff]   ;;  %v4415_v36 = vld [vmem:[#allocation5 + $0x724] ss:$24 sps:$4 sm:$0xff]  }
  0x7f   :  { %1924 = vmatprep.subr.bf16.mxu0 %v4337_v37  ;;  %v4418_v37 = vld [vmem:[#allocation5 + $0x12c] ss:$24 sps:$4 sm:$0xff]  }
  0x81   :  { %1882 = vmatpush1.bf16.msra.mxu1 %v4339_v38  ;;  %v4413_v38 = vld [vmem:[#allocation5 + $0x720] ss:$24 sps:$4 sm:$0xff]  }
  0x82   :  { %1925 = vmatpush1.bf16.msra.mxu0 %v4340_v39  ;;  %1883 = vmatprep.subr.bf16.mxu1 %v4341_v40  ;;  %v4416_v39 = vld [vmem:[#allocation5 + $0x128] ss:$24 sps:$4 sm:$0xff]   ;;  %v4421_v40 = vld [vmem:[#allocation5 + $0x754] ss:$24 sps:$4 sm:$0xff]  }
  0x83   :  { %1926 = vmatprep.subr.bf16.mxu0 %v4343_v41  ;;  %v90_v41 = vld [vmem:[#allocation2 + $0x28] sm:$0xff] }
  0x85   :  { %1884 = vmatpush1.bf16.msra.mxu1 %v4345_v42  ;;  %v96_v42 = vld [vmem:[#allocation2 + $0x58] sm:$0xff] }
  0x86   :  { %1927 = vmatpush1.bf16.msra.mxu0 %v4346_v43  ;;  %1885 = vmatprep.subr.bf16.mxu1 %v4347_v44  ;;  %v4424_v43 = vld [vmem:[#allocation5 + $0x15c] ss:$24 sps:$4 sm:$0xff]   ;;  %v5258_v44 = vpack.c.bf16 %v96_v42, %v90_v41  ;;  %v4500_v41 = vld [vmem:[#allocation5 + $0xd0] ss:$24 sps:$4 sm:$0xff]  }
  0x87   :  { %1928 = vmatprep.subr.bf16.mxu0 %v4349_v45  ;;  %v4419_v45 = vld [vmem:[#allocation5 + $0x750] ss:$24 sps:$4 sm:$0xff]   ;;  %v4508_v42 = vld [vmem:[#allocation5 + $0x104] ss:$24 sps:$4 sm:$0xff]  }
  0x89   :  { %1886 = vmatpush1.bf16.msra.mxu1 %v4351_v47  ;;  %v4427_v47 = vld [vmem:[#allocation5 + $0x784] ss:$24 sps:$4 sm:$0xff]  }
  0x8a   :  { %1929 = vmatpush1.bf16.msra.mxu0 %v4352_v48  ;;  %1887 = vmatprep.subr.bf16.mxu1 %v4353_v53  ;;  %v4430_v48 = vld [vmem:[#allocation5 + $0x18c] ss:$24 sps:$4 sm:$0xff]   ;;  %v4436_v53 = vld [vmem:[#allocation5 + $0x1bc] ss:$24 sps:$4 sm:$0xff]  }
  0x8b   :  { %1930 = vmatprep.subr.bf16.mxu0 %v4355_v54  ;;  %v4431_v54 = vld [vmem:[#allocation5 + $0x7b0] ss:$24 sps:$4 sm:$0xff]  }
  0x8d   :  { %1888 = vmatpush1.bf16.msra.mxu1 %v4357_v56  ;;  %v4434_v56 = vld [vmem:[#allocation5 + $0x1b8] ss:$24 sps:$4 sm:$0xff]  }
  0x8e   :  { %1931 = vmatpush1.bf16.msra.mxu0 %v4358_v57  ;;  %1889 = vmatprep.subr.bf16.mxu1 %v4359_v58  ;;  %v4439_v57 = vld [vmem:[#allocation5 + $0x7e4] ss:$24 sps:$4 sm:$0xff]  }
  0x8f   :  { %1932 = vmatprep.subr.bf16.mxu0 %v4361_v59  ;;  %v4442_v58 = vld [vmem:[#allocation5 + $0x1ec] ss:$24 sps:$4 sm:$0xff]   ;;  %v4437_v59 = vld [vmem:[#allocation5 + $0x7e0] ss:$24 sps:$4 sm:$0xff]  }
  0x91   :  { %1890 = vmatpush1.bf16.msra.mxu1 %v4363_v60  ;;  %v4440_v60 = vld [vmem:[#allocation5 + $0x1e8] ss:$24 sps:$4 sm:$0xff]  }
  0x92   :  { %1933 = vmatpush1.bf16.msra.mxu0 %v4364_v61  ;;  %1891 = vmatprep.subr.bf16.mxu1 %v4365_v62  ;;  %v4445_v61 = vld [vmem:[#allocation5 + $0x814] ss:$24 sps:$4 sm:$0xff]  }
  0x93   :  { %1934 = vmatprep.subr.bf16.mxu0 %v4367_v63  ;;  %v4448_v62 = vld [vmem:[#allocation5 + $0x21c] ss:$24 sps:$4 sm:$0xff]   ;;  %v4443_v63 = vld [vmem:[#allocation5 + $0x810] ss:$24 sps:$4 sm:$0xff]  }
  0x95   :  { %1892 = vmatpush1.bf16.msra.mxu1 %v4369_v0  ;;  %v4446_v0 = vld [vmem:[#allocation5 + $0x218] ss:$24 sps:$4 sm:$0xff]  }
  0x96   :  { %1935 = vmatpush1.bf16.msra.mxu0 %v4370_v1  ;;  %1893 = vmatprep.subr.bf16.mxu1 %v4371_v2  ;;  %v4451_v1 = vld [vmem:[#allocation5 + $0x844] ss:$24 sps:$4 sm:$0xff]  }
  0x97   :  { %1936 = vmatprep.subr.bf16.mxu0 %v4373_v3  ;;  %v4454_v2 = vld [vmem:[#allocation5 + $0x24c] ss:$24 sps:$4 sm:$0xff]   ;;  %v4449_v3 = vld [vmem:[#allocation5 + $0x840] ss:$24 sps:$4 sm:$0xff]  }
  0x99   :  { %1894 = vmatpush1.bf16.msra.mxu1 %v4375_v4  ;;  %v4452_v4 = vld [vmem:[#allocation5 + $0x248] ss:$24 sps:$4 sm:$0xff]  }
  0x9a   :  { %1937 = vmatpush1.bf16.msra.mxu0 %v4376_v5  ;;  %1992 = vmatprep.subr.bf16.mxu1 %v4382_v11  ;;  %v4457_v5 = vld [vmem:[#allocation5 + $0x874] ss:$24 sps:$4 sm:$0xff]   ;;  %v4461_v11 = vld [vmem:[#allocation5 + $0x8a0] ss:$24 sps:$4 sm:$0xff]  }
  0x9b   :  { %1949 = vmatprep.subr.bf16.mxu0 %v4379_v8  ;;  %v4458_v8 = vld [vmem:[#allocation5 + $0x278] ss:$24 sps:$4 sm:$0xff]  }
  0x9c   :  { %1896 = vmatmul.mubr.bf16.vlgmr.msra.gmra.mrb[0].mxu1 %v5251_v12 }
  0x9d   :  { %1939 = vmatmul.mubr.bf16.vlgmr.msra.gmra.mrb[0].mxu0 %v5253_v15  ;;  %1993 = vmatpush1.bf16.msra.mxu1 %v4380_v14  ;;  %v4469_v14 = vld [vmem:[#allocation5 + $0x8d4] ss:$24 sps:$4 sm:$0xff]  }
  0x9e   :  { %1950 = vmatpush1.bf16.msra.mxu0 %v4377_v13  ;;  %1994 = vmatprep.subr.bf16.mxu1 %v4388_v17  ;;  %v4464_v13 = vld [vmem:[#allocation5 + $0x2a8] ss:$24 sps:$4 sm:$0xff]  }
  0x9f   :  { %1951 = vmatprep.subr.bf16.mxu0 %v4385_v16  ;;  %2024 = vmatprep.mubr.bf16.mxu1 %v5245_v50  ;;  %v4472_v16 = vld [vmem:[#allocation5 + $0x2dc] ss:$24 sps:$4 sm:$0xff]   ;;  %v4467_v17 = vld [vmem:[#allocation5 + $0x8d0] ss:$24 sps:$4 sm:$0xff]  }
  0xa0   :  { %1981 = vmatprep.mubr.bf16.mxu0 %v5258_v44 }
  0xa1   :  { %1995 = vmatpush1.bf16.msra.mxu1 %v4386_v19  ;;  %v89_v19 = vld [vmem:[#allocation2 + $0x20] sm:$0xff] }
  0xa2   :  { %1952 = vmatpush1.bf16.msra.mxu0 %v4383_v18  ;;  %1996 = vmatprep.subr.bf16.mxu1 %v4394_v21  ;;  %v4470_v18 = vld [vmem:[#allocation5 + $0x2d8] ss:$24 sps:$4 sm:$0xff]   ;;  %v4475_v21 = vld [vmem:[#allocation5 + $0x30c] ss:$24 sps:$4 sm:$0xff]  }
  0xa3   :  { %1953 = vmatprep.subr.bf16.mxu0 %v4391_v20  ;;  %v95_v20 = vld [vmem:[#allocation2 + $0x50] sm:$0xff] }
  0xa5   :  { %1997 = vmatpush1.bf16.msra.mxu1 %v4392_v23  ;;  %v5261_v23 = vpack.c.bf16 %v95_v20, %v89_v19  ;;  %v4562_v19 = vld [vmem:[#allocation5 + $0x2b4] ss:$24 sps:$4 sm:$0xff]   ;;  %v4557_v20 = vld [vmem:[#allocation5 + $0x5a8] ss:$24 sps:$4 sm:$0xff]  }
  0xa6   :  { %1954 = vmatpush1.bf16.msra.mxu0 %v4389_v22  ;;  %1998 = vmatprep.subr.bf16.mxu1 %v4400_v25  ;;  %v4478_v22 = vld [vmem:[#allocation5 + $0x14] ss:$24 sps:$4 sm:$0xff]   ;;  %v4476_v25 = vld [vmem:[#allocation5 + $0x10] ss:$24 sps:$4 sm:$0xff]  }
  0xa7   :  { %1955 = vmatprep.subr.bf16.mxu0 %v4397_v24  ;;  %v4473_v24 = vld [vmem:[#allocation5 + $0x308] ss:$24 sps:$4 sm:$0xff]  }
  0xa9   :  { %1999 = vmatpush1.bf16.msra.mxu1 %v4398_v27  ;;  %v4484_v27 = vld [vmem:[#allocation5 + $0x44] ss:$24 sps:$4 sm:$0xff]  }
  0xaa   :  { %1956 = vmatpush1.bf16.msra.mxu0 %v4395_v26  ;;  %2000 = vmatprep.subr.bf16.mxu1 %v4406_v29  ;;  %v4481_v26 = vld [vmem:[#allocation5 + $0x33c] ss:$24 sps:$4 sm:$0xff]   ;;  %v4482_v29 = vld [vmem:[#allocation5 + $0x40] ss:$24 sps:$4 sm:$0xff]  }
  0xab   :  { %1957 = vmatprep.subr.bf16.mxu0 %v4403_v28  ;;  %v4479_v28 = vld [vmem:[#allocation5 + $0x338] ss:$24 sps:$4 sm:$0xff]  }
  0xad   :  { %2001 = vmatpush1.bf16.msra.mxu1 %v4404_v31  ;;  %v4490_v31 = vld [vmem:[#allocation5 + $0x74] ss:$24 sps:$4 sm:$0xff]  }
  0xae   :  { %1958 = vmatpush1.bf16.msra.mxu0 %v4401_v30  ;;  %2002 = vmatprep.subr.bf16.mxu1 %v4412_v33  ;;  %v4487_v30 = vld [vmem:[#allocation5 + $0x36c] ss:$24 sps:$4 sm:$0xff]   ;;  %v4488_v33 = vld [vmem:[#allocation5 + $0x70] ss:$24 sps:$4 sm:$0xff]  }
  0xaf   :  { %1959 = vmatprep.subr.bf16.mxu0 %v4409_v32  ;;  %v4485_v32 = vld [vmem:[#allocation5 + $0x368] ss:$24 sps:$4 sm:$0xff]  }
  0xb1   :  { %2003 = vmatpush1.bf16.msra.mxu1 %v4410_v35  ;;  %v4496_v35 = vld [vmem:[#allocation5 + $0xa4] ss:$24 sps:$4 sm:$0xff]  }
  0xb2   :  { %1960 = vmatpush1.bf16.msra.mxu0 %v4407_v34  ;;  %2004 = vmatprep.subr.bf16.mxu1 %v4418_v37  ;;  %v4493_v34 = vld [vmem:[#allocation5 + $0x39c] ss:$24 sps:$4 sm:$0xff]   ;;  %v4494_v37 = vld [vmem:[#allocation5 + $0xa0] ss:$24 sps:$4 sm:$0xff]  }
  0xb3   :  { %1961 = vmatprep.subr.bf16.mxu0 %v4415_v36  ;;  %v4491_v36 = vld [vmem:[#allocation5 + $0x398] ss:$24 sps:$4 sm:$0xff]  }
  0xb5   :  { %2005 = vmatpush1.bf16.msra.mxu1 %v4416_v39  ;;  %v4502_v39 = vld [vmem:[#allocation5 + $0xd4] ss:$24 sps:$4 sm:$0xff]  }
  0xb6   :  { %1962 = vmatpush1.bf16.msra.mxu0 %v4413_v38  ;;  %2006 = vmatprep.subr.bf16.mxu1 %v4424_v43  ;;  %v4499_v38 = vld [vmem:[#allocation5 + $0x3cc] ss:$24 sps:$4 sm:$0xff]   ;;  %v4503_v43 = vld [vmem:[#allocation5 + $0x3f8] ss:$24 sps:$4 sm:$0xff]  }
  0xb7   :  { %1963 = vmatprep.subr.bf16.mxu0 %v4421_v40  ;;  %v4497_v40 = vld [vmem:[#allocation5 + $0x3c8] ss:$24 sps:$4 sm:$0xff]  }
  0xb9   :  { %2007 = vmatpush1.bf16.msra.mxu1 %v4422_v46  ;;  %v4511_v46 = vld [vmem:[#allocation5 + $0x42c] ss:$24 sps:$4 sm:$0xff]  }
  0xba   :  { %1964 = vmatpush1.bf16.msra.mxu0 %v4419_v45  ;;  %2008 = vmatprep.subr.bf16.mxu1 %v4430_v48  ;;  %v4506_v45 = vld [vmem:[#allocation5 + $0x100] ss:$24 sps:$4 sm:$0xff]  }
  0xbb   :  { %1965 = vmatprep.subr.bf16.mxu0 %v4427_v47  ;;  %v4514_v47 = vld [vmem:[#allocation5 + $0x134] ss:$24 sps:$4 sm:$0xff]   ;;  %v4509_v48 = vld [vmem:[#allocation5 + $0x428] ss:$24 sps:$4 sm:$0xff]  }
  0xbd   :  { %2009 = vmatpush1.bf16.msra.mxu1 %v4428_v51  ;;  %v4517_v51 = vld [vmem:[#allocation5 + $0x45c] ss:$24 sps:$4 sm:$0xff]  }
  0xbe   :  { %1966 = vmatpush1.bf16.msra.mxu0 %v4425_v49  ;;  %2010 = vmatprep.subr.bf16.mxu1 %v4436_v53  ;;  %v4512_v49 = vld [vmem:[#allocation5 + $0x130] ss:$24 sps:$4 sm:$0xff]  }
  0xbf   :  { %1967 = vmatprep.subr.bf16.mxu0 %v4433_v52  ;;  %v4520_v52 = vld [vmem:[#allocation5 + $0x164] ss:$24 sps:$4 sm:$0xff]   ;;  %v4515_v53 = vld [vmem:[#allocation5 + $0x458] ss:$24 sps:$4 sm:$0xff]  }
  0xc1   :  { %2011 = vmatpush1.bf16.msra.mxu1 %v4434_v56  ;;  %v4523_v56 = vld [vmem:[#allocation5 + $0x48c] ss:$24 sps:$4 sm:$0xff]  }
  0xc2   :  { %1968 = vmatpush1.bf16.msra.mxu0 %v4431_v54  ;;  %2012 = vmatprep.subr.bf16.mxu1 %v4442_v58  ;;  %v4518_v54 = vld [vmem:[#allocation5 + $0x160] ss:$24 sps:$4 sm:$0xff]  }
  0xc3   :  { %1969 = vmatprep.subr.bf16.mxu0 %v4439_v57  ;;  %v4526_v57 = vld [vmem:[#allocation5 + $0x194] ss:$24 sps:$4 sm:$0xff]   ;;  %v4521_v58 = vld [vmem:[#allocation5 + $0x488] ss:$24 sps:$4 sm:$0xff]  }
  0xc5   :  { %2013 = vmatpush1.bf16.msra.mxu1 %v4440_v60  ;;  %v4529_v60 = vld [vmem:[#allocation5 + $0x4bc] ss:$24 sps:$4 sm:$0xff]  }
  0xc6   :  { %1970 = vmatpush1.bf16.msra.mxu0 %v4437_v59  ;;  %2014 = vmatprep.subr.bf16.mxu1 %v4448_v62  ;;  %v4524_v59 = vld [vmem:[#allocation5 + $0x190] ss:$24 sps:$4 sm:$0xff]  }
  0xc7   :  { %1971 = vmatprep.subr.bf16.mxu0 %v4445_v61  ;;  %v4532_v61 = vld [vmem:[#allocation5 + $0x1c4] ss:$24 sps:$4 sm:$0xff]   ;;  %v4527_v62 = vld [vmem:[#allocation5 + $0x4b8] ss:$24 sps:$4 sm:$0xff]  }
  0xc9   :  { %2015 = vmatpush1.bf16.msra.mxu1 %v4446_v0  ;;  %v4535_v0 = vld [vmem:[#allocation5 + $0x4ec] ss:$24 sps:$4 sm:$0xff]  }
  0xca   :  { %1972 = vmatpush1.bf16.msra.mxu0 %v4443_v63  ;;  %2016 = vmatprep.subr.bf16.mxu1 %v4454_v2  ;;  %v4530_v63 = vld [vmem:[#allocation5 + $0x1c0] ss:$24 sps:$4 sm:$0xff]  }
  0xcb   :  { %1973 = vmatprep.subr.bf16.mxu0 %v4451_v1  ;;  %v4538_v1 = vld [vmem:[#allocation5 + $0x1f4] ss:$24 sps:$4 sm:$0xff]   ;;  %v4533_v2 = vld [vmem:[#allocation5 + $0x4e8] ss:$24 sps:$4 sm:$0xff]  }
  0xcd   :  { %2017 = vmatpush1.bf16.msra.mxu1 %v4452_v4  ;;  %v4541_v4 = vld [vmem:[#allocation5 + $0x51c] ss:$24 sps:$4 sm:$0xff]  }
  0xce   :  { %1974 = vmatpush1.bf16.msra.mxu0 %v4449_v3  ;;  %2018 = vmatprep.subr.bf16.mxu1 %v4460_v6  ;;  %v4536_v3 = vld [vmem:[#allocation5 + $0x1f0] ss:$24 sps:$4 sm:$0xff]  }
  0xcf   :  { %1975 = vmatprep.subr.bf16.mxu0 %v4457_v5  ;;  %v4544_v5 = vld [vmem:[#allocation5 + $0x224] ss:$24 sps:$4 sm:$0xff]   ;;  %v4539_v6 = vld [vmem:[#allocation5 + $0x518] ss:$24 sps:$4 sm:$0xff]  }
  0xd1   :  { %2019 = vmatpush1.bf16.msra.mxu1 %v4458_v8  ;;  %v4547_v8 = vld [vmem:[#allocation5 + $0x54c] ss:$24 sps:$4 sm:$0xff]  }
  0xd2   :  { %1976 = vmatpush1.bf16.msra.mxu0 %v4455_v7  ;;  %2020 = vmatprep.subr.bf16.mxu1 %v4466_v10  ;;  %v4542_v7 = vld [vmem:[#allocation5 + $0x220] ss:$24 sps:$4 sm:$0xff]  }
  0xd3   :  { %1977 = vmatprep.subr.bf16.mxu0 %v4463_v9  ;;  %v4550_v9 = vld [vmem:[#allocation5 + $0x254] ss:$24 sps:$4 sm:$0xff]   ;;  %v4545_v10 = vld [vmem:[#allocation5 + $0x548] ss:$24 sps:$4 sm:$0xff]  }
  0xd5   :  { %2021 = vmatpush1.bf16.msra.mxu1 %v4464_v13  ;;  %v4553_v13 = vld [vmem:[#allocation5 + $0x57c] ss:$24 sps:$4 sm:$0xff]  }
  0xd6   :  { %1978 = vmatpush1.bf16.msra.mxu0 %v4461_v11  ;;  %2022 = vmatprep.subr.bf16.mxu1 %v4472_v16  ;;  %v4548_v11 = vld [vmem:[#allocation5 + $0x250] ss:$24 sps:$4 sm:$0xff]  }
  0xd7   :  { %1979 = vmatprep.subr.bf16.mxu0 %v4469_v14  ;;  %v4556_v14 = vld [vmem:[#allocation5 + $0x284] ss:$24 sps:$4 sm:$0xff]   ;;  %v4551_v16 = vld [vmem:[#allocation5 + $0x578] ss:$24 sps:$4 sm:$0xff]  }
  0xd9   :  { %2023 = vmatpush1.bf16.msra.mxu1 %v4470_v18  ;;  %v4559_v18 = vld [vmem:[#allocation5 + $0x5ac] ss:$24 sps:$4 sm:$0xff]  }
  0xda   :  { %1980 = vmatpush1.bf16.msra.mxu0 %v4467_v17  ;;  %2035 = vmatprep.subr.bf16.mxu1 %v4475_v21  ;;  %v4554_v17 = vld [vmem:[#allocation5 + $0x280] ss:$24 sps:$4 sm:$0xff]   ;;  %v4560_v21 = vld [vmem:[#allocation5 + $0x2b0] ss:$24 sps:$4 sm:$0xff]  }
  0xdb   :  { %2121 = vmatprep.subr.bf16.mxu0 %v4478_v22  ;;  %v4565_v22 = vld [vmem:[#allocation5 + $0x5dc] ss:$24 sps:$4 sm:$0xff]  }
  0xdc   :  { %2025 = vmatmul.mubr.bf16.vlgmr.msra.gmra.mrb[4].mxu1 %v5251_v12 }
  0xdd   :  { %1982 = vmatmul.mubr.bf16.vlgmr.msra.gmra.mrb[0].mxu0 %v5261_v23  ;;  %2036 = vmatpush1.bf16.msra.mxu1 %v4473_v24  ;;  %v4568_v24 = vld [vmem:[#allocation5 + $0x2e4] ss:$24 sps:$4 sm:$0xff]  }
  0xde   :  { %2122 = vmatpush1.bf16.msra.mxu0 %v4476_v25  ;;  %2037 = vmatprep.subr.bf16.mxu1 %v4481_v26  ;;  %v4563_v25 = vld [vmem:[#allocation5 + $0x5d8] ss:$24 sps:$4 sm:$0xff]  }
  0xdf   :  { %2123 = vmatprep.subr.bf16.mxu0 %v4484_v27  ;;  %2067 = vmatprep.mubr.bf16.mxu1 %v5247_v55  ;;  %v4566_v26 = vld [vmem:[#allocation5 + $0x2e0] ss:$24 sps:$4 sm:$0xff]   ;;  %v4571_v27 = vld [vmem:[#allocation5 + $0x60c] ss:$24 sps:$4 sm:$0xff]  }
  0xe0   :  { %2153 = vmatprep.mubr.bf16.mxu0 %v5245_v50  ;;  %v4505_v50 = vld [vmem:[#allocation5 + $0x3fc] ss:$24 sps:$4 sm:$0xff]  }
  0xe1   :  { %2038 = vmatpush1.bf16.msra.mxu1 %v4479_v28  ;;  %v4574_v28 = vld [vmem:[#allocation5 + $0x314] ss:$24 sps:$4 sm:$0xff]  }
  0xe2   :  { %2124 = vmatpush1.bf16.msra.mxu0 %v4482_v29  ;;  %2039 = vmatprep.subr.bf16.mxu1 %v4487_v30  ;;  %v4569_v29 = vld [vmem:[#allocation5 + $0x608] ss:$24 sps:$4 sm:$0xff]  }
  0xe3   :  { %2125 = vmatprep.subr.bf16.mxu0 %v4490_v31  ;;  %v4572_v30 = vld [vmem:[#allocation5 + $0x310] ss:$24 sps:$4 sm:$0xff]   ;;  %v4577_v31 = vld [vmem:[#allocation5 + $0x63c] ss:$24 sps:$4 sm:$0xff]  }
  0xe5   :  { %2040 = vmatpush1.bf16.msra.mxu1 %v4485_v32  ;;  %v4580_v32 = vld [vmem:[#allocation5 + $0x344] ss:$24 sps:$4 sm:$0xff]  }
  0xe6   :  { %2126 = vmatpush1.bf16.msra.mxu0 %v4488_v33  ;;  %2041 = vmatprep.subr.bf16.mxu1 %v4493_v34  ;;  %v4575_v33 = vld [vmem:[#allocation5 + $0x638] ss:$24 sps:$4 sm:$0xff]  }
  0xe7   :  { %2127 = vmatprep.subr.bf16.mxu0 %v4496_v35  ;;  %v4578_v34 = vld [vmem:[#allocation5 + $0x340] ss:$24 sps:$4 sm:$0xff]   ;;  %v4583_v35 = vld [vmem:[#allocation5 + $0x66c] ss:$24 sps:$4 sm:$0xff]  }
  0xe9   :  { %2042 = vmatpush1.bf16.msra.mxu1 %v4491_v36  ;;  %v4586_v36 = vld [vmem:[#allocation5 + $0x374] ss:$24 sps:$4 sm:$0xff]  }
  0xea   :  { %2128 = vmatpush1.bf16.msra.mxu0 %v4494_v37  ;;  %2043 = vmatprep.subr.bf16.mxu1 %v4499_v38  ;;  %v4581_v37 = vld [vmem:[#allocation5 + $0x668] ss:$24 sps:$4 sm:$0xff]  }
  0xeb   :  { %2129 = vmatprep.subr.bf16.mxu0 %v4502_v39  ;;  %v4584_v38 = vld [vmem:[#allocation5 + $0x370] ss:$24 sps:$4 sm:$0xff]   ;;  %v4589_v39 = vld [vmem:[#allocation5 + $0x69c] ss:$24 sps:$4 sm:$0xff]  }
  0xed   :  { %2044 = vmatpush1.bf16.msra.mxu1 %v4497_v40  ;;  %v4587_v40 = vld [vmem:[#allocation5 + $0x698] ss:$24 sps:$4 sm:$0xff]  }
  0xee   :  { %2130 = vmatpush1.bf16.msra.mxu0 %v4500_v41  ;;  %2045 = vmatprep.subr.bf16.mxu1 %v4505_v50  ;;  %v4590_v41 = vld [vmem:[#allocation5 + $0x3a0] ss:$24 sps:$4 sm:$0xff]   ;;  %v4595_v50 = vld [vmem:[#allocation5 + $0x6cc] ss:$24 sps:$4 sm:$0xff]  }
  0xef   :  { %2131 = vmatprep.subr.bf16.mxu0 %v4508_v42  ;;  %v4598_v42 = vld [vmem:[#allocation5 + $0x3d4] ss:$24 sps:$4 sm:$0xff]  }
  0xf1   :  { %2046 = vmatpush1.bf16.msra.mxu1 %v4503_v43  ;;  %v4593_v43 = vld [vmem:[#allocation5 + $0x6c8] ss:$24 sps:$4 sm:$0xff]  }
  0xf2   :  { %2132 = vmatpush1.bf16.msra.mxu0 %v4506_v45  ;;  %2047 = vmatprep.subr.bf16.mxu1 %v4511_v46  ;;  %v4601_v45 = vld [vmem:[#allocation5 + $0x6fc] ss:$24 sps:$4 sm:$0xff]  }
  0xf3   :  { %2133 = vmatprep.subr.bf16.mxu0 %v4514_v47  ;;  %v4604_v46 = vld [vmem:[#allocation5 + $0x404] ss:$24 sps:$4 sm:$0xff]   ;;  %v4599_v47 = vld [vmem:[#allocation5 + $0x6f8] ss:$24 sps:$4 sm:$0xff]  }
  0xf5   :  { %2048 = vmatpush1.bf16.msra.mxu1 %v4509_v48  ;;  %v4602_v48 = vld [vmem:[#allocation5 + $0x400] ss:$24 sps:$4 sm:$0xff]  }
  0xf6   :  { %2134 = vmatpush1.bf16.msra.mxu0 %v4512_v49  ;;  %2049 = vmatprep.subr.bf16.mxu1 %v4517_v51  ;;  %v4607_v49 = vld [vmem:[#allocation5 + $0x72c] ss:$24 sps:$4 sm:$0xff]  }
  0xf7   :  { %2135 = vmatprep.subr.bf16.mxu0 %v4520_v52  ;;  %v4610_v51 = vld [vmem:[#allocation5 + $0x434] ss:$24 sps:$4 sm:$0xff]   ;;  %v4605_v52 = vld [vmem:[#allocation5 + $0x728] ss:$24 sps:$4 sm:$0xff]  }
  0xf9   :  { %2050 = vmatpush1.bf16.msra.mxu1 %v4515_v53  ;;  %v4608_v53 = vld [vmem:[#allocation5 + $0x430] ss:$24 sps:$4 sm:$0xff]  }
  0xfa   :  { %2136 = vmatpush1.bf16.msra.mxu0 %v4518_v54  ;;  %2051 = vmatprep.subr.bf16.mxu1 %v4523_v56  ;;  %v4613_v54 = vld [vmem:[#allocation5 + $0x75c] ss:$24 sps:$4 sm:$0xff]  }
  0xfb   :  { %2137 = vmatprep.subr.bf16.mxu0 %v4526_v57  ;;  %v4616_v56 = vld [vmem:[#allocation5 + $0x464] ss:$24 sps:$4 sm:$0xff]   ;;  %v4611_v57 = vld [vmem:[#allocation5 + $0x758] ss:$24 sps:$4 sm:$0xff]  }
  0xfd   :  { %2052 = vmatpush1.bf16.msra.mxu1 %v4521_v58  ;;  %v4614_v58 = vld [vmem:[#allocation5 + $0x460] ss:$24 sps:$4 sm:$0xff]  }
  0xfe   :  { %2138 = vmatpush1.bf16.msra.mxu0 %v4524_v59  ;;  %2053 = vmatprep.subr.bf16.mxu1 %v4529_v60  ;;  %v4619_v59 = vld [vmem:[#allocation5 + $0x78c] ss:$24 sps:$4 sm:$0xff]  }
  0xff   :  { %2139 = vmatprep.subr.bf16.mxu0 %v4532_v61  ;;  %v4622_v60 = vld [vmem:[#allocation5 + $0x494] ss:$24 sps:$4 sm:$0xff]   ;;  %v4617_v61 = vld [vmem:[#allocation5 + $0x788] ss:$24 sps:$4 sm:$0xff]  }
 0x101   :  { %2054 = vmatpush1.bf16.msra.mxu1 %v4527_v62  ;;  %v4620_v62 = vld [vmem:[#allocation5 + $0x490] ss:$24 sps:$4 sm:$0xff]  }
 0x102   :  { %2140 = vmatpush1.bf16.msra.mxu0 %v4530_v63  ;;  %2055 = vmatprep.subr.bf16.mxu1 %v4535_v0  ;;  %v4625_v63 = vld [vmem:[#allocation5 + $0x7bc] ss:$24 sps:$4 sm:$0xff]  }
 0x103   :  { %2141 = vmatprep.subr.bf16.mxu0 %v4538_v1  ;;  %v4628_v0 = vld [vmem:[#allocation5 + $0x4c4] ss:$24 sps:$4 sm:$0xff]   ;;  %v4623_v1 = vld [vmem:[#allocation5 + $0x7b8] ss:$24 sps:$4 sm:$0xff]  }
 0x105   :  { %2056 = vmatpush1.bf16.msra.mxu1 %v4533_v2  ;;  %v4626_v2 = vld [vmem:[#allocation5 + $0x4c0] ss:$24 sps:$4 sm:$0xff]  }
 0x106   :  { %2142 = vmatpush1.bf16.msra.mxu0 %v4536_v3  ;;  %2057 = vmatprep.subr.bf16.mxu1 %v4541_v4  ;;  %v4631_v3 = vld [vmem:[#allocation5 + $0x7ec] ss:$24 sps:$4 sm:$0xff]  }
 0x107   :  { %2143 = vmatprep.subr.bf16.mxu0 %v4544_v5  ;;  %v4634_v4 = vld [vmem:[#allocation5 + $0x4f4] ss:$24 sps:$4 sm:$0xff]   ;;  %v4629_v5 = vld [vmem:[#allocation5 + $0x7e8] ss:$24 sps:$4 sm:$0xff]  }
 0x109   :  { %2058 = vmatpush1.bf16.msra.mxu1 %v4539_v6  ;;  %v4632_v6 = vld [vmem:[#allocation5 + $0x4f0] ss:$24 sps:$4 sm:$0xff]  }
 0x10a   :  { %2144 = vmatpush1.bf16.msra.mxu0 %v4542_v7  ;;  %2059 = vmatprep.subr.bf16.mxu1 %v4547_v8  ;;  %v4637_v7 = vld [vmem:[#allocation5 + $0x81c] ss:$24 sps:$4 sm:$0xff]  }
 0x10b   :  { %2145 = vmatprep.subr.bf16.mxu0 %v4550_v9  ;;  %v4640_v8 = vld [vmem:[#allocation5 + $0x524] ss:$24 sps:$4 sm:$0xff]   ;;  %v4635_v9 = vld [vmem:[#allocation5 + $0x818] ss:$24 sps:$4 sm:$0xff]  }
 0x10d   :  { %2060 = vmatpush1.bf16.msra.mxu1 %v4545_v10  ;;  %v4638_v10 = vld [vmem:[#allocation5 + $0x520] ss:$24 sps:$4 sm:$0xff]  }
 0x10e   :  { %2146 = vmatpush1.bf16.msra.mxu0 %v4548_v11  ;;  %2061 = vmatprep.subr.bf16.mxu1 %v4553_v13  ;;  %v4643_v11 = vld [vmem:[#allocation5 + $0x84c] ss:$24 sps:$4 sm:$0xff]  }
 0x10f   :  { %2147 = vmatprep.subr.bf16.mxu0 %v4556_v14  ;;  %v4646_v13 = vld [vmem:[#allocation5 + $0x554] ss:$24 sps:$4 sm:$0xff]   ;;  %v4641_v14 = vld [vmem:[#allocation5 + $0x848] ss:$24 sps:$4 sm:$0xff]  }
 0x111   :  { %2062 = vmatpush1.bf16.msra.mxu1 %v4551_v16  ;;  %v4644_v16 = vld [vmem:[#allocation5 + $0x550] ss:$24 sps:$4 sm:$0xff]  }
 0x112   :  { %2148 = vmatpush1.bf16.msra.mxu0 %v4554_v17  ;;  %2063 = vmatprep.subr.bf16.mxu1 %v4559_v18  ;;  %v4649_v17 = vld [vmem:[#allocation5 + $0x87c] ss:$24 sps:$4 sm:$0xff]  }
 0x113   :  { %2149 = vmatprep.subr.bf16.mxu0 %v4562_v19  ;;  %v4652_v18 = vld [vmem:[#allocation5 + $0x584] ss:$24 sps:$4 sm:$0xff]   ;;  %v4647_v19 = vld [vmem:[#allocation5 + $0x878] ss:$24 sps:$4 sm:$0xff]  }
 0x115   :  { %2064 = vmatpush1.bf16.msra.mxu1 %v4557_v20  ;;  %v4650_v20 = vld [vmem:[#allocation5 + $0x580] ss:$24 sps:$4 sm:$0xff]  }
 0x116   :  { %2150 = vmatpush1.bf16.msra.mxu0 %v4560_v21  ;;  %2065 = vmatprep.subr.bf16.mxu1 %v4565_v22  ;;  %v4655_v21 = vld [vmem:[#allocation5 + $0x8ac] ss:$24 sps:$4 sm:$0xff]  }
 0x117   :  { %2151 = vmatprep.subr.bf16.mxu0 %v4568_v24  ;;  %v4658_v22 = vld [vmem:[#allocation5 + $0x5b4] ss:$24 sps:$4 sm:$0xff]   ;;  %v4653_v24 = vld [vmem:[#allocation5 + $0x8a8] ss:$24 sps:$4 sm:$0xff]  }
 0x119   :  { %2066 = vmatpush1.bf16.msra.mxu1 %v4563_v25  ;;  %v4656_v25 = vld [vmem:[#allocation5 + $0x5b0] ss:$24 sps:$4 sm:$0xff]  }
 0x11a   :  { %2152 = vmatpush1.bf16.msra.mxu0 %v4566_v26  ;;  %2078 = vmatprep.subr.bf16.mxu1 %v4571_v27  ;;  %v4661_v26 = vld [vmem:[#allocation5 + $0x8dc] ss:$24 sps:$4 sm:$0xff]  }
 0x11b   :  { %2164 = vmatprep.subr.bf16.mxu0 %v4574_v28  ;;  %v4664_v27 = vld [vmem:[#allocation5 + $0x5e4] ss:$24 sps:$4 sm:$0xff]   ;;  %v4659_v28 = vld [vmem:[#allocation5 + $0x8d8] ss:$24 sps:$4 sm:$0xff]  }
 0x11c   :  { %2068 = vmatmul.mubr.bf16.vlgmr.msra.gmra.mrb[4].mxu1 %v5253_v15 }
 0x11d   :  { %2154 = vmatmul.mubr.bf16.vlgmr.msra.gmra.mrb[4].mxu0 %v5251_v12  ;;  %2079 = vmatpush1.bf16.msra.mxu1 %v4569_v29  ;;  %v4592_v12 = vld [vmem:[#allocation5 + $0x3a4] ss:$24 sps:$4 sm:$0xff]   ;;  %v4662_v29 = vld [vmem:[#allocation5 + $0x5e0] ss:$24 sps:$4 sm:$0xff]  }
 0x11e   :  { %2165 = vmatpush1.bf16.msra.mxu0 %v4572_v30  ;;  %2080 = vmatprep.subr.bf16.mxu1 %v4577_v31  ;;  %v4667_v30 = vld [vmem:[#allocation5 + $0x614] ss:$24 sps:$4 sm:$0xff]  }
 0x11f   :  { %2166 = vmatprep.subr.bf16.mxu0 %v4580_v32  ;;  %2110 = vmatprep.mubr.bf16.mxu1 %v5258_v44  ;;  %v4691_v31 = vld [vmem:[#allocation8 + $0x4] ss:$16 sps:$4 sm:$0xff]  }
 0x120   :  { %2196 = vmatprep.mubr.bf16.mxu0 %v5247_v55  ;;  %v4596_v55 = vld [vmem:[#allocation5 + $0x3d0] ss:$24 sps:$4 sm:$0xff]  }
 0x121   :  { %2081 = vmatpush1.bf16.msra.mxu1 %v4575_v33  ;;  %v4665_v32 = vld [vmem:[#allocation5 + $0x610] ss:$24 sps:$4 sm:$0xff]  }
 0x122   :  { %2167 = vmatpush1.bf16.msra.mxu0 %v4578_v34  ;;  %2082 = vmatprep.subr.bf16.mxu1 %v4583_v35  ;;  %v4689_v33 = vld [vmem:[#allocation8] ss:$16 sps:$4 sm:$0xff]   ;;  %v4697_v35 = vld [vmem:[#allocation8 + $0x24] ss:$16 sps:$4 sm:$0xff]  }
 0x123   :  { %2168 = vmatprep.subr.bf16.mxu0 %v4586_v36  ;;  %v4670_v34 = vld [vmem:[#allocation5 + $0x644] ss:$24 sps:$4 sm:$0xff]   ;;  %v4668_v36 = vld [vmem:[#allocation5 + $0x640] ss:$24 sps:$4 sm:$0xff]  }
 0x125   :  { %2083 = vmatpush1.bf16.msra.mxu1 %v4581_v37  ;;  %v4695_v37 = vld [vmem:[#allocation8 + $0x20] ss:$16 sps:$4 sm:$0xff]  }
 0x126   :  { %2169 = vmatpush1.bf16.msra.mxu0 %v4584_v38  ;;  %2084 = vmatprep.subr.bf16.mxu1 %v4589_v39  ;;  %v4673_v38 = vld [vmem:[#allocation5 + $0x674] ss:$24 sps:$4 sm:$0xff]  }
 0x127   :  { %2170 = vmatprep.subr.bf16.mxu0 %v4592_v12  ;;  %v4703_v39 = vld [vmem:[#allocation8 + $0x44] ss:$16 sps:$4 sm:$0xff]  }
 0x128   :  { %v4671_v12 = vld [vmem:[#allocation5 + $0x670] ss:$24 sps:$4 sm:$0xff]  }
 0x129   :  { %2085 = vmatpush1.bf16.msra.mxu1 %v4587_v40  ;;  %v4676_v40 = vld [vmem:[#allocation5 + $0x6a4] ss:$24 sps:$4 sm:$0xff]  }
 0x12a   :  { %2171 = vmatpush1.bf16.msra.mxu0 %v4590_v41  ;;  %2086 = vmatprep.subr.bf16.mxu1 %v4595_v50  ;;  %v4701_v41 = vld [vmem:[#allocation8 + $0x40] ss:$16 sps:$4 sm:$0xff]   ;;  %v4709_v50 = vld [vmem:[#allocation8 + $0x64] ss:$16 sps:$4 sm:$0xff]  }
 0x12b   :  { %2172 = vmatprep.subr.bf16.mxu0 %v4598_v42  ;;  %v4679_v42 = vld [vmem:[#allocation5 + $0x6d4] ss:$24 sps:$4 sm:$0xff]  }
 0x12d   :  { %2087 = vmatpush1.bf16.msra.mxu1 %v4593_v43  ;;  %v4707_v43 = vld [vmem:[#allocation8 + $0x60] ss:$16 sps:$4 sm:$0xff]  }
 0x12e   :  { %2173 = vmatpush1.bf16.msra.mxu0 %v4596_v55  ;;  %2088 = vmatprep.subr.bf16.mxu1 %v4601_v45  ;;  %v4715_v55 = vld [vmem:[#allocation8 + $0x84] ss:$16 sps:$4 sm:$0xff]  }
 0x12f   :  { %2174 = vmatprep.subr.bf16.mxu0 %v4604_v46  ;;  %v4677_v45 = vld [vmem:[#allocation5 + $0x6d0] ss:$24 sps:$4 sm:$0xff]   ;;  %v4682_v46 = vld [vmem:[#allocation5 + $0x704] ss:$24 sps:$4 sm:$0xff]  }
 0x131   :  { %2089 = vmatpush1.bf16.msra.mxu1 %v4599_v47  ;;  %v4721_v47 = vld [vmem:[#allocation8 + $0xa4] ss:$16 sps:$4 sm:$0xff]  }
 0x132   :  { %2175 = vmatpush1.bf16.msra.mxu0 %v4602_v48  ;;  %2090 = vmatprep.subr.bf16.mxu1 %v4607_v49  ;;  %v4680_v48 = vld [vmem:[#allocation5 + $0x700] ss:$24 sps:$4 sm:$0xff]   ;;  %v4685_v49 = vld [vmem:[#allocation5 + $0x734] ss:$24 sps:$4 sm:$0xff]  }
 0x133   :  { %2176 = vmatprep.subr.bf16.mxu0 %v4610_v51  ;;  %v4719_v51 = vld [vmem:[#allocation8 + $0xa0] ss:$16 sps:$4 sm:$0xff]  }
 0x135   :  { %2091 = vmatpush1.bf16.msra.mxu1 %v4605_v52  ;;  %v4727_v52 = vld [vmem:[#allocation8 + $0xc4] ss:$16 sps:$4 sm:$0xff]  }
 0x136   :  { %2177 = vmatpush1.bf16.msra.mxu0 %v4608_v53  ;;  %2092 = vmatprep.subr.bf16.mxu1 %v4613_v54 }
 0x137   :  { %2178 = vmatprep.subr.bf16.mxu0 %v4616_v56 }
 0x139   :  { %2093 = vmatpush1.bf16.msra.mxu1 %v4611_v57  ;;  %v4683_v57 = vld [vmem:[#allocation5 + $0x730] ss:$24 sps:$4 sm:$0xff]  }
 0x13a   :  { %2179 = vmatpush1.bf16.msra.mxu0 %v4614_v58  ;;  %2094 = vmatprep.subr.bf16.mxu1 %v4619_v59  ;;  %v4725_v58 = vld [vmem:[#allocation8 + $0xc0] ss:$16 sps:$4 sm:$0xff]  }
 0x13b   :  { %2180 = vmatprep.subr.bf16.mxu0 %v4622_v60  ;;  %v4688_v60 = vld [vmem:[#allocation5 + $0x764] ss:$24 sps:$4 sm:$0xff]  }
 0x13d   :  { %2095 = vmatpush1.bf16.msra.mxu1 %v4617_v61  ;;  %v4733_v61 = vld [vmem:[#allocation8 + $0xe4] ss:$16 sps:$4 sm:$0xff]  }
 0x13e   :  { %2181 = vmatpush1.bf16.msra.mxu0 %v4620_v62  ;;  %2096 = vmatprep.subr.bf16.mxu1 %v4625_v63  ;;  %v4686_v62 = vld [vmem:[#allocation5 + $0x760] ss:$24 sps:$4 sm:$0xff]   ;;  %v4694_v63 = vld [vmem:[#allocation5 + $0x794] ss:$24 sps:$4 sm:$0xff]  }
 0x13f   :  { %2182 = vmatprep.subr.bf16.mxu0 %v4628_v0  ;;  %v4731_v0 = vld [vmem:[#allocation8 + $0xe0] ss:$16 sps:$4 sm:$0xff]  }
 0x141   :  { %2097 = vmatpush1.bf16.msra.mxu1 %v4623_v1  ;;  %v4739_v1 = vld [vmem:[#allocation8 + $0x104] ss:$16 sps:$4 sm:$0xff]  }
 0x142   :  { %2183 = vmatpush1.bf16.msra.mxu0 %v4626_v2  ;;  %2098 = vmatprep.subr.bf16.mxu1 %v4631_v3  ;;  %v4692_v2 = vld [vmem:[#allocation5 + $0x790] ss:$24 sps:$4 sm:$0xff]   ;;  %v4700_v3 = vld [vmem:[#allocation5 + $0x7c4] ss:$24 sps:$4 sm:$0xff]  }
 0x143   :  { %2184 = vmatprep.subr.bf16.mxu0 %v4634_v4  ;;  %v4737_v4 = vld [vmem:[#allocation8 + $0x100] ss:$16 sps:$4 sm:$0xff]  }
 0x145   :  { %2099 = vmatpush1.bf16.msra.mxu1 %v4629_v5  ;;  %v4745_v5 = vld [vmem:[#allocation8 + $0x124] ss:$16 sps:$4 sm:$0xff]  }
 0x146   :  { %2185 = vmatpush1.bf16.msra.mxu0 %v4632_v6  ;;  %2100 = vmatprep.subr.bf16.mxu1 %v4637_v7  ;;  %v4698_v6 = vld [vmem:[#allocation5 + $0x7c0] ss:$24 sps:$4 sm:$0xff]   ;;  %v4706_v7 = vld [vmem:[#allocation5 + $0x7f4] ss:$24 sps:$4 sm:$0xff]  }
 0x147   :  { %2186 = vmatprep.subr.bf16.mxu0 %v4640_v8  ;;  %v4743_v8 = vld [vmem:[#allocation8 + $0x120] ss:$16 sps:$4 sm:$0xff]  }
 0x149   :  { %2101 = vmatpush1.bf16.msra.mxu1 %v4635_v9  ;;  %v4751_v9 = vld [vmem:[#allocation8 + $0x144] ss:$16 sps:$4 sm:$0xff]  }
 0x14a   :  { %2187 = vmatpush1.bf16.msra.mxu0 %v4638_v10  ;;  %2102 = vmatprep.subr.bf16.mxu1 %v4643_v11  ;;  %v4704_v10 = vld [vmem:[#allocation5 + $0x7f0] ss:$24 sps:$4 sm:$0xff]  }
 0x14b   :  { %2188 = vmatprep.subr.bf16.mxu0 %v4646_v13  ;;  %v4749_v11 = vld [vmem:[#allocation8 + $0x140] ss:$16 sps:$4 sm:$0xff]  }
 0x14c   :  { %v4712_v13 = vld [vmem:[#allocation5 + $0x824] ss:$24 sps:$4 sm:$0xff]  }
 0x14d   :  { %2103 = vmatpush1.bf16.msra.mxu1 %v4641_v14  ;;  %v4757_v14 = vld [vmem:[#allocation8 + $0x164] ss:$16 sps:$4 sm:$0xff]  }
 0x14e   :  { %2189 = vmatpush1.bf16.msra.mxu0 %v4644_v16  ;;  %2104 = vmatprep.subr.bf16.mxu1 %v4649_v17  ;;  %v4710_v16 = vld [vmem:[#allocation5 + $0x820] ss:$24 sps:$4 sm:$0xff]  }
 0x14f   :  { %2190 = vmatprep.subr.bf16.mxu0 %v4652_v18  ;;  %v4755_v17 = vld [vmem:[#allocation8 + $0x160] ss:$16 sps:$4 sm:$0xff]  }
 0x150   :  { %v4718_v18 = vld [vmem:[#allocation5 + $0x854] ss:$24 sps:$4 sm:$0xff]  }
 0x151   :  { %2105 = vmatpush1.bf16.msra.mxu1 %v4647_v19  ;;  %v4763_v19 = vld [vmem:[#allocation8 + $0x184] ss:$16 sps:$4 sm:$0xff]  }
 0x152   :  { %2191 = vmatpush1.bf16.msra.mxu0 %v4650_v20  ;;  %2106 = vmatprep.subr.bf16.mxu1 %v4655_v21  ;;  %v4716_v20 = vld [vmem:[#allocation5 + $0x850] ss:$24 sps:$4 sm:$0xff]  }
 0x153   :  { %2192 = vmatprep.subr.bf16.mxu0 %v4658_v22  ;;  %v4761_v21 = vld [vmem:[#allocation8 + $0x180] ss:$16 sps:$4 sm:$0xff]  }
 0x154   :  { %v4724_v22 = vld [vmem:[#allocation5 + $0x884] ss:$24 sps:$4 sm:$0xff]  }
 0x155   :  { %2107 = vmatpush1.bf16.msra.mxu1 %v4653_v24  ;;  %v4769_v24 = vld [vmem:[#allocation8 + $0x1a4] ss:$16 sps:$4 sm:$0xff]  }
 0x156   :  { %2193 = vmatpush1.bf16.msra.mxu0 %v4656_v25  ;;  %2108 = vmatprep.subr.bf16.mxu1 %v4661_v26  ;;  %v4722_v25 = vld [vmem:[#allocation5 + $0x880] ss:$24 sps:$4 sm:$0xff]  }
 0x157   :  { %2194 = vmatprep.subr.bf16.mxu0 %v4664_v27  ;;  %v4767_v26 = vld [vmem:[#allocation8 + $0x1a0] ss:$16 sps:$4 sm:$0xff]  }
 0x158   :  { %v4730_v27 = vld [vmem:[#allocation5 + $0x8b4] ss:$24 sps:$4 sm:$0xff]  }
 0x159   :  { %2109 = vmatpush1.bf16.msra.mxu1 %v4659_v28  ;;  %v4775_v28 = vld [vmem:[#allocation8 + $0x1c4] ss:$16 sps:$4 sm:$0xff]  }
 0x15a   :  { %2195 = vmatpush1.bf16.msra.mxu0 %v4662_v29  ;;  %3442 = vmatprep.subr.bf16.mxu1 %v4691_v31  ;;  %v4728_v29 = vld [vmem:[#allocation5 + $0x8b0] ss:$24 sps:$4 sm:$0xff]   ;;  %v4736_v31 = vld [vmem:[#allocation5 + $0x8e4] ss:$24 sps:$4 sm:$0xff]  }
 0x15b   :  { %2207 = vmatprep.subr.bf16.mxu0 %v4667_v30  ;;  %v4773_v30 = vld [vmem:[#allocation8 + $0x1c0] ss:$16 sps:$4 sm:$0xff]  }
 0x15c   :  { %2111 = vmatmul.mubr.bf16.vlgmr.msra.gmra.mrb[4].mxu1 %v5261_v23 }
 0x15d   :  { %2197 = vmatmul.mubr.bf16.vlgmr.msra.gmra.mrb[4].mxu0 %v5253_v15  ;;  %3443 = vmatpush1.bf16.msra.mxu1 %v4689_v33  ;;  %v4674_v15 = vld [vmem:[#allocation5 + $0x6a0] ss:$24 sps:$4 sm:$0xff]  }
 0x15e   :  { %2208 = vmatpush1.bf16.msra.mxu0 %v4665_v32  ;;  %3444 = vmatprep.subr.bf16.mxu1 %v4697_v35  ;;  %v4781_v32 = vld [vmem:[#allocation8 + $0x1e4] ss:$16 sps:$4 sm:$0xff]   ;;  %v4742_v35 = vld [vmem:[#allocation8 + $0xc] ss:$16 sps:$4 sm:$0xff]  }
 0x15f   :  { %2209 = vmatprep.subr.bf16.mxu0 %v4670_v34  ;;  %2239 = vmatprep.mubr.bf16.mxu0 %v5258_v44  ;;  %v4713_v44 = vld [vmem:[#allocation8 + $0x80] ss:$16 sps:$4 sm:$0xff]  }
 0x160   :  { %v4734_v33 = vld [vmem:[#allocation5 + $0x8e0] ss:$24 sps:$4 sm:$0xff]  }
 0x161   :  { %3445 = vmatpush1.bf16.msra.mxu1 %v4695_v37  ;;  %v4779_v34 = vld [vmem:[#allocation8 + $0x1e0] ss:$16 sps:$4 sm:$0xff]   ;;  %v4740_v37 = vld [vmem:[#allocation8 + $0x8] ss:$16 sps:$4 sm:$0xff]  }
 0x162   :  { %2210 = vmatpush1.bf16.msra.mxu0 %v4668_v36  ;;  %3446 = vmatprep.subr.bf16.mxu1 %v4703_v39  ;;  %v4811_v36 = vld [vmem:[#allocation8 + $0x204] ss:$16 sps:$4 sm:$0xff]   ;;  %v4746_v39 = vld [vmem:[#allocation8 + $0x28] ss:$16 sps:$4 sm:$0xff]  }
 0x163   :  { %2211 = vmatprep.subr.bf16.mxu0 %v4673_v38  ;;  %v4748_v38 = vld [vmem:[#allocation8 + $0x2c] ss:$16 sps:$4 sm:$0xff]  }
 0x165   :  { %3447 = vmatpush1.bf16.msra.mxu1 %v4701_v41  ;;  %v4752_v41 = vld [vmem:[#allocation8 + $0x48] ss:$16 sps:$4 sm:$0xff]  }
 0x166   :  { %2212 = vmatpush1.bf16.msra.mxu0 %v4671_v12  ;;  %3448 = vmatprep.subr.bf16.mxu1 %v4709_v50  ;;  %v393_v12 = vlaneseq }
 0x167   :  { %2213 = vmatprep.subr.bf16.mxu0 %v4676_v40  ;;  %v4754_v40 = vld [vmem:[#allocation8 + $0x4c] ss:$16 sps:$4 sm:$0xff]  }
 0x168   :  { %v5283_v50 = vshrl.u32 %v393_v12, 7  ;;  %v4803_v12 = vld [vmem:[#allocation8 + $0x1c8] ss:$16 sps:$4 sm:$0xff]  }
 0x169   :  { %3449 = vmatpush1.bf16.msra.mxu1 %v4707_v43 }
 0x16a   :  { %2214 = vmatpush1.bf16.msra.mxu0 %v4674_v15  ;;  %3450 = vmatprep.subr.bf16.mxu1 %v4715_v55  ;;  %v4760_v15 = vld [vmem:[#allocation8 + $0x6c] ss:$16 sps:$4 sm:$0xff]   ;;  %v395_v43 = vsub.s32 0, %v5283_v50 }
 0x16b   :  { %2215 = vmatprep.subr.bf16.mxu0 %v4679_v42  ;;  %v4758_v42 = vld [vmem:[#allocation8 + $0x68] ss:$16 sps:$4 sm:$0xff]   ;;  %v4766_v55 = vld [vmem:[#allocation8 + $0x8c] ss:$16 sps:$4 sm:$0xff]  }
 0x16d   :  { %3451 = vmatpush1.bf16.msra.mxu1 %v4713_v44 }
 0x16e   :  { %2216 = vmatpush1.bf16.msra.mxu0 %v4677_v45  ;;  %3452 = vmatprep.subr.bf16.mxu1 %v4721_v47  ;;  %v5286_v45 = vld [vmem:[#allocation7] sm:$0x3f] }
 0x16f   :  { %2217 = vmatprep.subr.bf16.mxu0 %v4682_v46  ;;  %v5274_v53 = vpop.f32.mrb[0].mxu1  ;;  %v4764_v46 = vld [vmem:[#allocation8 + $0x88] ss:$16 sps:$4 sm:$0xff]   ;;  %v396_v44 = vrot.slane %v5286_v45, %v395_v43  ;;  %v4772_v47 = vld [vmem:[#allocation8 + $0xac] ss:$16 sps:$4 sm:$0xff]  }
 0x170   :  { %v5276_v54 = vpop.f32.mrb[1].mxu1 }
 0x171   :  { %v5278_v56 = vpop.f32.mrb[2].mxu1  ;;  %3453 = vmatpush1.bf16.msra.mxu1 %v4719_v51  ;;  %v1898_v51 = vadd.f32 %v5274_v53, %v396_v44 }
 0x172   :  { %2218 = vmatpush1.bf16.msra.mxu0 %v4680_v48  ;;  %v5280_v59 = vpop.f32.mrb[3].mxu1  ;;  %3454 = vmatprep.subr.bf16.mxu1 %v4727_v52  ;;  %v4778_v52 = vld [vmem:[#allocation8 + $0xcc] ss:$16 sps:$4 sm:$0xff]  }
 0x173   :  { %2219 = vmatprep.subr.bf16.mxu0 %v4685_v49  ;;  %v4770_v49 = vld [vmem:[#allocation8 + $0xa8] ss:$16 sps:$4 sm:$0xff]  }
 0x175   :  { %3455 = vmatpush1.bf16.msra.mxu1 %v4725_v58 }
 0x176   :  { %2220 = vmatpush1.bf16.msra.mxu0 %v4683_v57  ;;  %3456 = vmatprep.subr.bf16.mxu1 %v4733_v61 }
 0x177   :  { %2221 = vmatprep.subr.bf16.mxu0 %v4688_v60  ;;  %v1902_v60 = vadd.f32 %v5278_v56, %v396_v44  ;;  %v4865_v44 = vld [vmem:[#allocation8 + $0x324] ss:$16 sps:$4 sm:$0xff]  }
 0x179   :  { %3457 = vmatpush1.bf16.msra.mxu1 %v4731_v0 }
 0x17a   :  { %2222 = vmatpush1.bf16.msra.mxu0 %v4686_v62  ;;  %3458 = vmatprep.subr.bf16.mxu1 %v4739_v1 }
 0x17b   :  { %2223 = vmatprep.subr.bf16.mxu0 %v4694_v63 }
 0x17d   :  { %3459 = vmatpush1.bf16.msra.mxu1 %v4737_v4 }
 0x17e   :  { %2224 = vmatpush1.bf16.msra.mxu0 %v4692_v2  ;;  %3460 = vmatprep.subr.bf16.mxu1 %v4745_v5  ;;  %v4776_v2 = vld [vmem:[#allocation8 + $0xc8] ss:$16 sps:$4 sm:$0xff]   ;;  %v4784_v5 = vld [vmem:[#allocation8 + $0xec] ss:$16 sps:$4 sm:$0xff]  }
 0x17f   :  { %2225 = vmatprep.subr.bf16.mxu0 %v4700_v3 }
 0x181   :  { %3461 = vmatpush1.bf16.msra.mxu1 %v4743_v8 }
 0x182   :  { %2226 = vmatpush1.bf16.msra.mxu0 %v4698_v6  ;;  %3462 = vmatprep.subr.bf16.mxu1 %v4751_v9  ;;  %v4782_v9 = vld [vmem:[#allocation8 + $0xe8] ss:$16 sps:$4 sm:$0xff]  }
 0x183   :  { %2227 = vmatprep.subr.bf16.mxu0 %v4706_v7 }
 0x185   :  { %3463 = vmatpush1.bf16.msra.mxu1 %v4749_v11  ;;  %v4809_v11 = vld [vmem:[#allocation8 + $0x200] ss:$16 sps:$4 sm:$0xff]  }
 0x186   :  { %2228 = vmatpush1.bf16.msra.mxu0 %v4704_v10  ;;  %3464 = vmatprep.subr.bf16.mxu1 %v4757_v14  ;;  %v4785_v14 = vld [vmem:[#allocation8 + $0x108] ss:$16 sps:$4 sm:$0xff]  }
 0x187   :  { %2229 = vmatprep.subr.bf16.mxu0 %v4712_v13  ;;  %v4817_v13 = vld [vmem:[#allocation8 + $0x224] ss:$16 sps:$4 sm:$0xff]  }
 0x189   :  { %3465 = vmatpush1.bf16.msra.mxu1 %v4755_v17  ;;  %v4815_v17 = vld [vmem:[#allocation8 + $0x220] ss:$16 sps:$4 sm:$0xff]  }
 0x18a   :  { %2230 = vmatpush1.bf16.msra.mxu0 %v4710_v16  ;;  %3466 = vmatprep.subr.bf16.mxu1 %v4763_v19  ;;  %v4790_v16 = vld [vmem:[#allocation8 + $0x12c] ss:$16 sps:$4 sm:$0xff]   ;;  %v4788_v19 = vld [vmem:[#allocation8 + $0x128] ss:$16 sps:$4 sm:$0xff]  }
 0x18b   :  { %2231 = vmatprep.subr.bf16.mxu0 %v4718_v18  ;;  %v4823_v18 = vld [vmem:[#allocation8 + $0x244] ss:$16 sps:$4 sm:$0xff]  }
 0x18d   :  { %3467 = vmatpush1.bf16.msra.mxu1 %v4761_v21  ;;  %v4821_v21 = vld [vmem:[#allocation8 + $0x240] ss:$16 sps:$4 sm:$0xff]  }
 0x18e   :  { %2232 = vmatpush1.bf16.msra.mxu0 %v4716_v20  ;;  %3468 = vmatprep.subr.bf16.mxu1 %v4769_v24  ;;  %v4793_v20 = vld [vmem:[#allocation8 + $0x14c] ss:$16 sps:$4 sm:$0xff]   ;;  %v4791_v24 = vld [vmem:[#allocation8 + $0x148] ss:$16 sps:$4 sm:$0xff]  }
 0x18f   :  { %2233 = vmatprep.subr.bf16.mxu0 %v4724_v22  ;;  %v4829_v22 = vld [vmem:[#allocation8 + $0x264] ss:$16 sps:$4 sm:$0xff]  }
 0x191   :  { %3469 = vmatpush1.bf16.msra.mxu1 %v4767_v26  ;;  %v4827_v26 = vld [vmem:[#allocation8 + $0x260] ss:$16 sps:$4 sm:$0xff]  }
 0x192   :  { %2234 = vmatpush1.bf16.msra.mxu0 %v4722_v25  ;;  %3470 = vmatprep.subr.bf16.mxu1 %v4775_v28  ;;  %v4796_v25 = vld [vmem:[#allocation8 + $0x16c] ss:$16 sps:$4 sm:$0xff]   ;;  %v4794_v28 = vld [vmem:[#allocation8 + $0x168] ss:$16 sps:$4 sm:$0xff]  }
 0x193   :  { %2235 = vmatprep.subr.bf16.mxu0 %v4730_v27  ;;  %v4835_v27 = vld [vmem:[#allocation8 + $0x284] ss:$16 sps:$4 sm:$0xff]  }
 0x195   :  { %3471 = vmatpush1.bf16.msra.mxu1 %v4773_v30  ;;  %v4833_v30 = vld [vmem:[#allocation8 + $0x280] ss:$16 sps:$4 sm:$0xff]  }
 0x196   :  { %2236 = vmatpush1.bf16.msra.mxu0 %v4728_v29  ;;  %3472 = vmatprep.subr.bf16.mxu1 %v4781_v32  ;;  %v4799_v29 = vld [vmem:[#allocation8 + $0x18c] ss:$16 sps:$4 sm:$0xff]   ;;  %v4797_v32 = vld [vmem:[#allocation8 + $0x188] ss:$16 sps:$4 sm:$0xff]  }
 0x197   :  { %2237 = vmatprep.subr.bf16.mxu0 %v4736_v31  ;;  %v4841_v31 = vld [vmem:[#allocation8 + $0x2a4] ss:$16 sps:$4 sm:$0xff]  }
 0x199   :  { %3473 = vmatpush1.bf16.msra.mxu1 %v4779_v34  ;;  %v4839_v34 = vld [vmem:[#allocation8 + $0x2a0] ss:$16 sps:$4 sm:$0xff]  }
 0x19a   :  { %2238 = vmatpush1.bf16.msra.mxu0 %v4734_v33  ;;  %3485 = vmatprep.subr.bf16.mxu1 %v4811_v36  ;;  %v4802_v33 = vld [vmem:[#allocation8 + $0x1ac] ss:$16 sps:$4 sm:$0xff]   ;;  %v4800_v36 = vld [vmem:[#allocation8 + $0x1a8] ss:$16 sps:$4 sm:$0xff]  }
 0x19b   :  { %3571 = vmatprep.subr.bf16.mxu0 %v4742_v35  ;;  %v4847_v35 = vld [vmem:[#allocation8 + $0x2c4] ss:$16 sps:$4 sm:$0xff]  }
 0x19d   :  { %2240 = vmatmul.mubr.bf16.vlgmr.msra.gmra.mrb[4].mxu0 %v5261_v23  ;;  %v399_v23 = vsub.s32 1, %v5283_v50 }
 0x19e   :  { %3572 = vmatpush1.bf16.msra.mxu0 %v4740_v37  ;;  %v4805_v37 = vld [vmem:[#allocation8 + $0x1cc] ss:$16 sps:$4 sm:$0xff]  }
 0x19f   :  { %3573 = vmatprep.subr.bf16.mxu0 %v4748_v38  ;;  %v400_v48 = vrot.slane %v5286_v45, %v399_v23  ;;  %v4845_v38 = vld [vmem:[#allocation8 + $0x2c0] ss:$16 sps:$4 sm:$0xff]  }
 0x1a1   :  { %v1900_v57 = vadd.f32 %v5276_v54, %v400_v48  ;;  %v1904_v63 = vadd.f32 %v5280_v59, %v400_v48  ;;  %v4787_v59 = vld [vmem:[#allocation8 + $0x10c] ss:$16 sps:$4 sm:$0xff]  }
 0x1a2   :  { %3574 = vmatpush1.bf16.msra.mxu0 %v4746_v39  ;;  %v4853_v39 = vld [vmem:[#allocation8 + $0x2e4] ss:$16 sps:$4 sm:$0xff]   ;;  %v4820_v48 = vld [vmem:[#allocation8 + $0x22c] ss:$16 sps:$4 sm:$0xff]  }
 0x1a3   :  { %3575 = vmatprep.subr.bf16.mxu0 %v4754_v40  ;;  %v4808_v40 = vld [vmem:[#allocation8 + $0x1ec] ss:$16 sps:$4 sm:$0xff]  }
 0x1a6   :  { %3576 = vmatpush1.bf16.msra.mxu0 %v4752_v41  ;;  %v4851_v41 = vld [vmem:[#allocation8 + $0x2e0] ss:$16 sps:$4 sm:$0xff]  }
 0x1a7   :  { %3577 = vmatprep.subr.bf16.mxu0 %v4760_v15  ;;  %v4859_v15 = vld [vmem:[#allocation8 + $0x304] ss:$16 sps:$4 sm:$0xff]  }
 0x1aa   :  { %3578 = vmatpush1.bf16.msra.mxu0 %v4758_v42  ;;  %v4806_v42 = vld [vmem:[#allocation8 + $0x1e8] ss:$16 sps:$4 sm:$0xff]  }
 0x1ab   :  { %3579 = vmatprep.subr.bf16.mxu0 %v4766_v55  ;;  %v4814_v55 = vld [vmem:[#allocation8 + $0x20c] ss:$16 sps:$4 sm:$0xff]  }
 0x1ae   :  { %3580 = vmatpush1.bf16.msra.mxu0 %v4764_v46  ;;  %v4857_v46 = vld [vmem:[#allocation8 + $0x300] ss:$16 sps:$4 sm:$0xff]  }
 0x1af   :  { %3581 = vmatprep.subr.bf16.mxu0 %v4772_v47  ;;  %v4812_v47 = vld [vmem:[#allocation8 + $0x208] ss:$16 sps:$4 sm:$0xff]  }
 0x1b0   :  { %v1983_v58 = vpop.f32.mrb[0].mxu0 }
 0x1b1   :  { %v4208_v61 = vadd.f32 %v1983_v58, %v1898_v51  ;;  %v1985_v62 = vpop.f32.mrb[1].mxu0  ;;  %v4871_v51 = vld [vmem:[#allocation8 + $0x344] ss:$16 sps:$4 sm:$0xff]   ;;  %v4869_v58 = vld [vmem:[#allocation8 + $0x340] ss:$16 sps:$4 sm:$0xff]  }
 0x1b2   :  { %v4210_v0 = vadd.f32 %v1985_v62, %v1900_v57  ;;  %v1987_v1 = vpop.f32.mrb[2].mxu0  ;;  %3582 = vmatpush1.bf16.msra.mxu0 %v4770_v49  ;;  %v4863_v49 = vld [vmem:[#allocation8 + $0x320] ss:$16 sps:$4 sm:$0xff]   ;;  %v4826_v57 = vld [vmem:[#allocation8 + $0x24c] ss:$16 sps:$4 sm:$0xff]  }
 0x1b3   :  { %v4212_v3 = vadd.f32 %v1987_v1, %v1902_v60  ;;  %v1989_v4 = vpop.f32.mrb[3].mxu0  ;;  %3583 = vmatprep.subr.bf16.mxu0 %v4778_v52  ;;  %v2250_v6 = vmax.f32 %v4208_v61, 0.0  ;;  %v4818_v52 = vld [vmem:[#allocation8 + $0x228] ss:$16 sps:$4 sm:$0xff]   ;;  %v4877_v60 = vld [vmem:[#allocation8 + $0x364] ss:$16 sps:$4 sm:$0xff]  }
 0x1b4   :  { %v4214_v53 = vadd.f32 %v1989_v4, %v1904_v63  ;;  %v2251_v8 = vmax.f32 %v4210_v0, 0.0  ;;  %v4824_v61 = vld [vmem:[#allocation8 + $0x248] ss:$16 sps:$4 sm:$0xff]   ;;  %v4832_v62 = vld [vmem:[#allocation8 + $0x26c] ss:$16 sps:$4 sm:$0xff]  }
 0x1b5   :  { %v2256_v7 = vmax.f32 %v4212_v3, 0.0  ;;  %v4875_v63 = vld [vmem:[#allocation8 + $0x360] ss:$16 sps:$4 sm:$0xff]   ;;  %v4883_v0 = vld [vmem:[#allocation8 + $0x384] ss:$16 sps:$4 sm:$0xff]  }
 0x1b6   :  { %v2257_v54 = vmax.f32 %v4214_v53, 0.0  ;;  %3584 = vmatpush1.bf16.msra.mxu0 %v4776_v2  ;;  %v4830_v1 = vld [vmem:[#allocation8 + $0x268] ss:$16 sps:$4 sm:$0xff]   ;;  %v4838_v2 = vld [vmem:[#allocation8 + $0x28c] ss:$16 sps:$4 sm:$0xff]  }
 0x1b7   :  { %v5299_v56 = vpack.c.bf16 %v2256_v7, %v2250_v6  ;;  %3585 = vmatprep.subr.bf16.mxu0 %v4784_v5  ;;  %v4881_v3 = vld [vmem:[#allocation8 + $0x380] ss:$16 sps:$4 sm:$0xff]   ;;  %v4889_v4 = vld [vmem:[#allocation8 + $0x3a4] ss:$16 sps:$4 sm:$0xff]   ;;  %v4836_v5 = vld [vmem:[#allocation8 + $0x288] ss:$16 sps:$4 sm:$0xff]  }
 0x1b8   :  { %v2263_v10 = vpack.c.bf16 %v2257_v54, %v2251_v8  ;;  %v4844_v53 = vld [vmem:[#allocation8 + $0x2ac] ss:$16 sps:$4 sm:$0xff]   ;;  %v4887_v6 = vld [vmem:[#allocation8 + $0x3a0] ss:$16 sps:$4 sm:$0xff]   ;;  %v4895_v7 = vld [vmem:[#allocation8 + $0x3c4] ss:$16 sps:$4 sm:$0xff]  }
 0x1b9   :  { %v4842_v8 = vld [vmem:[#allocation8 + $0x2a8] ss:$16 sps:$4 sm:$0xff]   ;;  %v4850_v54 = vld [vmem:[#allocation8 + $0x2cc] ss:$16 sps:$4 sm:$0xff]  }
 0x1ba   :  { %3474 = vmatprep.mubr.bf16.mxu1 %v2263_v10  ;;  %3586 = vmatpush1.bf16.msra.mxu0 %v4782_v9  ;;  %v4893_v9 = vld [vmem:[#allocation8 + $0x3c0] ss:$16 sps:$4 sm:$0xff]  }
 0x1bb   :  { %3603 = vmatprep.mubr.bf16.mxu0 %v2263_v10  ;;  %3475 = vmatmul.mubr.bf16.vlgmr.msra.gmra.mrb[8].mxu1 %v5299_v56  ;;  %v4848_v10 = vld [vmem:[#allocation8 + $0x2c8] ss:$16 sps:$4 sm:$0xff]  }
 0x1bc   :  { %3587 = vmatprep.subr.bf16.mxu0 %v4787_v59  ;;  %3486 = vmatpush1.bf16.msra.mxu1 %v4809_v11  ;;  %v4856_v59 = vld [vmem:[#allocation8 + $0x2ec] ss:$16 sps:$4 sm:$0xff]   ;;  %v4899_v11 = vld [vmem:[#allocation8 + $0x3e0] ss:$16 sps:$4 sm:$0xff]  }
 0x1bd   :  { %3487 = vmatprep.subr.bf16.mxu1 %v4817_v13  ;;  %v4907_v13 = vld [vmem:[#allocation8 + $0x404] ss:$16 sps:$4 sm:$0xff]  }
 0x1be   :  { %3588 = vmatpush1.bf16.msra.mxu0 %v4785_v14  ;;  %v4854_v14 = vld [vmem:[#allocation8 + $0x2e8] ss:$16 sps:$4 sm:$0xff]  }
 0x1bf   :  { %3589 = vmatprep.subr.bf16.mxu0 %v4790_v16  ;;  %v4862_v16 = vld [vmem:[#allocation8 + $0x30c] ss:$16 sps:$4 sm:$0xff]  }
 0x1c0   :  { %3488 = vmatpush1.bf16.msra.mxu1 %v4815_v17  ;;  %v4860_v17 = vld [vmem:[#allocation8 + $0x308] ss:$16 sps:$4 sm:$0xff]  }
 0x1c1   :  { %3489 = vmatprep.subr.bf16.mxu1 %v4823_v18  ;;  %v4868_v18 = vld [vmem:[#allocation8 + $0x32c] ss:$16 sps:$4 sm:$0xff]  }
 0x1c2   :  { %3590 = vmatpush1.bf16.msra.mxu0 %v4788_v19  ;;  %v4866_v19 = vld [vmem:[#allocation8 + $0x328] ss:$16 sps:$4 sm:$0xff]  }
 0x1c3   :  { %3591 = vmatprep.subr.bf16.mxu0 %v4793_v20  ;;  %v4874_v20 = vld [vmem:[#allocation8 + $0x34c] ss:$16 sps:$4 sm:$0xff]  }
 0x1c4   :  { %3490 = vmatpush1.bf16.msra.mxu1 %v4821_v21  ;;  %v4872_v21 = vld [vmem:[#allocation8 + $0x348] ss:$16 sps:$4 sm:$0xff]  }
 0x1c5   :  { %3491 = vmatprep.subr.bf16.mxu1 %v4829_v22  ;;  %v4880_v22 = vld [vmem:[#allocation8 + $0x36c] ss:$16 sps:$4 sm:$0xff]  }
 0x1c6   :  { %3592 = vmatpush1.bf16.msra.mxu0 %v4791_v24  ;;  %v4878_v24 = vld [vmem:[#allocation8 + $0x368] ss:$16 sps:$4 sm:$0xff]  }
 0x1c7   :  { %3593 = vmatprep.subr.bf16.mxu0 %v4796_v25  ;;  %v4886_v25 = vld [vmem:[#allocation8 + $0x38c] ss:$16 sps:$4 sm:$0xff]  }
 0x1c8   :  { %3492 = vmatpush1.bf16.msra.mxu1 %v4827_v26  ;;  %v4884_v26 = vld [vmem:[#allocation8 + $0x388] ss:$16 sps:$4 sm:$0xff]  }
 0x1c9   :  { %3493 = vmatprep.subr.bf16.mxu1 %v4835_v27  ;;  %v4892_v27 = vld [vmem:[#allocation8 + $0x3ac] ss:$16 sps:$4 sm:$0xff]  }
 0x1ca   :  { %3594 = vmatpush1.bf16.msra.mxu0 %v4794_v28  ;;  %v4890_v28 = vld [vmem:[#allocation8 + $0x3a8] ss:$16 sps:$4 sm:$0xff]  }
 0x1cb   :  { %3595 = vmatprep.subr.bf16.mxu0 %v4799_v29  ;;  %v4898_v29 = vld [vmem:[#allocation8 + $0x3cc] ss:$16 sps:$4 sm:$0xff]  }
 0x1cc   :  { %3494 = vmatpush1.bf16.msra.mxu1 %v4833_v30  ;;  %v4896_v30 = vld [vmem:[#allocation8 + $0x3c8] ss:$16 sps:$4 sm:$0xff]  }
 0x1cd   :  { %3495 = vmatprep.subr.bf16.mxu1 %v4841_v31  ;;  %v4904_v31 = vld [vmem:[#allocation8 + $0x3ec] ss:$16 sps:$4 sm:$0xff]  }
 0x1ce   :  { %3596 = vmatpush1.bf16.msra.mxu0 %v4797_v32  ;;  %v4902_v32 = vld [vmem:[#allocation8 + $0x3e8] ss:$16 sps:$4 sm:$0xff]  }
 0x1cf   :  { %3597 = vmatprep.subr.bf16.mxu0 %v4802_v33  ;;  %v4910_v33 = vld [vmem:[#allocation8 + $0x40c] ss:$16 sps:$4 sm:$0xff]  }
 0x1d0   :  { %3496 = vmatpush1.bf16.msra.mxu1 %v4839_v34  ;;  %v403_v34 = vsub.s32 2, %v5283_v50 }
 0x1d1   :  { %3497 = vmatprep.subr.bf16.mxu1 %v4847_v35  ;;  %v407_v35 = vsub.s32 3, %v5283_v50 }
 0x1d2   :  { %3598 = vmatpush1.bf16.msra.mxu0 %v4800_v36  ;;  %v404_v36 = vrot.slane %v5286_v45, %v403_v34 }
 0x1d3   :  { %3599 = vmatprep.subr.bf16.mxu0 %v4805_v37  ;;  %v408_v37 = vrot.slane %v5286_v45, %v407_v35 }
 0x1d4   :  { %3498 = vmatpush1.bf16.msra.mxu1 %v4845_v38 }
 0x1d5   :  { %3499 = vmatprep.subr.bf16.mxu1 %v4853_v39 }
 0x1d6   :  { %3600 = vmatpush1.bf16.msra.mxu0 %v4803_v12 }
 0x1d7   :  { %3601 = vmatprep.subr.bf16.mxu0 %v4808_v40 }
 0x1d8   :  { %3500 = vmatpush1.bf16.msra.mxu1 %v4851_v41 }
 0x1d9   :  { %3501 = vmatprep.subr.bf16.mxu1 %v4859_v15 }
 0x1da   :  { %3602 = vmatpush1.bf16.msra.mxu0 %v4806_v42 }
 0x1db   :  { %3614 = vmatprep.subr.bf16.mxu0 %v4814_v55 }
 0x1dc   :  { %3502 = vmatpush1.bf16.msra.mxu1 %v4857_v46 }
 0x1dd   :  { %3604 = vmatmul.mubr.bf16.vlgmr.msra.gmra.mrb[8].mxu0 %v5299_v56  ;;  %3503 = vmatprep.subr.bf16.mxu1 %v4865_v44  ;;  %v4901_v56 = vld [vmem:[#allocation8 + $0x3e4] ss:$16 sps:$4 sm:$0xff]  }
 0x1de   :  { %3615 = vmatpush1.bf16.msra.mxu0 %v4812_v47 }
 0x1df   :  { %3616 = vmatprep.subr.bf16.mxu0 %v4820_v48 }
 0x1e0   :  { %3504 = vmatpush1.bf16.msra.mxu1 %v4863_v49 }
 0x1e1   :  { %3505 = vmatprep.subr.bf16.mxu1 %v4871_v51 }
 0x1e2   :  { %3617 = vmatpush1.bf16.msra.mxu0 %v4818_v52  ;;  %v4905_v52 = vld [vmem:[#allocation8 + $0x400] ss:$16 sps:$4 sm:$0xff]  }
 0x1e3   :  { %3618 = vmatprep.subr.bf16.mxu0 %v4826_v57  ;;  %v4908_v57 = vld [vmem:[#allocation8 + $0x408] ss:$16 sps:$4 sm:$0xff]  }
 0x1e4   :  { %3506 = vmatpush1.bf16.msra.mxu1 %v4869_v58  ;;  %v4913_v58 = vld [vmem:[#allocation8 + $0x424] ss:$16 sps:$4 sm:$0xff]  }
 0x1e5   :  { %3507 = vmatprep.subr.bf16.mxu1 %v4877_v60  ;;  %v4916_v60 = vld [vmem:[#allocation8 + $0x42c] ss:$16 sps:$4 sm:$0xff]  }
 0x1e6   :  { %3619 = vmatpush1.bf16.msra.mxu0 %v4824_v61  ;;  %v4911_v61 = vld [vmem:[#allocation8 + $0x420] ss:$16 sps:$4 sm:$0xff]  }
 0x1e7   :  { %3620 = vmatprep.subr.bf16.mxu0 %v4832_v62  ;;  %v4914_v62 = vld [vmem:[#allocation8 + $0x428] ss:$16 sps:$4 sm:$0xff]  }
 0x1e8   :  { %3508 = vmatpush1.bf16.msra.mxu1 %v4875_v63  ;;  %v4919_v63 = vld [vmem:[#allocation8 + $0x444] ss:$16 sps:$4 sm:$0xff]  }
 0x1e9   :  { %3509 = vmatprep.subr.bf16.mxu1 %v4883_v0  ;;  %v4922_v0 = vld [vmem:[#allocation8 + $0x44c] ss:$16 sps:$4 sm:$0xff]  }
 0x1ea   :  { %3621 = vmatpush1.bf16.msra.mxu0 %v4830_v1  ;;  %v4917_v1 = vld [vmem:[#allocation8 + $0x440] ss:$16 sps:$4 sm:$0xff]  }
 0x1eb   :  { %3622 = vmatprep.subr.bf16.mxu0 %v4838_v2  ;;  %v4920_v2 = vld [vmem:[#allocation8 + $0x448] ss:$16 sps:$4 sm:$0xff]  }
 0x1ec   :  { %3510 = vmatpush1.bf16.msra.mxu1 %v4881_v3  ;;  %v4925_v3 = vld [vmem:[#allocation8 + $0x464] ss:$16 sps:$4 sm:$0xff]  }
 0x1ed   :  { %3511 = vmatprep.subr.bf16.mxu1 %v4889_v4  ;;  %v4928_v4 = vld [vmem:[#allocation8 + $0x46c] ss:$16 sps:$4 sm:$0xff]  }
 0x1ee   :  { %3623 = vmatpush1.bf16.msra.mxu0 %v4836_v5  ;;  %v4923_v5 = vld [vmem:[#allocation8 + $0x460] ss:$16 sps:$4 sm:$0xff]  }
 0x1ef   :  { %3624 = vmatprep.subr.bf16.mxu0 %v4844_v53  ;;  %v4926_v53 = vld [vmem:[#allocation8 + $0x468] ss:$16 sps:$4 sm:$0xff]  }
 0x1f0   :  { %3512 = vmatpush1.bf16.msra.mxu1 %v4887_v6  ;;  %v4931_v6 = vld [vmem:[#allocation8 + $0x484] ss:$16 sps:$4 sm:$0xff]  }
 0x1f1   :  { %3513 = vmatprep.subr.bf16.mxu1 %v4895_v7  ;;  %v4934_v7 = vld [vmem:[#allocation8 + $0x48c] ss:$16 sps:$4 sm:$0xff]  }
 0x1f2   :  { %3625 = vmatpush1.bf16.msra.mxu0 %v4842_v8  ;;  %v4929_v8 = vld [vmem:[#allocation8 + $0x480] ss:$16 sps:$4 sm:$0xff]  }
 0x1f3   :  { %3626 = vmatprep.subr.bf16.mxu0 %v4850_v54  ;;  %v4932_v54 = vld [vmem:[#allocation8 + $0x488] ss:$16 sps:$4 sm:$0xff]  }
 0x1f4   :  { %3514 = vmatpush1.bf16.msra.mxu1 %v4893_v9  ;;  %v4937_v9 = vld [vmem:[#allocation8 + $0x4a4] ss:$16 sps:$4 sm:$0xff]  }
 0x1f5   :  { %3515 = vmatprep.subr.bf16.mxu1 %v4901_v56  ;;  %v4940_v56 = vld [vmem:[#allocation8 + $0x4ac] ss:$16 sps:$4 sm:$0xff]  }
 0x1f6   :  { %3627 = vmatpush1.bf16.msra.mxu0 %v4848_v10  ;;  %v4935_v10 = vld [vmem:[#allocation8 + $0x4a0] ss:$16 sps:$4 sm:$0xff]  }
 0x1f7   :  { %3628 = vmatprep.subr.bf16.mxu0 %v4856_v59  ;;  %v4938_v59 = vld [vmem:[#allocation8 + $0x4a8] ss:$16 sps:$4 sm:$0xff]  }
 0x1f8   :  { %3516 = vmatpush1.bf16.msra.mxu1 %v4899_v11  ;;  %v4943_v11 = vld [vmem:[#allocation8 + $0x4c4] ss:$16 sps:$4 sm:$0xff]  }
 0x1f9   :  { %3528 = vmatprep.subr.bf16.mxu1 %v4907_v13  ;;  %v4946_v13 = vld [vmem:[#allocation8 + $0x4cc] ss:$16 sps:$4 sm:$0xff]  }
 0x1fa   :  { %3629 = vmatpush1.bf16.msra.mxu0 %v4854_v14  ;;  %v4941_v14 = vld [vmem:[#allocation8 + $0x4c0] ss:$16 sps:$4 sm:$0xff]  }
 0x1fb   :  { %3630 = vmatprep.subr.bf16.mxu0 %v4862_v16  ;;  %v4944_v16 = vld [vmem:[#allocation8 + $0x4c8] ss:$16 sps:$4 sm:$0xff]  }
 0x1fe   :  { %3631 = vmatpush1.bf16.msra.mxu0 %v4860_v17  ;;  %v4949_v17 = vld [vmem:[#allocation8 + $0x4e4] ss:$16 sps:$4 sm:$0xff]  }
 0x1ff   :  { %3632 = vmatprep.subr.bf16.mxu0 %v4868_v18  ;;  %v4952_v18 = vld [vmem:[#allocation8 + $0x4ec] ss:$16 sps:$4 sm:$0xff]  }
 0x202   :  { %3633 = vmatpush1.bf16.msra.mxu0 %v4866_v19  ;;  %v4947_v19 = vld [vmem:[#allocation8 + $0x4e0] ss:$16 sps:$4 sm:$0xff]  }
 0x203   :  { %3634 = vmatprep.subr.bf16.mxu0 %v4874_v20  ;;  %v4950_v20 = vld [vmem:[#allocation8 + $0x4e8] ss:$16 sps:$4 sm:$0xff]  }
 0x206   :  { %3635 = vmatpush1.bf16.msra.mxu0 %v4872_v21  ;;  %v4955_v21 = vld [vmem:[#allocation8 + $0x504] ss:$16 sps:$4 sm:$0xff]  }
 0x207   :  { %3636 = vmatprep.subr.bf16.mxu0 %v4880_v22  ;;  %v4958_v22 = vld [vmem:[#allocation8 + $0x50c] ss:$16 sps:$4 sm:$0xff]  }
 0x20a   :  { %3637 = vmatpush1.bf16.msra.mxu0 %v4878_v24  ;;  %v4953_v24 = vld [vmem:[#allocation8 + $0x500] ss:$16 sps:$4 sm:$0xff]  }
 0x20b   :  { %3638 = vmatprep.subr.bf16.mxu0 %v4886_v25  ;;  %v4956_v25 = vld [vmem:[#allocation8 + $0x508] ss:$16 sps:$4 sm:$0xff]  }
 0x20e   :  { %3639 = vmatpush1.bf16.msra.mxu0 %v4884_v26  ;;  %v4961_v26 = vld [vmem:[#allocation8 + $0x524] ss:$16 sps:$4 sm:$0xff]  }
 0x20f   :  { %3640 = vmatprep.subr.bf16.mxu0 %v4892_v27  ;;  %v4964_v27 = vld [vmem:[#allocation8 + $0x52c] ss:$16 sps:$4 sm:$0xff]  }
 0x212   :  { %3641 = vmatpush1.bf16.msra.mxu0 %v4890_v28  ;;  %v4959_v28 = vld [vmem:[#allocation8 + $0x520] ss:$16 sps:$4 sm:$0xff]  }
 0x213   :  { %3642 = vmatprep.subr.bf16.mxu0 %v4898_v29  ;;  %v4962_v29 = vld [vmem:[#allocation8 + $0x528] ss:$16 sps:$4 sm:$0xff]  }
 0x216   :  { %3643 = vmatpush1.bf16.msra.mxu0 %v4896_v30  ;;  %v4967_v30 = vld [vmem:[#allocation8 + $0x544] ss:$16 sps:$4 sm:$0xff]  }
 0x217   :  { %3644 = vmatprep.subr.bf16.mxu0 %v4904_v31  ;;  %v4970_v31 = vld [vmem:[#allocation8 + $0x54c] ss:$16 sps:$4 sm:$0xff]  }
 0x21a   :  { %3645 = vmatpush1.bf16.msra.mxu0 %v4902_v32  ;;  %v4965_v32 = vld [vmem:[#allocation8 + $0x540] ss:$16 sps:$4 sm:$0xff]  }
 0x21b   :  { %3657 = vmatprep.subr.bf16.mxu0 %v4910_v33  ;;  %v4968_v33 = vld [vmem:[#allocation8 + $0x548] ss:$16 sps:$4 sm:$0xff]  }
 0x22f   :  { %v2112_v38 = vpop.f32.mrb[4].mxu1 }
 0x230   :  { %v4215_v39 = vadd.f32 %v2112_v38, %v404_v36  ;;  %v2114_v12 = vpop.f32.mrb[5].mxu1  ;;  %v4971_v38 = vld [vmem:[#allocation8 + $0x560] ss:$16 sps:$4 sm:$0xff]  }
 0x231   :  { %v4216_v40 = vadd.f32 %v2114_v12, %v408_v37  ;;  %v2116_v41 = vpop.f32.mrb[6].mxu1  ;;  %v4979_v12 = vld [vmem:[#allocation8 + $0x584] ss:$16 sps:$4 sm:$0xff]  }
 0x232   :  { %v4217_v15 = vadd.f32 %v2116_v41, %v404_v36  ;;  %v2118_v42 = vpop.f32.mrb[7].mxu1  ;;  %v2252_v46 = vmax.f32 %v4215_v39, 0.0  ;;  %v4973_v36 = vld [vmem:[#allocation8 + $0x564] ss:$16 sps:$4 sm:$0xff]   ;;  %v4974_v39 = vld [vmem:[#allocation8 + $0x568] ss:$16 sps:$4 sm:$0xff]  }
 0x233   :  { %v4218_v55 = vadd.f32 %v2118_v42, %v408_v37  ;;  %v2253_v47 = vmax.f32 %v4216_v40, 0.0  ;;  %v4976_v37 = vld [vmem:[#allocation8 + $0x56c] ss:$16 sps:$4 sm:$0xff]   ;;  %v4977_v41 = vld [vmem:[#allocation8 + $0x580] ss:$16 sps:$4 sm:$0xff]  }
 0x234   :  { %v2258_v44 = vmax.f32 %v4217_v15, 0.0  ;;  %v4982_v40 = vld [vmem:[#allocation8 + $0x58c] ss:$16 sps:$4 sm:$0xff]   ;;  %v4980_v15 = vld [vmem:[#allocation8 + $0x588] ss:$16 sps:$4 sm:$0xff]  }
 0x235   :  { %v2259_v48 = vmax.f32 %v4218_v55, 0.0  ;;  %v4985_v42 = vld [vmem:[#allocation8 + $0x5a4] ss:$16 sps:$4 sm:$0xff]   ;;  %v4988_v55 = vld [vmem:[#allocation8 + $0x5ac] ss:$16 sps:$4 sm:$0xff]  }
 0x236   :  { %v2264_v49 = vpack.c.bf16 %v2258_v44, %v2252_v46  ;;  %v411_v46 = vsub.s32 4, %v5283_v50  ;;  %v415_v44 = vsub.s32 5, %v5283_v50 }
 0x237   :  { %v2265_v51 = vpack.c.bf16 %v2259_v48, %v2253_v47  ;;  %v4983_v47 = vld [vmem:[#allocation8 + $0x5a0] ss:$16 sps:$4 sm:$0xff]   ;;  %v4986_v48 = vld [vmem:[#allocation8 + $0x5a8] ss:$16 sps:$4 sm:$0xff]  }
 0x239   :  { %3517 = vmatprep.mubr.bf16.mxu1 %v2265_v51  ;;  %3646 = vmatprep.mubr.bf16.mxu0 %v2265_v51  ;;  %v4991_v51 = vld [vmem:[#allocation8 + $0x5c4] ss:$16 sps:$4 sm:$0xff]  }
 0x23a   :  { %3518 = vmatmul.mubr.bf16.vlgmr.msra.gmra.mrb[8].mxu1 %v2264_v49  ;;  %3647 = vmatmul.mubr.bf16.vlgmr.msra.gmra.mrb[8].mxu0 %v2264_v49  ;;  %v412_v49 = vrot.slane %v5286_v45, %v411_v46 }
 0x23b   :  { %3529 = vmatpush1.bf16.msra.mxu1 %v4905_v52  ;;  %3658 = vmatpush1.bf16.msra.mxu0 %v4908_v57  ;;  %v4994_v52 = vld [vmem:[#allocation8 + $0x5cc] ss:$16 sps:$4 sm:$0xff]   ;;  %v416_v57 = vrot.slane %v5286_v45, %v415_v44  ;;  %v4998_v45 = vld [vmem:[#allocation8 + $0x5e8] ss:$16 sps:$4 sm:$0xff]  }
 0x23c   :  { %3530 = vmatprep.subr.bf16.mxu1 %v4913_v58  ;;  %3659 = vmatprep.subr.bf16.mxu0 %v4916_v60  ;;  %v4989_v60 = vld [vmem:[#allocation8 + $0x5c0] ss:$16 sps:$4 sm:$0xff]  }
 0x23f   :  { %3531 = vmatpush1.bf16.msra.mxu1 %v4911_v61  ;;  %3660 = vmatpush1.bf16.msra.mxu0 %v4914_v62  ;;  %v4992_v61 = vld [vmem:[#allocation8 + $0x5c8] ss:$16 sps:$4 sm:$0xff]  }
 0x240   :  { %3532 = vmatprep.subr.bf16.mxu1 %v4919_v63  ;;  %3661 = vmatprep.subr.bf16.mxu0 %v4922_v0  ;;  %v4997_v0 = vld [vmem:[#allocation8 + $0x5e4] ss:$16 sps:$4 sm:$0xff]  }
 0x243   :  { %3533 = vmatpush1.bf16.msra.mxu1 %v4917_v1  ;;  %3662 = vmatpush1.bf16.msra.mxu0 %v4920_v2  ;;  %v5000_v1 = vld [vmem:[#allocation8 + $0x5ec] ss:$16 sps:$4 sm:$0xff]  }
 0x244   :  { %3534 = vmatprep.subr.bf16.mxu1 %v4925_v3  ;;  %3663 = vmatprep.subr.bf16.mxu0 %v4928_v4 }
 0x247   :  { %3535 = vmatpush1.bf16.msra.mxu1 %v4923_v5  ;;  %3664 = vmatpush1.bf16.msra.mxu0 %v4926_v53 }
 0x248   :  { %3536 = vmatprep.subr.bf16.mxu1 %v4931_v6  ;;  %3665 = vmatprep.subr.bf16.mxu0 %v4934_v7  ;;  %v4995_v6 = vld [vmem:[#allocation8 + $0x5e0] ss:$16 sps:$4 sm:$0xff]  }
 0x24b   :  { %3537 = vmatpush1.bf16.msra.mxu1 %v4929_v8  ;;  %3666 = vmatpush1.bf16.msra.mxu0 %v4932_v54 }
 0x24c   :  { %3538 = vmatprep.subr.bf16.mxu1 %v4937_v9  ;;  %3667 = vmatprep.subr.bf16.mxu0 %v4940_v56 }
 0x24f   :  { %3539 = vmatpush1.bf16.msra.mxu1 %v4935_v10  ;;  %3668 = vmatpush1.bf16.msra.mxu0 %v4938_v59  ;;  %v2460_v59 = vld [vmem:[#allocation10] sm:$0xf] }
 0x250   :  { %3540 = vmatprep.subr.bf16.mxu1 %v4943_v11  ;;  %3669 = vmatprep.subr.bf16.mxu0 %v4946_v13  ;;  %v2465_v11 = vrot.slane %v2460_v59, %v395_v43  ;;  %v2473_v13 = vrot.slane %v2460_v59, %v403_v34 }
 0x253   :  { %3541 = vmatpush1.bf16.msra.mxu1 %v4941_v14  ;;  %3670 = vmatpush1.bf16.msra.mxu0 %v4944_v16  ;;  %v2469_v14 = vrot.slane %v2460_v59, %v399_v23  ;;  %v2477_v16 = vrot.slane %v2460_v59, %v407_v35 }
 0x254   :  { %3542 = vmatprep.subr.bf16.mxu1 %v4949_v17  ;;  %3671 = vmatprep.subr.bf16.mxu0 %v4952_v18 }
 0x257   :  { %3543 = vmatpush1.bf16.msra.mxu1 %v4947_v19  ;;  %3672 = vmatpush1.bf16.msra.mxu0 %v4950_v20 }
 0x258   :  { %3544 = vmatprep.subr.bf16.mxu1 %v4955_v21  ;;  %3673 = vmatprep.subr.bf16.mxu0 %v4958_v22 }
 0x25b   :  { %3545 = vmatpush1.bf16.msra.mxu1 %v4953_v24  ;;  %3674 = vmatpush1.bf16.msra.mxu0 %v4956_v25 }
 0x25c   :  { %3546 = vmatprep.subr.bf16.mxu1 %v4961_v26  ;;  %3675 = vmatprep.subr.bf16.mxu0 %v4964_v27 }
 0x25f   :  { %3547 = vmatpush1.bf16.msra.mxu1 %v4959_v28  ;;  %3676 = vmatpush1.bf16.msra.mxu0 %v4962_v29 }
 0x260   :  { %3548 = vmatprep.subr.bf16.mxu1 %v4967_v30  ;;  %3677 = vmatprep.subr.bf16.mxu0 %v4970_v31 }
 0x263   :  { %3549 = vmatpush1.bf16.msra.mxu1 %v4965_v32  ;;  %3678 = vmatpush1.bf16.msra.mxu0 %v4968_v33 }
 0x264   :  { %3550 = vmatprep.subr.bf16.mxu1 %v4973_v36  ;;  %3679 = vmatprep.subr.bf16.mxu0 %v4976_v37 }
 0x267   :  { %3551 = vmatpush1.bf16.msra.mxu1 %v4971_v38  ;;  %3680 = vmatpush1.bf16.msra.mxu0 %v4974_v39 }
 0x268   :  { %3552 = vmatprep.subr.bf16.mxu1 %v4979_v12  ;;  %3681 = vmatprep.subr.bf16.mxu0 %v4982_v40 }
 0x26b   :  { %3553 = vmatpush1.bf16.msra.mxu1 %v4977_v41  ;;  %3682 = vmatpush1.bf16.msra.mxu0 %v4980_v15 }
 0x26c   :  { %3554 = vmatprep.subr.bf16.mxu1 %v4985_v42  ;;  %3683 = vmatprep.subr.bf16.mxu0 %v4988_v55 }
 0x26f   :  { %3555 = vmatpush1.bf16.msra.mxu1 %v4983_v47  ;;  %3684 = vmatpush1.bf16.msra.mxu0 %v4986_v48 }
 0x270   :  { %v2241_v58 = vpop.f32.mrb[4].mxu0  ;;  %3556 = vmatprep.subr.bf16.mxu1 %v4991_v51  ;;  %3685 = vmatprep.subr.bf16.mxu0 %v4994_v52 }
 0x271   :  { %v4219_v62 = vadd.f32 %v2241_v58, %v412_v49  ;;  %v2243_v63 = vpop.f32.mrb[5].mxu0 }
 0x272   :  { %v4220_v2 = vadd.f32 %v2243_v63, %v416_v57  ;;  %v2245_v3 = vpop.f32.mrb[6].mxu0 }
 0x273   :  { %v4221_v4 = vadd.f32 %v2245_v3, %v412_v49  ;;  %v2247_v5 = vpop.f32.mrb[7].mxu0  ;;  %3557 = vmatpush1.bf16.msra.mxu1 %v4989_v60  ;;  %3686 = vmatpush1.bf16.msra.mxu0 %v4992_v61  ;;  %v2254_v7 = vmax.f32 %v4219_v62, 0.0 }
 0x274   :  { %v4222_v53 = vadd.f32 %v2247_v5, %v416_v57  ;;  %3558 = vmatprep.subr.bf16.mxu1 %v4997_v0  ;;  %3687 = vmatprep.subr.bf16.mxu0 %v5000_v1  ;;  %v2255_v54 = vmax.f32 %v4220_v2, 0.0 }
 0x275   :  { %v2260_v8 = vmax.f32 %v4221_v4, 0.0 }
 0x276   :  { %v2261_v9 = vmax.f32 %v4222_v53, 0.0 }
 0x277   :  { %v2266_v56 = vpack.c.bf16 %v2260_v8, %v2254_v7  ;;  %3559 = vmatpush1.bf16.msra.mxu1 %v4995_v6  ;;  %3688 = vmatpush1.bf16.msra.mxu0 %v4998_v45 }
 0x278   :  { %v2267_v10 = vpack.c.bf16 %v2261_v9, %v2255_v54 }
 0x27a   :  { %3560 = vmatprep.mubr.bf16.mxu1 %v2267_v10  ;;  %3689 = vmatprep.mubr.bf16.mxu0 %v2267_v10 }
 0x27b   :  { %3561 = vmatmul.mubr.bf16.vlgmr.msra.gmra.mrb[8].mxu1 %v2266_v56  ;;  %3690 = vmatmul.mubr.bf16.vlgmr.msra.gmra.mrb[8].mxu0 %v2266_v56 }
 0x34e   :  { %v3562_v17 = vpop.f32.mrb[8].mxu1  ;;  %v3691_v18 = vpop.f32.mrb[8].mxu0 }
 0x34f   :  { %v4223_v19 = vadd.f32 %v3562_v17, %v2465_v11  ;;  %v4227_v20 = vadd.f32 %v3691_v18, %v2473_v13  ;;  %v3564_v21 = vpop.f32.mrb[9].mxu1  ;;  %v3693_v22 = vpop.f32.mrb[9].mxu0 }
 0x350   :  { %v4224_v24 = vadd.f32 %v3564_v21, %v2469_v14  ;;  %v4228_v25 = vadd.f32 %v3693_v22, %v2477_v16  ;;  %v3566_v43 = vpop.f32.mrb[10].mxu1  ;;  %v3695_v26 = vpop.f32.mrb[10].mxu0 }
 0x351   :  { %3700 = vst [vmem:[#allocation11] sm:$0xff] %v4223_v19  ;;  %3702 = vst [vmem:[#allocation11 + $0x10] sm:$0xff] %v4227_v20  ;;  %v4225_v34 = vadd.f32 %v3566_v43, %v2465_v11  ;;  %v4229_v27 = vadd.f32 %v3695_v26, %v2473_v13  ;;  %v3568_v23 = vpop.f32.mrb[11].mxu1  ;;  %v3697_v28 = vpop.f32.mrb[11].mxu0 }
 0x352   :  { %3701 = vst [vmem:[#allocation11 + $0x8] sm:$0xff] %v4224_v24  ;;  %3703 = vst [vmem:[#allocation11 + $0x18] sm:$0xff] %v4228_v25  ;;  %v4226_v50 = vadd.f32 %v3568_v23, %v2469_v14  ;;  %v4230_v35 = vadd.f32 %v3697_v28, %v2477_v16 }
 0x353   :  { %3704 = vst [vmem:[#allocation11 + $0x20] sm:$0xff] %v4225_v34  ;;  %3706 = vst [vmem:[#allocation11 + $0x30] sm:$0xff] %v4229_v27 }
 0x354   :  { %3705 = vst [vmem:[#allocation11 + $0x28] sm:$0xff] %v4226_v50  ;;  %3707 = vst [vmem:[#allocation11 + $0x38] sm:$0xff] %v4230_v35 }
 0x355   :  { %5122 = shalt.err (!%p5119_p2)
}
 0x356   :  { %s5123_s7 = scalar_lea.hbm %s5340_s5, 1024 }
 0x357   :  { %p5124_p3 = scmp.ne.s32.totalorder %s5340_s5, %s5123_s7  ;;  %p5127_p4 = scmp.lt.u32.totalorder %s5123_s7, %s5340_s5 }
 0x359   :  { %p5129_p5 = pnand %p5127_p4, %p5124_p3 }
 0x35b   :  { %5132 = shalt.err (!%p5129_p5)
}
 0x35c   :  { %s5153_s12 = smov 512   ;;  %s5154_s13 = smov 32  }
 0x35d   :  { %3719 = dma.vmem_to_hbm [thread:$0]  %s3714_s29, 1024, %s5340_s5, [#allocation4], %s5153_s12, %s5153_s12, %s5154_s13  }
 0x35e   :  { %5139 = dma.done.wait [#allocation4], 1024  }
 0x35f   :  { %5140 = vsyncadd [#allocation4], 4294966272 }
 0x360   :  { %3723 = vsyncpa [#allocation3], 1 }
 0x361   :  { %3724 = vsyncpa [#allocation6], 1 }
 0x362   :  { %3725 = vsyncpa [#allocation9], 1 }
 0x363   :  { %3726 = vsyncpa [#allocation4], 1 }

// kernel: tpu_custom_call.1
= control target key start
LH: loop header
LB: loop body
LE: loop exit
PB: predicated region body
PF: predicated region fallthrough
CT: control target
= control target key end

     0   :  { %10 = vsyncpa [#allocation3], 0  ;;  %s5335_s0 = inlined_call_operand.hbm [shape: f32[16,768], index: 0, kind: input, shape index: {}]   ;;  %s5336_s1 = inlined_call_operand.hbm [shape: bf16[768,768], index: 1, kind: input, shape index: {}]   ;;  %s5337_s2 = inlined_call_operand.hbm [shape: f32[1,768], index: 2, kind: input, shape index: {}]   ;;  %s5338_s3 = inlined_call_operand.hbm [shape: bf16[768,512], index: 3, kind: input, shape index: {}]   ;;  %s5339_s4 = inlined_call_operand.hbm [shape: f32[1,512], index: 4, kind: input, shape index: {}]   ;;  %s5340_s5 = inlined_call_operand.hbm [shape: f32[16,512], index: 5, kind: output, shape index: {}]  }
   0x1   :  { %11 = vsyncpa [#allocation6], 0 }
   0x2   :  { %12 = vsyncpa [#allocation9], 0 }
   0x3   :  { %13 = vsyncpa [#allocation4], 0  ;;  %s5141_s18 = smov [#allocation5]   ;;  %s5001_s22 = scalar_lea.hbm %s5336_s1, 36864 }
   0x4   :  { %s31_s19 = sshll.u32 %s5141_s18, 4  ;;  %p5002_p0 = scmp.ne.s32.totalorder %s5336_s1, %s5001_s22  ;;  %s32_s19 = int_to_ptr.vmem [resolvable:$true] %s31_s19 }
   0x5   :  { %p5005_p1 = scmp.lt.u32.totalorder %s5001_s22, %s5336_s1 }
   0x7   :  { %p5007_p2 = pnand %p5005_p1, %p5002_p0 }
   0x9   :  { %5010 = shalt.err (!%p5007_p2)
}
   0xa   :  { %s5011_s27 = scalar_lea.vmem %s32_s19, 36864  ;;  %p5016_p4 = scmp.lt.s32.totalorder %s32_s19, %s32_s19 }
   0xb   :  { %p5012_p3 = scmp.ne.s32.totalorder %s32_s19, %s5011_s27  ;;  %p5017_p5 = scmp.lt.s32.totalorder %s5011_s27, %s5011_s27 }
   0xd   :  { %p5018_p6 = por %p5017_p5, %p5016_p4 }
   0xf   :  { %p5019_p7 = pnand %p5018_p6, %p5012_p3 }
  0x11   :  { %5022 = shalt.err (!%p5019_p7)
}
  0x12   :  { %s5142_s28 = smov 384   ;;  %s5143_s29 = smov 24  }
  0x13   :  { %37 = dma.hbm_to_vmem [thread:$0]  %s5336_s1, 36864, %s32_s19, [#allocation6], %s5142_s28, %s5142_s28, %s5143_s29  }
  0x14   :  { %s5144_s7 = smov [#allocation8]   ;;  %s5023_s11 = scalar_lea.hbm %s5338_s3, 24576 }
  0x15   :  { %s53_s8 = sshll.u32 %s5144_s7, 4  ;;  %p5024_p8 = scmp.ne.s32.totalorder %s5338_s3, %s5023_s11  ;;  %s54_s8 = int_to_ptr.vmem [resolvable:$true] %s53_s8 }
  0x16   :  { %p5027_p9 = scmp.lt.u32.totalorder %s5023_s11, %s5338_s3 }
  0x18   :  { %p5029_p10 = pnand %p5027_p9, %p5024_p8 }
  0x1a   :  { %5032 = shalt.err (!%p5029_p10)
}
  0x1b   :  { %s5033_s16 = scalar_lea.vmem %s54_s8, 24576  ;;  %p5038_p12 = scmp.lt.s32.totalorder %s54_s8, %s54_s8 }
  0x1c   :  { %p5034_p11 = scmp.ne.s32.totalorder %s54_s8, %s5033_s16  ;;  %p5039_p13 = scmp.lt.s32.totalorder %s5033_s16, %s5033_s16 }
  0x1e   :  { %p5040_p0 = por %p5039_p13, %p5038_p12 }
  0x20   :  { %p5041_p1 = pnand %p5040_p0, %p5034_p11 }
  0x22   :  { %5044 = shalt.err (!%p5041_p1)
}
  0x23   :  { %s5145_s1 = smov 256   ;;  %s5146_s17 = smov 16  }
  0x24   :  { %59 = dma.hbm_to_vmem [thread:$0]  %s5338_s3, 24576, %s54_s8, [#allocation9], %s5145_s1, %s5145_s1, %s5146_s17  }
  0x25   :  { %s5147_s20 = smov [#allocation2]   ;;  %s5045_s24 = scalar_lea.hbm %s5335_s0, 1536 }
  0x26   :  { %s19_s21 = sshll.u32 %s5147_s20, 4  ;;  %p5046_p2 = scmp.ne.s32.totalorder %s5335_s0, %s5045_s24  ;;  %s20_s21 = int_to_ptr.vmem [resolvable:$true] %s19_s21 }
  0x27   :  { %p5049_p3 = scmp.lt.u32.totalorder %s5045_s24, %s5335_s0 }
  0x29   :  { %p5051_p4 = pnand %p5049_p3, %p5046_p2 }
  0x2b   :  { %5054 = shalt.err (!%p5051_p4)
}
  0x2c   :  { %s5055_s29 = scalar_lea.vmem %s20_s21, 1536  ;;  %p5060_p6 = scmp.lt.s32.totalorder %s20_s21, %s20_s21 }
  0x2d   :  { %p5056_p5 = scmp.ne.s32.totalorder %s20_s21, %s5055_s29  ;;  %p5061_p7 = scmp.lt.s32.totalorder %s5055_s29, %s5055_s29 }
  0x2f   :  { %p5062_p8 = por %p5061_p7, %p5060_p6 }
  0x31   :  { %p5063_p9 = pnand %p5062_p8, %p5056_p5 }
  0x33   :  { %5066 = shalt.err (!%p5063_p9)
}
  0x34   :  { %s5148_s3 = smov 768   ;;  %s5149_s30 = smov 48  }
  0x35   :  { %25 = dma.hbm_to_vmem [thread:$0]  %s5335_s0, 1536, %s20_s21, [#allocation3], %s5148_s3, %s5148_s3, %s5149_s30  }
  0x36   :  { %s5150_s8 = smov [#allocation7]   ;;  %s5151_s10 = smov [#allocation10]  }
  0x37   :  { %s44_s9 = sshll.u32 %s5150_s8, 4  ;;  %s66_s11 = sshll.u32 %s5151_s10, 4  ;;  %s45_s9 = int_to_ptr.vmem [resolvable:$true] %s44_s9  ;;  %s67_s11 = int_to_ptr.vmem [resolvable:$true] %s66_s11 }
  0x38   :  { %s5067_s14 = scalar_lea.hbm %s5337_s2, 96 }
  0x39   :  { %p5068_p10 = scmp.ne.s32.totalorder %s5337_s2, %s5067_s14  ;;  %p5071_p11 = scmp.lt.u32.totalorder %s5067_s14, %s5337_s2 }
  0x3b   :  { %p5073_p12 = pnand %p5071_p11, %p5068_p10 }
  0x3d   :  { %5076 = shalt.err (!%p5073_p12)
}
  0x3e   :  { %s5077_s0 = scalar_lea.vmem %s45_s9, 96  ;;  %p5082_p0 = scmp.lt.s32.totalorder %s45_s9, %s45_s9 }
  0x3f   :  { %p5078_p13 = scmp.ne.s32.totalorder %s45_s9, %s5077_s0  ;;  %p5083_p1 = scmp.lt.s32.totalorder %s5077_s0, %s5077_s0 }
  0x41   :  { %p5084_p2 = por %p5083_p1, %p5082_p0 }
  0x43   :  { %p5085_p3 = pnand %p5084_p2, %p5078_p13 }
  0x45   :  { %5088 = shalt.err (!%p5085_p3)
}
  0x46   :  { %47 = dma.hbm_to_vmem [thread:$0]  %s5337_s2, 96, %s45_s9, [#allocation6]  }
  0x47   :  { %s5089_s22 = scalar_lea.hbm %s5339_s4, 64 }
  0x48   :  { %p5090_p4 = scmp.ne.s32.totalorder %s5339_s4, %s5089_s22  ;;  %p5093_p5 = scmp.lt.u32.totalorder %s5089_s22, %s5339_s4 }
  0x4a   :  { %p5095_p6 = pnand %p5093_p5, %p5090_p4 }
  0x4c   :  { %5098 = shalt.err (!%p5095_p6)
}
  0x4d   :  { %s5099_s27 = scalar_lea.vmem %s67_s11, 64  ;;  %p5104_p8 = scmp.lt.s32.totalorder %s67_s11, %s67_s11 }
  0x4e   :  { %p5100_p7 = scmp.ne.s32.totalorder %s67_s11, %s5099_s27  ;;  %p5105_p9 = scmp.lt.s32.totalorder %s5099_s27, %s5099_s27 }
  0x50   :  { %p5106_p10 = por %p5105_p9, %p5104_p8 }
  0x52   :  { %p5107_p11 = pnand %p5106_p10, %p5100_p7 }
  0x54   :  { %5110 = shalt.err (!%p5107_p11)
}
  0x55   :  { %69 = dma.hbm_to_vmem [thread:$0]  %s5339_s4, 64, %s67_s11, [#allocation9]  }
  0x56   :  { %5133 = dma.done.wait [#allocation3], 1536  }
  0x57   :  { %5134 = vsyncadd [#allocation3], 4294965760 }
  0x58   :  { %5135 = dma.done.wait [#allocation6], 36960  }
  0x59   :  { %5136 = vsyncadd [#allocation6], 4294930336 }
  0x5a   :  { %5137 = dma.done.wait [#allocation9], 24640  }
  0x5b   :  { %5138 = vsyncadd [#allocation9], 4294942656  ;;  %v4281_v0 = vld [vmem:[#allocation5 + $0x4] ss:$24 sps:$4 sm:$0xff]   ;;  %v4285_v2 = vld [vmem:[#allocation5] ss:$24 sps:$4 sm:$0xff]  }
  0x5c   :  { %v4283_v1 = vld [vmem:[#allocation5 + $0x304] ss:$24 sps:$4 sm:$0xff]   ;;  %1863 = vmatprep.subr.bf16.mxu1 %v4281_v0  ;;  %v4286_v3 = vld [vmem:[#allocation5 + $0x300] ss:$24 sps:$4 sm:$0xff]   ;;  %v4287_v4 = vld [vmem:[#allocation5 + $0x34] ss:$24 sps:$4 sm:$0xff]  }
  0x5d   :  { %1906 = vmatprep.subr.bf16.mxu0 %v4283_v1  ;;  %1864 = vmatpush1.bf16.msra.mxu1 %v4285_v2  ;;  %v4289_v5 = vld [vmem:[#allocation5 + $0x334] ss:$24 sps:$4 sm:$0xff]   ;;  %v4291_v6 = vld [vmem:[#allocation5 + $0x30] ss:$24 sps:$4 sm:$0xff]   ;;  %v4293_v8 = vld [vmem:[#allocation5 + $0x64] ss:$24 sps:$4 sm:$0xff]  }
  0x5e   :  { %1907 = vmatpush1.bf16.msra.mxu0 %v4286_v3  ;;  %1865 = vmatprep.subr.bf16.mxu1 %v4287_v4  ;;  %v4292_v7 = vld [vmem:[#allocation5 + $0x330] ss:$24 sps:$4 sm:$0xff]   ;;  %v4295_v9 = vld [vmem:[#allocation5 + $0x364] ss:$24 sps:$4 sm:$0xff]   ;;  %v4297_v10 = vld [vmem:[#allocation5 + $0x60] ss:$24 sps:$4 sm:$0xff]  }
  0x5f   :  { %1908 = vmatprep.subr.bf16.mxu0 %v4289_v5  ;;  %v4298_v11 = vld [vmem:[#allocation5 + $0x360] ss:$24 sps:$4 sm:$0xff]   ;;  %v4299_v12 = vld [vmem:[#allocation5 + $0x94] ss:$24 sps:$4 sm:$0xff]   ;;  %v4303_v14 = vld [vmem:[#allocation5 + $0x90] ss:$24 sps:$4 sm:$0xff]  }
  0x60   :  { %v4301_v13 = vld [vmem:[#allocation5 + $0x394] ss:$24 sps:$4 sm:$0xff]   ;;  %v4304_v15 = vld [vmem:[#allocation5 + $0x390] ss:$24 sps:$4 sm:$0xff]   ;;  %v4305_v16 = vld [vmem:[#allocation5 + $0xc4] ss:$24 sps:$4 sm:$0xff]  }
  0x61   :  { %1866 = vmatpush1.bf16.msra.mxu1 %v4291_v6  ;;  %v4307_v17 = vld [vmem:[#allocation5 + $0x3c4] ss:$24 sps:$4 sm:$0xff]   ;;  %v4309_v18 = vld [vmem:[#allocation5 + $0xc0] ss:$24 sps:$4 sm:$0xff]   ;;  %v4311_v20 = vld [vmem:[#allocation5 + $0xf4] ss:$24 sps:$4 sm:$0xff]  }
  0x62   :  { %1909 = vmatpush1.bf16.msra.mxu0 %v4292_v7  ;;  %1867 = vmatprep.subr.bf16.mxu1 %v4293_v8  ;;  %v4310_v19 = vld [vmem:[#allocation5 + $0x3c0] ss:$24 sps:$4 sm:$0xff]   ;;  %v4313_v21 = vld [vmem:[#allocation5 + $0x3f4] ss:$24 sps:$4 sm:$0xff]   ;;  %v4315_v22 = vld [vmem:[#allocation5 + $0xf0] ss:$24 sps:$4 sm:$0xff]  }
  0x63   :  { %1910 = vmatprep.subr.bf16.mxu0 %v4295_v9  ;;  %v4316_v23 = vld [vmem:[#allocation5 + $0x3f0] ss:$24 sps:$4 sm:$0xff]   ;;  %v4317_v24 = vld [vmem:[#allocation5 + $0x124] ss:$24 sps:$4 sm:$0xff]   ;;  %v4321_v26 = vld [vmem:[#allocation5 + $0x120] ss:$24 sps:$4 sm:$0xff]  }
  0x64   :  { %v4319_v25 = vld [vmem:[#allocation5 + $0x424] ss:$24 sps:$4 sm:$0xff]   ;;  %v4322_v27 = vld [vmem:[#allocation5 + $0x420] ss:$24 sps:$4 sm:$0xff]   ;;  %v4323_v28 = vld [vmem:[#allocation5 + $0x154] ss:$24 sps:$4 sm:$0xff]  }
  0x65   :  { %1868 = vmatpush1.bf16.msra.mxu1 %v4297_v10  ;;  %v4325_v29 = vld [vmem:[#allocation5 + $0x454] ss:$24 sps:$4 sm:$0xff]   ;;  %v4327_v30 = vld [vmem:[#allocation5 + $0x150] ss:$24 sps:$4 sm:$0xff]   ;;  %v4329_v32 = vld [vmem:[#allocation5 + $0x184] ss:$24 sps:$4 sm:$0xff]  }
  0x66   :  { %1911 = vmatpush1.bf16.msra.mxu0 %v4298_v11  ;;  %1869 = vmatprep.subr.bf16.mxu1 %v4299_v12  ;;  %v4328_v31 = vld [vmem:[#allocation5 + $0x450] ss:$24 sps:$4 sm:$0xff]   ;;  %v4331_v33 = vld [vmem:[#allocation5 + $0x484] ss:$24 sps:$4 sm:$0xff]   ;;  %v4333_v34 = vld [vmem:[#allocation5 + $0x180] ss:$24 sps:$4 sm:$0xff]  }
  0x67   :  { %1912 = vmatprep.subr.bf16.mxu0 %v4301_v13  ;;  %v4334_v35 = vld [vmem:[#allocation5 + $0x480] ss:$24 sps:$4 sm:$0xff]   ;;  %v4335_v36 = vld [vmem:[#allocation5 + $0x1b4] ss:$24 sps:$4 sm:$0xff]   ;;  %v4339_v38 = vld [vmem:[#allocation5 + $0x1b0] ss:$24 sps:$4 sm:$0xff]  }
  0x68   :  { %v4337_v37 = vld [vmem:[#allocation5 + $0x4b4] ss:$24 sps:$4 sm:$0xff]   ;;  %v4340_v39 = vld [vmem:[#allocation5 + $0x4b0] ss:$24 sps:$4 sm:$0xff]   ;;  %v4341_v40 = vld [vmem:[#allocation5 + $0x1e4] ss:$24 sps:$4 sm:$0xff]  }
  0x69   :  { %1870 = vmatpush1.bf16.msra.mxu1 %v4303_v14  ;;  %v4343_v41 = vld [vmem:[#allocation5 + $0x4e4] ss:$24 sps:$4 sm:$0xff]   ;;  %v4345_v42 = vld [vmem:[#allocation5 + $0x1e0] ss:$24 sps:$4 sm:$0xff]   ;;  %v4347_v44 = vld [vmem:[#allocation5 + $0x214] ss:$24 sps:$4 sm:$0xff]  }
  0x6a   :  { %1913 = vmatpush1.bf16.msra.mxu0 %v4304_v15  ;;  %1871 = vmatprep.subr.bf16.mxu1 %v4305_v16  ;;  %v4346_v43 = vld [vmem:[#allocation5 + $0x4e0] ss:$24 sps:$4 sm:$0xff]   ;;  %v4349_v45 = vld [vmem:[#allocation5 + $0x514] ss:$24 sps:$4 sm:$0xff]   ;;  %v4351_v47 = vld [vmem:[#allocation5 + $0x210] ss:$24 sps:$4 sm:$0xff]  }
  0x6b   :  { %1914 = vmatprep.subr.bf16.mxu0 %v4307_v17  ;;  %v86_v46 = vld [vmem:[#allocation2 + $0x8] sm:$0xff]  ;;  %v92_v49 = vld [vmem:[#allocation2 + $0x38] sm:$0xff]  ;;  %v85_v6 = vld [vmem:[#allocation2] sm:$0xff]  ;;  %s5152_s4 = smov [#allocation11]  }
  0x6c   :  { %v4352_v48 = vld [vmem:[#allocation5 + $0x510] ss:$24 sps:$4 sm:$0xff]   ;;  %v5245_v50 = vpack.c.bf16 %v92_v49, %v86_v46  ;;  %v88_v51 = vld [vmem:[#allocation2 + $0x18] sm:$0xff]  ;;  %v4359_v58 = vld [vmem:[#allocation5 + $0x274] ss:$24 sps:$4 sm:$0xff]   ;;  %s3713_s29 = sshll.u32 %s5152_s4, 4  ;;  %s3714_s29 = int_to_ptr.vmem [resolvable:$true] %s3713_s29 }
  0x6d   :  { %1872 = vmatpush1.bf16.msra.mxu1 %v4309_v18  ;;  %v94_v52 = vld [vmem:[#allocation2 + $0x48] sm:$0xff]  ;;  %v4353_v53 = vld [vmem:[#allocation5 + $0x244] ss:$24 sps:$4 sm:$0xff]   ;;  %v4357_v56 = vld [vmem:[#allocation5 + $0x240] ss:$24 sps:$4 sm:$0xff]   ;;  %s5111_s3 = scalar_lea.vmem %s3714_s29, 1024  ;;  %p5116_p13 = scmp.lt.s32.totalorder %s3714_s29, %s3714_s29 }
  0x6e   :  { %1915 = vmatpush1.bf16.msra.mxu0 %v4310_v19  ;;  %1873 = vmatprep.subr.bf16.mxu1 %v4311_v20  ;;  %v4355_v54 = vld [vmem:[#allocation5 + $0x544] ss:$24 sps:$4 sm:$0xff]   ;;  %v5247_v55 = vpack.c.bf16 %v94_v52, %v88_v51  ;;  %v4358_v57 = vld [vmem:[#allocation5 + $0x540] ss:$24 sps:$4 sm:$0xff]   ;;  %v4361_v59 = vld [vmem:[#allocation5 + $0x574] ss:$24 sps:$4 sm:$0xff]   ;;  %p5112_p12 = scmp.ne.s32.totalorder %s3714_s29, %s5111_s3  ;;  %p5117_p0 = scmp.lt.s32.totalorder %s5111_s3, %s5111_s3 }
  0x6f   :  { %1916 = vmatprep.subr.bf16.mxu0 %v4313_v21  ;;  %1895 = vmatprep.mubr.bf16.mxu1 %v5245_v50  ;;  %v4363_v60 = vld [vmem:[#allocation5 + $0x270] ss:$24 sps:$4 sm:$0xff]   ;;  %v4365_v62 = vld [vmem:[#allocation5 + $0x2a4] ss:$24 sps:$4 sm:$0xff]   ;;  %v4369_v0 = vld [vmem:[#allocation5 + $0x2a0] ss:$24 sps:$4 sm:$0xff]  }
  0x70   :  { %1938 = vmatprep.mubr.bf16.mxu0 %v5247_v55  ;;  %v4364_v61 = vld [vmem:[#allocation5 + $0x570] ss:$24 sps:$4 sm:$0xff]   ;;  %v4367_v63 = vld [vmem:[#allocation5 + $0x5a4] ss:$24 sps:$4 sm:$0xff]   ;;  %v4370_v1 = vld [vmem:[#allocation5 + $0x5a0] ss:$24 sps:$4 sm:$0xff]   ;;  %p5118_p1 = por %p5117_p0, %p5116_p13 }
  0x71   :  { %1874 = vmatpush1.bf16.msra.mxu1 %v4315_v22  ;;  %v4371_v2 = vld [vmem:[#allocation5 + $0x2d4] ss:$24 sps:$4 sm:$0xff]   ;;  %v4375_v4 = vld [vmem:[#allocation5 + $0x2d0] ss:$24 sps:$4 sm:$0xff]   ;;  %v4379_v8 = vld [vmem:[#allocation5 + $0x604] ss:$24 sps:$4 sm:$0xff]  }
  0x72   :  { %1917 = vmatpush1.bf16.msra.mxu0 %v4316_v23  ;;  %1875 = vmatprep.subr.bf16.mxu1 %v4317_v24  ;;  %v4373_v3 = vld [vmem:[#allocation5 + $0x5d4] ss:$24 sps:$4 sm:$0xff]   ;;  %v4376_v5 = vld [vmem:[#allocation5 + $0x5d0] ss:$24 sps:$4 sm:$0xff]   ;;  %v93_v10 = vld [vmem:[#allocation2 + $0x40] sm:$0xff]  ;;  %p5119_p2 = pnand %p5118_p1, %p5112_p12 }
  0x73   :  { %1918 = vmatprep.subr.bf16.mxu0 %v4319_v25  ;;  %v91_v7 = vld [vmem:[#allocation2 + $0x30] sm:$0xff]  ;;  %v4382_v11 = vld [vmem:[#allocation5 + $0xc] ss:$24 sps:$4 sm:$0xff]   ;;  %v4377_v13 = vld [vmem:[#allocation5 + $0x600] ss:$24 sps:$4 sm:$0xff]  }
  0x74   :  { %v87_v9 = vld [vmem:[#allocation2 + $0x10] sm:$0xff]  ;;  %v5251_v12 = vpack.c.bf16 %v91_v7, %v85_v6  ;;  %v4380_v14 = vld [vmem:[#allocation5 + $0x8] ss:$24 sps:$4 sm:$0xff]   ;;  %v4391_v20 = vld [vmem:[#allocation5 + $0x664] ss:$24 sps:$4 sm:$0xff]  }
  0x75   :  { %1876 = vmatpush1.bf16.msra.mxu1 %v4321_v26  ;;  %v5253_v15 = vpack.c.bf16 %v93_v10, %v87_v9  ;;  %v4385_v16 = vld [vmem:[#allocation5 + $0x634] ss:$24 sps:$4 sm:$0xff]   ;;  %v4383_v18 = vld [vmem:[#allocation5 + $0x630] ss:$24 sps:$4 sm:$0xff]   ;;  %v4389_v22 = vld [vmem:[#allocation5 + $0x660] ss:$24 sps:$4 sm:$0xff]  }
  0x76   :  { %1919 = vmatpush1.bf16.msra.mxu0 %v4322_v27  ;;  %1877 = vmatprep.subr.bf16.mxu1 %v4323_v28  ;;  %v4388_v17 = vld [vmem:[#allocation5 + $0x3c] ss:$24 sps:$4 sm:$0xff]   ;;  %v4386_v19 = vld [vmem:[#allocation5 + $0x38] ss:$24 sps:$4 sm:$0xff]   ;;  %v4394_v21 = vld [vmem:[#allocation5 + $0x6c] ss:$24 sps:$4 sm:$0xff]  }
  0x77   :  { %1920 = vmatprep.subr.bf16.mxu0 %v4325_v29  ;;  %v4392_v23 = vld [vmem:[#allocation5 + $0x68] ss:$24 sps:$4 sm:$0xff]   ;;  %v4397_v24 = vld [vmem:[#allocation5 + $0x694] ss:$24 sps:$4 sm:$0xff]   ;;  %v4398_v27 = vld [vmem:[#allocation5 + $0x98] ss:$24 sps:$4 sm:$0xff]  }
  0x78   :  { %v4400_v25 = vld [vmem:[#allocation5 + $0x9c] ss:$24 sps:$4 sm:$0xff]   ;;  %v4395_v26 = vld [vmem:[#allocation5 + $0x690] ss:$24 sps:$4 sm:$0xff]   ;;  %v4406_v29 = vld [vmem:[#allocation5 + $0xcc] ss:$24 sps:$4 sm:$0xff]  }
  0x79   :  { %1878 = vmatpush1.bf16.msra.mxu1 %v4327_v30  ;;  %v4403_v28 = vld [vmem:[#allocation5 + $0x6c4] ss:$24 sps:$4 sm:$0xff]   ;;  %v4401_v30 = vld [vmem:[#allocation5 + $0x6c0] ss:$24 sps:$4 sm:$0xff]   ;;  %v4433_v52 = vld [vmem:[#allocation5 + $0x7b4] ss:$24 sps:$4 sm:$0xff]  }
  0x7a   :  { %1921 = vmatpush1.bf16.msra.mxu0 %v4328_v31  ;;  %1879 = vmatprep.subr.bf16.mxu1 %v4329_v32  ;;  %v4404_v31 = vld [vmem:[#allocation5 + $0xc8] ss:$24 sps:$4 sm:$0xff]   ;;  %v4409_v32 = vld [vmem:[#allocation5 + $0x6f4] ss:$24 sps:$4 sm:$0xff]   ;;  %v4422_v46 = vld [vmem:[#allocation5 + $0x158] ss:$24 sps:$4 sm:$0xff]  }
  0x7b   :  { %1922 = vmatprep.subr.bf16.mxu0 %v4331_v33  ;;  %v4412_v33 = vld [vmem:[#allocation5 + $0xfc] ss:$24 sps:$4 sm:$0xff]   ;;  %v4425_v49 = vld [vmem:[#allocation5 + $0x780] ss:$24 sps:$4 sm:$0xff]   ;;  %v4455_v7 = vld [vmem:[#allocation5 + $0x870] ss:$24 sps:$4 sm:$0xff]  }
  0x7c   :  { %v4428_v51 = vld [vmem:[#allocation5 + $0x188] ss:$24 sps:$4 sm:$0xff]   ;;  %v4460_v6 = vld [vmem:[#allocation5 + $0x27c] ss:$24 sps:$4 sm:$0xff]   ;;  %v4466_v10 = vld [vmem:[#allocation5 + $0x2ac] ss:$24 sps:$4 sm:$0xff]  }
  0x7d   :  { %1880 = vmatpush1.bf16.msra.mxu1 %v4333_v34  ;;  %v4407_v34 = vld [vmem:[#allocation5 + $0x6f0] ss:$24 sps:$4 sm:$0xff]   ;;  %v4463_v9 = vld [vmem:[#allocation5 + $0x8a4] ss:$24 sps:$4 sm:$0xff]  }
  0x7e   :  { %1923 = vmatpush1.bf16.msra.mxu0 %v4334_v35  ;;  %1881 = vmatprep.subr.bf16.mxu1 %v4335_v36  ;;  %v4410_v35 = vld [vmem:[#allocation5 + $0xf8] ss:$24 sps:$4 sm:$0xff]   ;;  %v4415_v36 = vld [vmem:[#allocation5 + $0x724] ss:$24 sps:$4 sm:$0xff]  }
  0x7f   :  { %1924 = vmatprep.subr.bf16.mxu0 %v4337_v37  ;;  %v4418_v37 = vld [vmem:[#allocation5 + $0x12c] ss:$24 sps:$4 sm:$0xff]  }
  0x81   :  { %1882 = vmatpush1.bf16.msra.mxu1 %v4339_v38  ;;  %v4413_v38 = vld [vmem:[#allocation5 + $0x720] ss:$24 sps:$4 sm:$0xff]  }
  0x82   :  { %1925 = vmatpush1.bf16.msra.mxu0 %v4340_v39  ;;  %1883 = vmatprep.subr.bf16.mxu1 %v4341_v40  ;;  %v4416_v39 = vld [vmem:[#allocation5 + $0x128] ss:$24 sps:$4 sm:$0xff]   ;;  %v4421_v40 = vld [vmem:[#allocation5 + $0x754] ss:$24 sps:$4 sm:$0xff]  }
  0x83   :  { %1926 = vmatprep.subr.bf16.mxu0 %v4343_v41  ;;  %v90_v41 = vld [vmem:[#allocation2 + $0x28] sm:$0xff] }
  0x85   :  { %1884 = vmatpush1.bf16.msra.mxu1 %v4345_v42  ;;  %v96_v42 = vld [vmem:[#allocation2 + $0x58] sm:$0xff] }
  0x86   :  { %1927 = vmatpush1.bf16.msra.mxu0 %v4346_v43  ;;  %1885 = vmatprep.subr.bf16.mxu1 %v4347_v44  ;;  %v4424_v43 = vld [vmem:[#allocation5 + $0x15c] ss:$24 sps:$4 sm:$0xff]   ;;  %v5258_v44 = vpack.c.bf16 %v96_v42, %v90_v41  ;;  %v4500_v41 = vld [vmem:[#allocation5 + $0xd0] ss:$24 sps:$4 sm:$0xff]  }
  0x87   :  { %1928 = vmatprep.subr.bf16.mxu0 %v4349_v45  ;;  %v4419_v45 = vld [vmem:[#allocation5 + $0x750] ss:$24 sps:$4 sm:$0xff]   ;;  %v4508_v42 = vld [vmem:[#allocation5 + $0x104] ss:$24 sps:$4 sm:$0xff]  }
  0x89   :  { %1886 = vmatpush1.bf16.msra.mxu1 %v4351_v47  ;;  %v4427_v47 = vld [vmem:[#allocation5 + $0x784] ss:$24 sps:$4 sm:$0xff]  }
  0x8a   :  { %1929 = vmatpush1.bf16.msra.mxu0 %v4352_v48  ;;  %1887 = vmatprep.subr.bf16.mxu1 %v4353_v53  ;;  %v4430_v48 = vld [vmem:[#allocation5 + $0x18c] ss:$24 sps:$4 sm:$0xff]   ;;  %v4436_v53 = vld [vmem:[#allocation5 + $0x1bc] ss:$24 sps:$4 sm:$0xff]  }
  0x8b   :  { %1930 = vmatprep.subr.bf16.mxu0 %v4355_v54  ;;  %v4431_v54 = vld [vmem:[#allocation5 + $0x7b0] ss:$24 sps:$4 sm:$0xff]  }
  0x8d   :  { %1888 = vmatpush1.bf16.msra.mxu1 %v4357_v56  ;;  %v4434_v56 = vld [vmem:[#allocation5 + $0x1b8] ss:$24 sps:$4 sm:$0xff]  }
  0x8e   :  { %1931 = vmatpush1.bf16.msra.mxu0 %v4358_v57  ;;  %1889 = vmatprep.subr.bf16.mxu1 %v4359_v58  ;;  %v4439_v57 = vld [vmem:[#allocation5 + $0x7e4] ss:$24 sps:$4 sm:$0xff]  }
  0x8f   :  { %1932 = vmatprep.subr.bf16.mxu0 %v4361_v59  ;;  %v4442_v58 = vld [vmem:[#allocation5 + $0x1ec] ss:$24 sps:$4 sm:$0xff]   ;;  %v4437_v59 = vld [vmem:[#allocation5 + $0x7e0] ss:$24 sps:$4 sm:$0xff]  }
  0x91   :  { %1890 = vmatpush1.bf16.msra.mxu1 %v4363_v60  ;;  %v4440_v60 = vld [vmem:[#allocation5 + $0x1e8] ss:$24 sps:$4 sm:$0xff]  }
  0x92   :  { %1933 = vmatpush1.bf16.msra.mxu0 %v4364_v61  ;;  %1891 = vmatprep.subr.bf16.mxu1 %v4365_v62  ;;  %v4445_v61 = vld [vmem:[#allocation5 + $0x814] ss:$24 sps:$4 sm:$0xff]  }
  0x93   :  { %1934 = vmatprep.subr.bf16.mxu0 %v4367_v63  ;;  %v4448_v62 = vld [vmem:[#allocation5 + $0x21c] ss:$24 sps:$4 sm:$0xff]   ;;  %v4443_v63 = vld [vmem:[#allocation5 + $0x810] ss:$24 sps:$4 sm:$0xff]  }
  0x95   :  { %1892 = vmatpush1.bf16.msra.mxu1 %v4369_v0  ;;  %v4446_v0 = vld [vmem:[#allocation5 + $0x218] ss:$24 sps:$4 sm:$0xff]  }
  0x96   :  { %1935 = vmatpush1.bf16.msra.mxu0 %v4370_v1  ;;  %1893 = vmatprep.subr.bf16.mxu1 %v4371_v2  ;;  %v4451_v1 = vld [vmem:[#allocation5 + $0x844] ss:$24 sps:$4 sm:$0xff]  }
  0x97   :  { %1936 = vmatprep.subr.bf16.mxu0 %v4373_v3  ;;  %v4454_v2 = vld [vmem:[#allocation5 + $0x24c] ss:$24 sps:$4 sm:$0xff]   ;;  %v4449_v3 = vld [vmem:[#allocation5 + $0x840] ss:$24 sps:$4 sm:$0xff]  }
  0x99   :  { %1894 = vmatpush1.bf16.msra.mxu1 %v4375_v4  ;;  %v4452_v4 = vld [vmem:[#allocation5 + $0x248] ss:$24 sps:$4 sm:$0xff]  }
  0x9a   :  { %1937 = vmatpush1.bf16.msra.mxu0 %v4376_v5  ;;  %1992 = vmatprep.subr.bf16.mxu1 %v4382_v11  ;;  %v4457_v5 = vld [vmem:[#allocation5 + $0x874] ss:$24 sps:$4 sm:$0xff]   ;;  %v4461_v11 = vld [vmem:[#allocation5 + $0x8a0] ss:$24 sps:$4 sm:$0xff]  }
  0x9b   :  { %1949 = vmatprep.subr.bf16.mxu0 %v4379_v8  ;;  %v4458_v8 = vld [vmem:[#allocation5 + $0x278] ss:$24 sps:$4 sm:$0xff]  }
  0x9c   :  { %1896 = vmatmul.mubr.bf16.vlgmr.msra.gmra.mrb[0].mxu1 %v5251_v12 }
  0x9d   :  { %1939 = vmatmul.mubr.bf16.vlgmr.msra.gmra.mrb[0].mxu0 %v5253_v15  ;;  %1993 = vmatpush1.bf16.msra.mxu1 %v4380_v14  ;;  %v4469_v14 = vld [vmem:[#allocation5 + $0x8d4] ss:$24 sps:$4 sm:$0xff]  }
  0x9e   :  { %1950 = vmatpush1.bf16.msra.mxu0 %v4377_v13  ;;  %1994 = vmatprep.subr.bf16.mxu1 %v4388_v17  ;;  %v4464_v13 = vld [vmem:[#allocation5 + $0x2a8] ss:$24 sps:$4 sm:$0xff]  }
  0x9f   :  { %1951 = vmatprep.subr.bf16.mxu0 %v4385_v16  ;;  %2024 = vmatprep.mubr.bf16.mxu1 %v5245_v50  ;;  %v4472_v16 = vld [vmem:[#allocation5 + $0x2dc] ss:$24 sps:$4 sm:$0xff]   ;;  %v4467_v17 = vld [vmem:[#allocation5 + $0x8d0] ss:$24 sps:$4 sm:$0xff]  }
  0xa0   :  { %1981 = vmatprep.mubr.bf16.mxu0 %v5258_v44 }
  0xa1   :  { %1995 = vmatpush1.bf16.msra.mxu1 %v4386_v19  ;;  %v89_v19 = vld [vmem:[#allocation2 + $0x20] sm:$0xff] }
  0xa2   :  { %1952 = vmatpush1.bf16.msra.mxu0 %v4383_v18  ;;  %1996 = vmatprep.subr.bf16.mxu1 %v4394_v21  ;;  %v4470_v18 = vld [vmem:[#allocation5 + $0x2d8] ss:$24 sps:$4 sm:$0xff]   ;;  %v4475_v21 = vld [vmem:[#allocation5 + $0x30c] ss:$24 sps:$4 sm:$0xff]  }
  0xa3   :  { %1953 = vmatprep.subr.bf16.mxu0 %v4391_v20  ;;  %v95_v20 = vld [vmem:[#allocation2 + $0x50] sm:$0xff] }
  0xa5   :  { %1997 = vmatpush1.bf16.msra.mxu1 %v4392_v23  ;;  %v5261_v23 = vpack.c.bf16 %v95_v20, %v89_v19  ;;  %v4562_v19 = vld [vmem:[#allocation5 + $0x2b4] ss:$24 sps:$4 sm:$0xff]   ;;  %v4557_v20 = vld [vmem:[#allocation5 + $0x5a8] ss:$24 sps:$4 sm:$0xff]  }
  0xa6   :  { %1954 = vmatpush1.bf16.msra.mxu0 %v4389_v22  ;;  %1998 = vmatprep.subr.bf16.mxu1 %v4400_v25  ;;  %v4478_v22 = vld [vmem:[#allocation5 + $0x14] ss:$24 sps:$4 sm:$0xff]   ;;  %v4476_v25 = vld [vmem:[#allocation5 + $0x10] ss:$24 sps:$4 sm:$0xff]  }
  0xa7   :  { %1955 = vmatprep.subr.bf16.mxu0 %v4397_v24  ;;  %v4473_v24 = vld [vmem:[#allocation5 + $0x308] ss:$24 sps:$4 sm:$0xff]  }
  0xa9   :  { %1999 = vmatpush1.bf16.msra.mxu1 %v4398_v27  ;;  %v4484_v27 = vld [vmem:[#allocation5 + $0x44] ss:$24 sps:$4 sm:$0xff]  }
  0xaa   :  { %1956 = vmatpush1.bf16.msra.mxu0 %v4395_v26  ;;  %2000 = vmatprep.subr.bf16.mxu1 %v4406_v29  ;;  %v4481_v26 = vld [vmem:[#allocation5 + $0x33c] ss:$24 sps:$4 sm:$0xff]   ;;  %v4482_v29 = vld [vmem:[#allocation5 + $0x40] ss:$24 sps:$4 sm:$0xff]  }
  0xab   :  { %1957 = vmatprep.subr.bf16.mxu0 %v4403_v28  ;;  %v4479_v28 = vld [vmem:[#allocation5 + $0x338] ss:$24 sps:$4 sm:$0xff]  }
  0xad   :  { %2001 = vmatpush1.bf16.msra.mxu1 %v4404_v31  ;;  %v4490_v31 = vld [vmem:[#allocation5 + $0x74] ss:$24 sps:$4 sm:$0xff]  }
  0xae   :  { %1958 = vmatpush1.bf16.msra.mxu0 %v4401_v30  ;;  %2002 = vmatprep.subr.bf16.mxu1 %v4412_v33  ;;  %v4487_v30 = vld [vmem:[#allocation5 + $0x36c] ss:$24 sps:$4 sm:$0xff]   ;;  %v4488_v33 = vld [vmem:[#allocation5 + $0x70] ss:$24 sps:$4 sm:$0xff]  }
  0xaf   :  { %1959 = vmatprep.subr.bf16.mxu0 %v4409_v32  ;;  %v4485_v32 = vld [vmem:[#allocation5 + $0x368] ss:$24 sps:$4 sm:$0xff]  }
  0xb1   :  { %2003 = vmatpush1.bf16.msra.mxu1 %v4410_v35  ;;  %v4496_v35 = vld [vmem:[#allocation5 + $0xa4] ss:$24 sps:$4 sm:$0xff]  }
  0xb2   :  { %1960 = vmatpush1.bf16.msra.mxu0 %v4407_v34  ;;  %2004 = vmatprep.subr.bf16.mxu1 %v4418_v37  ;;  %v4493_v34 = vld [vmem:[#allocation5 + $0x39c] ss:$24 sps:$4 sm:$0xff]   ;;  %v4494_v37 = vld [vmem:[#allocation5 + $0xa0] ss:$24 sps:$4 sm:$0xff]  }
  0xb3   :  { %1961 = vmatprep.subr.bf16.mxu0 %v4415_v36  ;;  %v4491_v36 = vld [vmem:[#allocation5 + $0x398] ss:$24 sps:$4 sm:$0xff]  }
  0xb5   :  { %2005 = vmatpush1.bf16.msra.mxu1 %v4416_v39  ;;  %v4502_v39 = vld [vmem:[#allocation5 + $0xd4] ss:$24 sps:$4 sm:$0xff]  }
  0xb6   :  { %1962 = vmatpush1.bf16.msra.mxu0 %v4413_v38  ;;  %2006 = vmatprep.subr.bf16.mxu1 %v4424_v43  ;;  %v4499_v38 = vld [vmem:[#allocation5 + $0x3cc] ss:$24 sps:$4 sm:$0xff]   ;;  %v4503_v43 = vld [vmem:[#allocation5 + $0x3f8] ss:$24 sps:$4 sm:$0xff]  }
  0xb7   :  { %1963 = vmatprep.subr.bf16.mxu0 %v4421_v40  ;;  %v4497_v40 = vld [vmem:[#allocation5 + $0x3c8] ss:$24 sps:$4 sm:$0xff]  }
  0xb9   :  { %2007 = vmatpush1.bf16.msra.mxu1 %v4422_v46  ;;  %v4511_v46 = vld [vmem:[#allocation5 + $0x42c] ss:$24 sps:$4 sm:$0xff]  }
  0xba   :  { %1964 = vmatpush1.bf16.msra.mxu0 %v4419_v45  ;;  %2008 = vmatprep.subr.bf16.mxu1 %v4430_v48  ;;  %v4506_v45 = vld [vmem:[#allocation5 + $0x100] ss:$24 sps:$4 sm:$0xff]  }
  0xbb   :  { %1965 = vmatprep.subr.bf16.mxu0 %v4427_v47  ;;  %v4514_v47 = vld [vmem:[#allocation5 + $0x134] ss:$24 sps:$4 sm:$0xff]   ;;  %v4509_v48 = vld [vmem:[#allocation5 + $0x428] ss:$24 sps:$4 sm:$0xff]  }
  0xbd   :  { %2009 = vmatpush1.bf16.msra.mxu1 %v4428_v51  ;;  %v4517_v51 = vld [vmem:[#allocation5 + $0x45c] ss:$24 sps:$4 sm:$0xff]  }
  0xbe   :  { %1966 = vmatpush1.bf16.msra.mxu0 %v4425_v49  ;;  %2010 = vmatprep.subr.bf16.mxu1 %v4436_v53  ;;  %v4512_v49 = vld [vmem:[#allocation5 + $0x130] ss:$24 sps:$4 sm:$0xff]  }
  0xbf   :  { %1967 = vmatprep.subr.bf16.mxu0 %v4433_v52  ;;  %v4520_v52 = vld [vmem:[#allocation5 + $0x164] ss:$24 sps:$4 sm:$0xff]   ;;  %v4515_v53 = vld [vmem:[#allocation5 + $0x458] ss:$24 sps:$4 sm:$0xff]  }
  0xc1   :  { %2011 = vmatpush1.bf16.msra.mxu1 %v4434_v56  ;;  %v4523_v56 = vld [vmem:[#allocation5 + $0x48c] ss:$24 sps:$4 sm:$0xff]  }
  0xc2   :  { %1968 = vmatpush1.bf16.msra.mxu0 %v4431_v54  ;;  %2012 = vmatprep.subr.bf16.mxu1 %v4442_v58  ;;  %v4518_v54 = vld [vmem:[#allocation5 + $0x160] ss:$24 sps:$4 sm:$0xff]  }
  0xc3   :  { %1969 = vmatprep.subr.bf16.mxu0 %v4439_v57  ;;  %v4526_v57 = vld [vmem:[#allocation5 + $0x194] ss:$24 sps:$4 sm:$0xff]   ;;  %v4521_v58 = vld [vmem:[#allocation5 + $0x488] ss:$24 sps:$4 sm:$0xff]  }
  0xc5   :  { %2013 = vmatpush1.bf16.msra.mxu1 %v4440_v60  ;;  %v4529_v60 = vld [vmem:[#allocation5 + $0x4bc] ss:$24 sps:$4 sm:$0xff]  }
  0xc6   :  { %1970 = vmatpush1.bf16.msra.mxu0 %v4437_v59  ;;  %2014 = vmatprep.subr.bf16.mxu1 %v4448_v62  ;;  %v4524_v59 = vld [vmem:[#allocation5 + $0x190] ss:$24 sps:$4 sm:$0xff]  }
  0xc7   :  { %1971 = vmatprep.subr.bf16.mxu0 %v4445_v61  ;;  %v4532_v61 = vld [vmem:[#allocation5 + $0x1c4] ss:$24 sps:$4 sm:$0xff]   ;;  %v4527_v62 = vld [vmem:[#allocation5 + $0x4b8] ss:$24 sps:$4 sm:$0xff]  }
  0xc9   :  { %2015 = vmatpush1.bf16.msra.mxu1 %v4446_v0  ;;  %v4535_v0 = vld [vmem:[#allocation5 + $0x4ec] ss:$24 sps:$4 sm:$0xff]  }
  0xca   :  { %1972 = vmatpush1.bf16.msra.mxu0 %v4443_v63  ;;  %2016 = vmatprep.subr.bf16.mxu1 %v4454_v2  ;;  %v4530_v63 = vld [vmem:[#allocation5 + $0x1c0] ss:$24 sps:$4 sm:$0xff]  }
  0xcb   :  { %1973 = vmatprep.subr.bf16.mxu0 %v4451_v1  ;;  %v4538_v1 = vld [vmem:[#allocation5 + $0x1f4] ss:$24 sps:$4 sm:$0xff]   ;;  %v4533_v2 = vld [vmem:[#allocation5 + $0x4e8] ss:$24 sps:$4 sm:$0xff]  }
  0xcd   :  { %2017 = vmatpush1.bf16.msra.mxu1 %v4452_v4  ;;  %v4541_v4 = vld [vmem:[#allocation5 + $0x51c] ss:$24 sps:$4 sm:$0xff]  }
  0xce   :  { %1974 = vmatpush1.bf16.msra.mxu0 %v4449_v3  ;;  %2018 = vmatprep.subr.bf16.mxu1 %v4460_v6  ;;  %v4536_v3 = vld [vmem:[#allocation5 + $0x1f0] ss:$24 sps:$4 sm:$0xff]  }
  0xcf   :  { %1975 = vmatprep.subr.bf16.mxu0 %v4457_v5  ;;  %v4544_v5 = vld [vmem:[#allocation5 + $0x224] ss:$24 sps:$4 sm:$0xff]   ;;  %v4539_v6 = vld [vmem:[#allocation5 + $0x518] ss:$24 sps:$4 sm:$0xff]  }
  0xd1   :  { %2019 = vmatpush1.bf16.msra.mxu1 %v4458_v8  ;;  %v4547_v8 = vld [vmem:[#allocation5 + $0x54c] ss:$24 sps:$4 sm:$0xff]  }
  0xd2   :  { %1976 = vmatpush1.bf16.msra.mxu0 %v4455_v7  ;;  %2020 = vmatprep.subr.bf16.mxu1 %v4466_v10  ;;  %v4542_v7 = vld [vmem:[#allocation5 + $0x220] ss:$24 sps:$4 sm:$0xff]  }
  0xd3   :  { %1977 = vmatprep.subr.bf16.mxu0 %v4463_v9  ;;  %v4550_v9 = vld [vmem:[#allocation5 + $0x254] ss:$24 sps:$4 sm:$0xff]   ;;  %v4545_v10 = vld [vmem:[#allocation5 + $0x548] ss:$24 sps:$4 sm:$0xff]  }
  0xd5   :  { %2021 = vmatpush1.bf16.msra.mxu1 %v4464_v13  ;;  %v4553_v13 = vld [vmem:[#allocation5 + $0x57c] ss:$24 sps:$4 sm:$0xff]  }
  0xd6   :  { %1978 = vmatpush1.bf16.msra.mxu0 %v4461_v11  ;;  %2022 = vmatprep.subr.bf16.mxu1 %v4472_v16  ;;  %v4548_v11 = vld [vmem:[#allocation5 + $0x250] ss:$24 sps:$4 sm:$0xff]  }
  0xd7   :  { %1979 = vmatprep.subr.bf16.mxu0 %v4469_v14  ;;  %v4556_v14 = vld [vmem:[#allocation5 + $0x284] ss:$24 sps:$4 sm:$0xff]   ;;  %v4551_v16 = vld [vmem:[#allocation5 + $0x578] ss:$24 sps:$4 sm:$0xff]  }
  0xd9   :  { %2023 = vmatpush1.bf16.msra.mxu1 %v4470_v18  ;;  %v4559_v18 = vld [vmem:[#allocation5 + $0x5ac] ss:$24 sps:$4 sm:$0xff]  }
  0xda   :  { %1980 = vmatpush1.bf16.msra.mxu0 %v4467_v17  ;;  %2035 = vmatprep.subr.bf16.mxu1 %v4475_v21  ;;  %v4554_v17 = vld [vmem:[#allocation5 + $0x280] ss:$24 sps:$4 sm:$0xff]   ;;  %v4560_v21 = vld [vmem:[#allocation5 + $0x2b0] ss:$24 sps:$4 sm:$0xff]  }
  0xdb   :  { %2121 = vmatprep.subr.bf16.mxu0 %v4478_v22  ;;  %v4565_v22 = vld [vmem:[#allocation5 + $0x5dc] ss:$24 sps:$4 sm:$0xff]  }
  0xdc   :  { %2025 = vmatmul.mubr.bf16.vlgmr.msra.gmra.mrb[4].mxu1 %v5251_v12 }
  0xdd   :  { %1982 = vmatmul.mubr.bf16.vlgmr.msra.gmra.mrb[0].mxu0 %v5261_v23  ;;  %2036 = vmatpush1.bf16.msra.mxu1 %v4473_v24  ;;  %v4568_v24 = vld [vmem:[#allocation5 + $0x2e4] ss:$24 sps:$4 sm:$0xff]  }
  0xde   :  { %2122 = vmatpush1.bf16.msra.mxu0 %v4476_v25  ;;  %2037 = vmatprep.subr.bf16.mxu1 %v4481_v26  ;;  %v4563_v25 = vld [vmem:[#allocation5 + $0x5d8] ss:$24 sps:$4 sm:$0xff]  }
  0xdf   :  { %2123 = vmatprep.subr.bf16.mxu0 %v4484_v27  ;;  %2067 = vmatprep.mubr.bf16.mxu1 %v5247_v55  ;;  %v4566_v26 = vld [vmem:[#allocation5 + $0x2e0] ss:$24 sps:$4 sm:$0xff]   ;;  %v4571_v27 = vld [vmem:[#allocation5 + $0x60c] ss:$24 sps:$4 sm:$0xff]  }
  0xe0   :  { %2153 = vmatprep.mubr.bf16.mxu0 %v5245_v50  ;;  %v4505_v50 = vld [vmem:[#allocation5 + $0x3fc] ss:$24 sps:$4 sm:$0xff]  }
  0xe1   :  { %2038 = vmatpush1.bf16.msra.mxu1 %v4479_v28  ;;  %v4574_v28 = vld [vmem:[#allocation5 + $0x314] ss:$24 sps:$4 sm:$0xff]  }
  0xe2   :  { %2124 = vmatpush1.bf16.msra.mxu0 %v4482_v29  ;;  %2039 = vmatprep.subr.bf16.mxu1 %v4487_v30  ;;  %v4569_v29 = vld [vmem:[#allocation5 + $0x608] ss:$24 sps:$4 sm:$0xff]  }
  0xe3   :  { %2125 = vmatprep.subr.bf16.mxu0 %v4490_v31  ;;  %v4572_v30 = vld [vmem:[#allocation5 + $0x310] ss:$24 sps:$4 sm:$0xff]   ;;  %v4577_v31 = vld [vmem:[#allocation5 + $0x63c] ss:$24 sps:$4 sm:$0xff]  }
  0xe5   :  { %2040 = vmatpush1.bf16.msra.mxu1 %v4485_v32  ;;  %v4580_v32 = vld [vmem:[#allocation5 + $0x344] ss:$24 sps:$4 sm:$0xff]  }
  0xe6   :  { %2126 = vmatpush1.bf16.msra.mxu0 %v4488_v33  ;;  %2041 = vmatprep.subr.bf16.mxu1 %v4493_v34  ;;  %v4575_v33 = vld [vmem:[#allocation5 + $0x638] ss:$24 sps:$4 sm:$0xff]  }
  0xe7   :  { %2127 = vmatprep.subr.bf16.mxu0 %v4496_v35  ;;  %v4578_v34 = vld [vmem:[#allocation5 + $0x340] ss:$24 sps:$4 sm:$0xff]   ;;  %v4583_v35 = vld [vmem:[#allocation5 + $0x66c] ss:$24 sps:$4 sm:$0xff]  }
  0xe9   :  { %2042 = vmatpush1.bf16.msra.mxu1 %v4491_v36  ;;  %v4586_v36 = vld [vmem:[#allocation5 + $0x374] ss:$24 sps:$4 sm:$0xff]  }
  0xea   :  { %2128 = vmatpush1.bf16.msra.mxu0 %v4494_v37  ;;  %2043 = vmatprep.subr.bf16.mxu1 %v4499_v38  ;;  %v4581_v37 = vld [vmem:[#allocation5 + $0x668] ss:$24 sps:$4 sm:$0xff]  }
  0xeb   :  { %2129 = vmatprep.subr.bf16.mxu0 %v4502_v39  ;;  %v4584_v38 = vld [vmem:[#allocation5 + $0x370] ss:$24 sps:$4 sm:$0xff]   ;;  %v4589_v39 = vld [vmem:[#allocation5 + $0x69c] ss:$24 sps:$4 sm:$0xff]  }
  0xed   :  { %2044 = vmatpush1.bf16.msra.mxu1 %v4497_v40  ;;  %v4587_v40 = vld [vmem:[#allocation5 + $0x698] ss:$24 sps:$4 sm:$0xff]  }
  0xee   :  { %2130 = vmatpush1.bf16.msra.mxu0 %v4500_v41  ;;  %2045 = vmatprep.subr.bf16.mxu1 %v4505_v50  ;;  %v4590_v41 = vld [vmem:[#allocation5 + $0x3a0] ss:$24 sps:$4 sm:$0xff]   ;;  %v4595_v50 = vld [vmem:[#allocation5 + $0x6cc] ss:$24 sps:$4 sm:$0xff]  }
  0xef   :  { %2131 = vmatprep.subr.bf16.mxu0 %v4508_v42  ;;  %v4598_v42 = vld [vmem:[#allocation5 + $0x3d4] ss:$24 sps:$4 sm:$0xff]  }
  0xf1   :  { %2046 = vmatpush1.bf16.msra.mxu1 %v4503_v43  ;;  %v4593_v43 = vld [vmem:[#allocation5 + $0x6c8] ss:$24 sps:$4 sm:$0xff]  }
  0xf2   :  { %2132 = vmatpush1.bf16.msra.mxu0 %v4506_v45  ;;  %2047 = vmatprep.subr.bf16.mxu1 %v4511_v46  ;;  %v4601_v45 = vld [vmem:[#allocation5 + $0x6fc] ss:$24 sps:$4 sm:$0xff]  }
  0xf3   :  { %2133 = vmatprep.subr.bf16.mxu0 %v4514_v47  ;;  %v4604_v46 = vld [vmem:[#allocation5 + $0x404] ss:$24 sps:$4 sm:$0xff]   ;;  %v4599_v47 = vld [vmem:[#allocation5 + $0x6f8] ss:$24 sps:$4 sm:$0xff]  }
  0xf5   :  { %2048 = vmatpush1.bf16.msra.mxu1 %v4509_v48  ;;  %v4602_v48 = vld [vmem:[#allocation5 + $0x400] ss:$24 sps:$4 sm:$0xff]  }
  0xf6   :  { %2134 = vmatpush1.bf16.msra.mxu0 %v4512_v49  ;;  %2049 = vmatprep.subr.bf16.mxu1 %v4517_v51  ;;  %v4607_v49 = vld [vmem:[#allocation5 + $0x72c] ss:$24 sps:$4 sm:$0xff]  }
  0xf7   :  { %2135 = vmatprep.subr.bf16.mxu0 %v4520_v52  ;;  %v4610_v51 = vld [vmem:[#allocation5 + $0x434] ss:$24 sps:$4 sm:$0xff]   ;;  %v4605_v52 = vld [vmem:[#allocation5 + $0x728] ss:$24 sps:$4 sm:$0xff]  }
  0xf9   :  { %2050 = vmatpush1.bf16.msra.mxu1 %v4515_v53  ;;  %v4608_v53 = vld [vmem:[#allocation5 + $0x430] ss:$24 sps:$4 sm:$0xff]  }
  0xfa   :  { %2136 = vmatpush1.bf16.msra.mxu0 %v4518_v54  ;;  %2051 = vmatprep.subr.bf16.mxu1 %v4523_v56  ;;  %v4613_v54 = vld [vmem:[#allocation5 + $0x75c] ss:$24 sps:$4 sm:$0xff]  }
  0xfb   :  { %2137 = vmatprep.subr.bf16.mxu0 %v4526_v57  ;;  %v4616_v56 = vld [vmem:[#allocation5 + $0x464] ss:$24 sps:$4 sm:$0xff]   ;;  %v4611_v57 = vld [vmem:[#allocation5 + $0x758] ss:$24 sps:$4 sm:$0xff]  }
  0xfd   :  { %2052 = vmatpush1.bf16.msra.mxu1 %v4521_v58  ;;  %v4614_v58 = vld [vmem:[#allocation5 + $0x460] ss:$24 sps:$4 sm:$0xff]  }
  0xfe   :  { %2138 = vmatpush1.bf16.msra.mxu0 %v4524_v59  ;;  %2053 = vmatprep.subr.bf16.mxu1 %v4529_v60  ;;  %v4619_v59 = vld [vmem:[#allocation5 + $0x78c] ss:$24 sps:$4 sm:$0xff]  }
  0xff   :  { %2139 = vmatprep.subr.bf16.mxu0 %v4532_v61  ;;  %v4622_v60 = vld [vmem:[#allocation5 + $0x494] ss:$24 sps:$4 sm:$0xff]   ;;  %v4617_v61 = vld [vmem:[#allocation5 + $0x788] ss:$24 sps:$4 sm:$0xff]  }
 0x101   :  { %2054 = vmatpush1.bf16.msra.mxu1 %v4527_v62  ;;  %v4620_v62 = vld [vmem:[#allocation5 + $0x490] ss:$24 sps:$4 sm:$0xff]  }
 0x102   :  { %2140 = vmatpush1.bf16.msra.mxu0 %v4530_v63  ;;  %2055 = vmatprep.subr.bf16.mxu1 %v4535_v0  ;;  %v4625_v63 = vld [vmem:[#allocation5 + $0x7bc] ss:$24 sps:$4 sm:$0xff]  }
 0x103   :  { %2141 = vmatprep.subr.bf16.mxu0 %v4538_v1  ;;  %v4628_v0 = vld [vmem:[#allocation5 + $0x4c4] ss:$24 sps:$4 sm:$0xff]   ;;  %v4623_v1 = vld [vmem:[#allocation5 + $0x7b8] ss:$24 sps:$4 sm:$0xff]  }
 0x105   :  { %2056 = vmatpush1.bf16.msra.mxu1 %v4533_v2  ;;  %v4626_v2 = vld [vmem:[#allocation5 + $0x4c0] ss:$24 sps:$4 sm:$0xff]  }
 0x106   :  { %2142 = vmatpush1.bf16.msra.mxu0 %v4536_v3  ;;  %2057 = vmatprep.subr.bf16.mxu1 %v4541_v4  ;;  %v4631_v3 = vld [vmem:[#allocation5 + $0x7ec] ss:$24 sps:$4 sm:$0xff]  }
 0x107   :  { %2143 = vmatprep.subr.bf16.mxu0 %v4544_v5  ;;  %v4634_v4 = vld [vmem:[#allocation5 + $0x4f4] ss:$24 sps:$4 sm:$0xff]   ;;  %v4629_v5 = vld [vmem:[#allocation5 + $0x7e8] ss:$24 sps:$4 sm:$0xff]  }
 0x109   :  { %2058 = vmatpush1.bf16.msra.mxu1 %v4539_v6  ;;  %v4632_v6 = vld [vmem:[#allocation5 + $0x4f0] ss:$24 sps:$4 sm:$0xff]  }
 0x10a   :  { %2144 = vmatpush1.bf16.msra.mxu0 %v4542_v7  ;;  %2059 = vmatprep.subr.bf16.mxu1 %v4547_v8  ;;  %v4637_v7 = vld [vmem:[#allocation5 + $0x81c] ss:$24 sps:$4 sm:$0xff]  }
 0x10b   :  { %2145 = vmatprep.subr.bf16.mxu0 %v4550_v9  ;;  %v4640_v8 = vld [vmem:[#allocation5 + $0x524] ss:$24 sps:$4 sm:$0xff]   ;;  %v4635_v9 = vld [vmem:[#allocation5 + $0x818] ss:$24 sps:$4 sm:$0xff]  }
 0x10d   :  { %2060 = vmatpush1.bf16.msra.mxu1 %v4545_v10  ;;  %v4638_v10 = vld [vmem:[#allocation5 + $0x520] ss:$24 sps:$4 sm:$0xff]  }
 0x10e   :  { %2146 = vmatpush1.bf16.msra.mxu0 %v4548_v11  ;;  %2061 = vmatprep.subr.bf16.mxu1 %v4553_v13  ;;  %v4643_v11 = vld [vmem:[#allocation5 + $0x84c] ss:$24 sps:$4 sm:$0xff]  }
 0x10f   :  { %2147 = vmatprep.subr.bf16.mxu0 %v4556_v14  ;;  %v4646_v13 = vld [vmem:[#allocation5 + $0x554] ss:$24 sps:$4 sm:$0xff]   ;;  %v4641_v14 = vld [vmem:[#allocation5 + $0x848] ss:$24 sps:$4 sm:$0xff]  }
 0x111   :  { %2062 = vmatpush1.bf16.msra.mxu1 %v4551_v16  ;;  %v4644_v16 = vld [vmem:[#allocation5 + $0x550] ss:$24 sps:$4 sm:$0xff]  }
 0x112   :  { %2148 = vmatpush1.bf16.msra.mxu0 %v4554_v17  ;;  %2063 = vmatprep.subr.bf16.mxu1 %v4559_v18  ;;  %v4649_v17 = vld [vmem:[#allocation5 + $0x87c] ss:$24 sps:$4 sm:$0xff]  }
 0x113   :  { %2149 = vmatprep.subr.bf16.mxu0 %v4562_v19  ;;  %v4652_v18 = vld [vmem:[#allocation5 + $0x584] ss:$24 sps:$4 sm:$0xff]   ;;  %v4647_v19 = vld [vmem:[#allocation5 + $0x878] ss:$24 sps:$4 sm:$0xff]  }
 0x115   :  { %2064 = vmatpush1.bf16.msra.mxu1 %v4557_v20  ;;  %v4650_v20 = vld [vmem:[#allocation5 + $0x580] ss:$24 sps:$4 sm:$0xff]  }
 0x116   :  { %2150 = vmatpush1.bf16.msra.mxu0 %v4560_v21  ;;  %2065 = vmatprep.subr.bf16.mxu1 %v4565_v22  ;;  %v4655_v21 = vld [vmem:[#allocation5 + $0x8ac] ss:$24 sps:$4 sm:$0xff]  }
 0x117   :  { %2151 = vmatprep.subr.bf16.mxu0 %v4568_v24  ;;  %v4658_v22 = vld [vmem:[#allocation5 + $0x5b4] ss:$24 sps:$4 sm:$0xff]   ;;  %v4653_v24 = vld [vmem:[#allocation5 + $0x8a8] ss:$24 sps:$4 sm:$0xff]  }
 0x119   :  { %2066 = vmatpush1.bf16.msra.mxu1 %v4563_v25  ;;  %v4656_v25 = vld [vmem:[#allocation5 + $0x5b0] ss:$24 sps:$4 sm:$0xff]  }
 0x11a   :  { %2152 = vmatpush1.bf16.msra.mxu0 %v4566_v26  ;;  %2078 = vmatprep.subr.bf16.mxu1 %v4571_v27  ;;  %v4661_v26 = vld [vmem:[#allocation5 + $0x8dc] ss:$24 sps:$4 sm:$0xff]  }
 0x11b   :  { %2164 = vmatprep.subr.bf16.mxu0 %v4574_v28  ;;  %v4664_v27 = vld [vmem:[#allocation5 + $0x5e4] ss:$24 sps:$4 sm:$0xff]   ;;  %v4659_v28 = vld [vmem:[#allocation5 + $0x8d8] ss:$24 sps:$4 sm:$0xff]  }
 0x11c   :  { %2068 = vmatmul.mubr.bf16.vlgmr.msra.gmra.mrb[4].mxu1 %v5253_v15 }
 0x11d   :  { %2154 = vmatmul.mubr.bf16.vlgmr.msra.gmra.mrb[4].mxu0 %v5251_v12  ;;  %2079 = vmatpush1.bf16.msra.mxu1 %v4569_v29  ;;  %v4592_v12 = vld [vmem:[#allocation5 + $0x3a4] ss:$24 sps:$4 sm:$0xff]   ;;  %v4662_v29 = vld [vmem:[#allocation5 + $0x5e0] ss:$24 sps:$4 sm:$0xff]  }
 0x11e   :  { %2165 = vmatpush1.bf16.msra.mxu0 %v4572_v30  ;;  %2080 = vmatprep.subr.bf16.mxu1 %v4577_v31  ;;  %v4667_v30 = vld [vmem:[#allocation5 + $0x614] ss:$24 sps:$4 sm:$0xff]  }
 0x11f   :  { %2166 = vmatprep.subr.bf16.mxu0 %v4580_v32  ;;  %2110 = vmatprep.mubr.bf16.mxu1 %v5258_v44  ;;  %v4691_v31 = vld [vmem:[#allocation8 + $0x4] ss:$16 sps:$4 sm:$0xff]  }
 0x120   :  { %2196 = vmatprep.mubr.bf16.mxu0 %v5247_v55  ;;  %v4596_v55 = vld [vmem:[#allocation5 + $0x3d0] ss:$24 sps:$4 sm:$0xff]  }
 0x121   :  { %2081 = vmatpush1.bf16.msra.mxu1 %v4575_v33  ;;  %v4665_v32 = vld [vmem:[#allocation5 + $0x610] ss:$24 sps:$4 sm:$0xff]  }
 0x122   :  { %2167 = vmatpush1.bf16.msra.mxu0 %v4578_v34  ;;  %2082 = vmatprep.subr.bf16.mxu1 %v4583_v35  ;;  %v4689_v33 = vld [vmem:[#allocation8] ss:$16 sps:$4 sm:$0xff]   ;;  %v4697_v35 = vld [vmem:[#allocation8 + $0x24] ss:$16 sps:$4 sm:$0xff]  }
 0x123   :  { %2168 = vmatprep.subr.bf16.mxu0 %v4586_v36  ;;  %v4670_v34 = vld [vmem:[#allocation5 + $0x644] ss:$24 sps:$4 sm:$0xff]   ;;  %v4668_v36 = vld [vmem:[#allocation5 + $0x640] ss:$24 sps:$4 sm:$0xff]  }
 0x125   :  { %2083 = vmatpush1.bf16.msra.mxu1 %v4581_v37  ;;  %v4695_v37 = vld [vmem:[#allocation8 + $0x20] ss:$16 sps:$4 sm:$0xff]  }
 0x126   :  { %2169 = vmatpush1.bf16.msra.mxu0 %v4584_v38  ;;  %2084 = vmatprep.subr.bf16.mxu1 %v4589_v39  ;;  %v4673_v38 = vld [vmem:[#allocation5 + $0x674] ss:$24 sps:$4 sm:$0xff]  }
 0x127   :  { %2170 = vmatprep.subr.bf16.mxu0 %v4592_v12  ;;  %v4703_v39 = vld [vmem:[#allocation8 + $0x44] ss:$16 sps:$4 sm:$0xff]  }
 0x128   :  { %v4671_v12 = vld [vmem:[#allocation5 + $0x670] ss:$24 sps:$4 sm:$0xff]  }
 0x129   :  { %2085 = vmatpush1.bf16.msra.mxu1 %v4587_v40  ;;  %v4676_v40 = vld [vmem:[#allocation5 + $0x6a4] ss:$24 sps:$4 sm:$0xff]  }
 0x12a   :  { %2171 = vmatpush1.bf16.msra.mxu0 %v4590_v41  ;;  %2086 = vmatprep.subr.bf16.mxu1 %v4595_v50  ;;  %v4701_v41 = vld [vmem:[#allocation8 + $0x40] ss:$16 sps:$4 sm:$0xff]   ;;  %v4709_v50 = vld [vmem:[#allocation8 + $0x64] ss:$16 sps:$4 sm:$0xff]  }
 0x12b   :  { %2172 = vmatprep.subr.bf16.mxu0 %v4598_v42  ;;  %v4679_v42 = vld [vmem:[#allocation5 + $0x6d4] ss:$24 sps:$4 sm:$0xff]  }
 0x12d   :  { %2087 = vmatpush1.bf16.msra.mxu1 %v4593_v43  ;;  %v4707_v43 = vld [vmem:[#allocation8 + $0x60] ss:$16 sps:$4 sm:$0xff]  }
 0x12e   :  { %2173 = vmatpush1.bf16.msra.mxu0 %v4596_v55  ;;  %2088 = vmatprep.subr.bf16.mxu1 %v4601_v45  ;;  %v4715_v55 = vld [vmem:[#allocation8 + $0x84] ss:$16 sps:$4 sm:$0xff]  }
 0x12f   :  { %2174 = vmatprep.subr.bf16.mxu0 %v4604_v46  ;;  %v4677_v45 = vld [vmem:[#allocation5 + $0x6d0] ss:$24 sps:$4 sm:$0xff]   ;;  %v4682_v46 = vld [vmem:[#allocation5 + $0x704] ss:$24 sps:$4 sm:$0xff]  }
 0x131   :  { %2089 = vmatpush1.bf16.msra.mxu1 %v4599_v47  ;;  %v4721_v47 = vld [vmem:[#allocation8 + $0xa4] ss:$16 sps:$4 sm:$0xff]  }
 0x132   :  { %2175 = vmatpush1.bf16.msra.mxu0 %v4602_v48  ;;  %2090 = vmatprep.subr.bf16.mxu1 %v4607_v49  ;;  %v4680_v48 = vld [vmem:[#allocation5 + $0x700] ss:$24 sps:$4 sm:$0xff]   ;;  %v4685_v49 = vld [vmem:[#allocation5 + $0x734] ss:$24 sps:$4 sm:$0xff]  }
 0x133   :  { %2176 = vmatprep.subr.bf16.mxu0 %v4610_v51  ;;  %v4719_v51 = vld [vmem:[#allocation8 + $0xa0] ss:$16 sps:$4 sm:$0xff]  }
 0x135   :  { %2091 = vmatpush1.bf16.msra.mxu1 %v4605_v52  ;;  %v4727_v52 = vld [vmem:[#allocation8 + $0xc4] ss:$16 sps:$4 sm:$0xff]  }
 0x136   :  { %2177 = vmatpush1.bf16.msra.mxu0 %v4608_v53  ;;  %2092 = vmatprep.subr.bf16.mxu1 %v4613_v54 }
 0x137   :  { %2178 = vmatprep.subr.bf16.mxu0 %v4616_v56 }
 0x139   :  { %2093 = vmatpush1.bf16.msra.mxu1 %v4611_v57  ;;  %v4683_v57 = vld [vmem:[#allocation5 + $0x730] ss:$24 sps:$4 sm:$0xff]  }
 0x13a   :  { %2179 = vmatpush1.bf16.msra.mxu0 %v4614_v58  ;;  %2094 = vmatprep.subr.bf16.mxu1 %v4619_v59  ;;  %v4725_v58 = vld [vmem:[#allocation8 + $0xc0] ss:$16 sps:$4 sm:$0xff]  }
 0x13b   :  { %2180 = vmatprep.subr.bf16.mxu0 %v4622_v60  ;;  %v4688_v60 = vld [vmem:[#allocation5 + $0x764] ss:$24 sps:$4 sm:$0xff]  }
 0x13d   :  { %2095 = vmatpush1.bf16.msra.mxu1 %v4617_v61  ;;  %v4733_v61 = vld [vmem:[#allocation8 + $0xe4] ss:$16 sps:$4 sm:$0xff]  }
 0x13e   :  { %2181 = vmatpush1.bf16.msra.mxu0 %v4620_v62  ;;  %2096 = vmatprep.subr.bf16.mxu1 %v4625_v63  ;;  %v4686_v62 = vld [vmem:[#allocation5 + $0x760] ss:$24 sps:$4 sm:$0xff]   ;;  %v4694_v63 = vld [vmem:[#allocation5 + $0x794] ss:$24 sps:$4 sm:$0xff]  }
 0x13f   :  { %2182 = vmatprep.subr.bf16.mxu0 %v4628_v0  ;;  %v4731_v0 = vld [vmem:[#allocation8 + $0xe0] ss:$16 sps:$4 sm:$0xff]  }
 0x141   :  { %2097 = vmatpush1.bf16.msra.mxu1 %v4623_v1  ;;  %v4739_v1 = vld [vmem:[#allocation8 + $0x104] ss:$16 sps:$4 sm:$0xff]  }
 0x142   :  { %2183 = vmatpush1.bf16.msra.mxu0 %v4626_v2  ;;  %2098 = vmatprep.subr.bf16.mxu1 %v4631_v3  ;;  %v4692_v2 = vld [vmem:[#allocation5 + $0x790] ss:$24 sps:$4 sm:$0xff]   ;;  %v4700_v3 = vld [vmem:[#allocation5 + $0x7c4] ss:$24 sps:$4 sm:$0xff]  }
 0x143   :  { %2184 = vmatprep.subr.bf16.mxu0 %v4634_v4  ;;  %v4737_v4 = vld [vmem:[#allocation8 + $0x100] ss:$16 sps:$4 sm:$0xff]  }
 0x145   :  { %2099 = vmatpush1.bf16.msra.mxu1 %v4629_v5  ;;  %v4745_v5 = vld [vmem:[#allocation8 + $0x124] ss:$16 sps:$4 sm:$0xff]  }
 0x146   :  { %2185 = vmatpush1.bf16.msra.mxu0 %v4632_v6  ;;  %2100 = vmatprep.subr.bf16.mxu1 %v4637_v7  ;;  %v4698_v6 = vld [vmem:[#allocation5 + $0x7c0] ss:$24 sps:$4 sm:$0xff]   ;;  %v4706_v7 = vld [vmem:[#allocation5 + $0x7f4] ss:$24 sps:$4 sm:$0xff]  }
 0x147   :  { %2186 = vmatprep.subr.bf16.mxu0 %v4640_v8  ;;  %v4743_v8 = vld [vmem:[#allocation8 + $0x120] ss:$16 sps:$4 sm:$0xff]  }
 0x149   :  { %2101 = vmatpush1.bf16.msra.mxu1 %v4635_v9  ;;  %v4751_v9 = vld [vmem:[#allocation8 + $0x144] ss:$16 sps:$4 sm:$0xff]  }
 0x14a   :  { %2187 = vmatpush1.bf16.msra.mxu0 %v4638_v10  ;;  %2102 = vmatprep.subr.bf16.mxu1 %v4643_v11  ;;  %v4704_v10 = vld [vmem:[#allocation5 + $0x7f0] ss:$24 sps:$4 sm:$0xff]  }
 0x14b   :  { %2188 = vmatprep.subr.bf16.mxu0 %v4646_v13  ;;  %v4749_v11 = vld [vmem:[#allocation8 + $0x140] ss:$16 sps:$4 sm:$0xff]  }
 0x14c   :  { %v4712_v13 = vld [vmem:[#allocation5 + $0x824] ss:$24 sps:$4 sm:$0xff]  }
 0x14d   :  { %2103 = vmatpush1.bf16.msra.mxu1 %v4641_v14  ;;  %v4757_v14 = vld [vmem:[#allocation8 + $0x164] ss:$16 sps:$4 sm:$0xff]  }
 0x14e   :  { %2189 = vmatpush1.bf16.msra.mxu0 %v4644_v16  ;;  %2104 = vmatprep.subr.bf16.mxu1 %v4649_v17  ;;  %v4710_v16 = vld [vmem:[#allocation5 + $0x820] ss:$24 sps:$4 sm:$0xff]  }
 0x14f   :  { %2190 = vmatprep.subr.bf16.mxu0 %v4652_v18  ;;  %v4755_v17 = vld [vmem:[#allocation8 + $0x160] ss:$16 sps:$4 sm:$0xff]  }
 0x150   :  { %v4718_v18 = vld [vmem:[#allocation5 + $0x854] ss:$24 sps:$4 sm:$0xff]  }
 0x151   :  { %2105 = vmatpush1.bf16.msra.mxu1 %v4647_v19  ;;  %v4763_v19 = vld [vmem:[#allocation8 + $0x184] ss:$16 sps:$4 sm:$0xff]  }
 0x152   :  { %2191 = vmatpush1.bf16.msra.mxu0 %v4650_v20  ;;  %2106 = vmatprep.subr.bf16.mxu1 %v4655_v21  ;;  %v4716_v20 = vld [vmem:[#allocation5 + $0x850] ss:$24 sps:$4 sm:$0xff]  }
 0x153   :  { %2192 = vmatprep.subr.bf16.mxu0 %v4658_v22  ;;  %v4761_v21 = vld [vmem:[#allocation8 + $0x180] ss:$16 sps:$4 sm:$0xff]  }
 0x154   :  { %v4724_v22 = vld [vmem:[#allocation5 + $0x884] ss:$24 sps:$4 sm:$0xff]  }
 0x155   :  { %2107 = vmatpush1.bf16.msra.mxu1 %v4653_v24  ;;  %v4769_v24 = vld [vmem:[#allocation8 + $0x1a4] ss:$16 sps:$4 sm:$0xff]  }
 0x156   :  { %2193 = vmatpush1.bf16.msra.mxu0 %v4656_v25  ;;  %2108 = vmatprep.subr.bf16.mxu1 %v4661_v26  ;;  %v4722_v25 = vld [vmem:[#allocation5 + $0x880] ss:$24 sps:$4 sm:$0xff]  }
 0x157   :  { %2194 = vmatprep.subr.bf16.mxu0 %v4664_v27  ;;  %v4767_v26 = vld [vmem:[#allocation8 + $0x1a0] ss:$16 sps:$4 sm:$0xff]  }
 0x158   :  { %v4730_v27 = vld [vmem:[#allocation5 + $0x8b4] ss:$24 sps:$4 sm:$0xff]  }
 0x159   :  { %2109 = vmatpush1.bf16.msra.mxu1 %v4659_v28  ;;  %v4775_v28 = vld [vmem:[#allocation8 + $0x1c4] ss:$16 sps:$4 sm:$0xff]  }
 0x15a   :  { %2195 = vmatpush1.bf16.msra.mxu0 %v4662_v29  ;;  %3442 = vmatprep.subr.bf16.mxu1 %v4691_v31  ;;  %v4728_v29 = vld [vmem:[#allocation5 + $0x8b0] ss:$24 sps:$4 sm:$0xff]   ;;  %v4736_v31 = vld [vmem:[#allocation5 + $0x8e4] ss:$24 sps:$4 sm:$0xff]  }
 0x15b   :  { %2207 = vmatprep.subr.bf16.mxu0 %v4667_v30  ;;  %v4773_v30 = vld [vmem:[#allocation8 + $0x1c0] ss:$16 sps:$4 sm:$0xff]  }
 0x15c   :  { %2111 = vmatmul.mubr.bf16.vlgmr.msra.gmra.mrb[4].mxu1 %v5261_v23 }
 0x15d   :  { %2197 = vmatmul.mubr.bf16.vlgmr.msra.gmra.mrb[4].mxu0 %v5253_v15  ;;  %3443 = vmatpush1.bf16.msra.mxu1 %v4689_v33  ;;  %v4674_v15 = vld [vmem:[#allocation5 + $0x6a0] ss:$24 sps:$4 sm:$0xff]  }
 0x15e   :  { %2208 = vmatpush1.bf16.msra.mxu0 %v4665_v32  ;;  %3444 = vmatprep.subr.bf16.mxu1 %v4697_v35  ;;  %v4781_v32 = vld [vmem:[#allocation8 + $0x1e4] ss:$16 sps:$4 sm:$0xff]   ;;  %v4742_v35 = vld [vmem:[#allocation8 + $0xc] ss:$16 sps:$4 sm:$0xff]  }
 0x15f   :  { %2209 = vmatprep.subr.bf16.mxu0 %v4670_v34  ;;  %2239 = vmatprep.mubr.bf16.mxu0 %v5258_v44  ;;  %v4713_v44 = vld [vmem:[#allocation8 + $0x80] ss:$16 sps:$4 sm:$0xff]  }
 0x160   :  { %v4734_v33 = vld [vmem:[#allocation5 + $0x8e0] ss:$24 sps:$4 sm:$0xff]  }
 0x161   :  { %3445 = vmatpush1.bf16.msra.mxu1 %v4695_v37  ;;  %v4779_v34 = vld [vmem:[#allocation8 + $0x1e0] ss:$16 sps:$4 sm:$0xff]   ;;  %v4740_v37 = vld [vmem:[#allocation8 + $0x8] ss:$16 sps:$4 sm:$0xff]  }
 0x162   :  { %2210 = vmatpush1.bf16.msra.mxu0 %v4668_v36  ;;  %3446 = vmatprep.subr.bf16.mxu1 %v4703_v39  ;;  %v4811_v36 = vld [vmem:[#allocation8 + $0x204] ss:$16 sps:$4 sm:$0xff]   ;;  %v4746_v39 = vld [vmem:[#allocation8 + $0x28] ss:$16 sps:$4 sm:$0xff]  }
 0x163   :  { %2211 = vmatprep.subr.bf16.mxu0 %v4673_v38  ;;  %v4748_v38 = vld [vmem:[#allocation8 + $0x2c] ss:$16 sps:$4 sm:$0xff]  }
 0x165   :  { %3447 = vmatpush1.bf16.msra.mxu1 %v4701_v41  ;;  %v4752_v41 = vld [vmem:[#allocation8 + $0x48] ss:$16 sps:$4 sm:$0xff]  }
 0x166   :  { %2212 = vmatpush1.bf16.msra.mxu0 %v4671_v12  ;;  %3448 = vmatprep.subr.bf16.mxu1 %v4709_v50  ;;  %v393_v12 = vlaneseq }
 0x167   :  { %2213 = vmatprep.subr.bf16.mxu0 %v4676_v40  ;;  %v4754_v40 = vld [vmem:[#allocation8 + $0x4c] ss:$16 sps:$4 sm:$0xff]  }
 0x168   :  { %v5283_v50 = vshrl.u32 %v393_v12, 7  ;;  %v4803_v12 = vld [vmem:[#allocation8 + $0x1c8] ss:$16 sps:$4 sm:$0xff]  }
 0x169   :  { %3449 = vmatpush1.bf16.msra.mxu1 %v4707_v43 }
 0x16a   :  { %2214 = vmatpush1.bf16.msra.mxu0 %v4674_v15  ;;  %3450 = vmatprep.subr.bf16.mxu1 %v4715_v55  ;;  %v4760_v15 = vld [vmem:[#allocation8 + $0x6c] ss:$16 sps:$4 sm:$0xff]   ;;  %v395_v43 = vsub.s32 0, %v5283_v50 }
 0x16b   :  { %2215 = vmatprep.subr.bf16.mxu0 %v4679_v42  ;;  %v4758_v42 = vld [vmem:[#allocation8 + $0x68] ss:$16 sps:$4 sm:$0xff]   ;;  %v4766_v55 = vld [vmem:[#allocation8 + $0x8c] ss:$16 sps:$4 sm:$0xff]  }
 0x16d   :  { %3451 = vmatpush1.bf16.msra.mxu1 %v4713_v44 }
 0x16e   :  { %2216 = vmatpush1.bf16.msra.mxu0 %v4677_v45  ;;  %3452 = vmatprep.subr.bf16.mxu1 %v4721_v47  ;;  %v5286_v45 = vld [vmem:[#allocation7] sm:$0x3f] }
 0x16f   :  { %2217 = vmatprep.subr.bf16.mxu0 %v4682_v46  ;;  %v5274_v53 = vpop.f32.mrb[0].mxu1  ;;  %v4764_v46 = vld [vmem:[#allocation8 + $0x88] ss:$16 sps:$4 sm:$0xff]   ;;  %v396_v44 = vrot.slane %v5286_v45, %v395_v43  ;;  %v4772_v47 = vld [vmem:[#allocation8 + $0xac] ss:$16 sps:$4 sm:$0xff]  }
 0x170   :  { %v5276_v54 = vpop.f32.mrb[1].mxu1 }
 0x171   :  { %v5278_v56 = vpop.f32.mrb[2].mxu1  ;;  %3453 = vmatpush1.bf16.msra.mxu1 %v4719_v51  ;;  %v1898_v51 = vadd.f32 %v5274_v53, %v396_v44 }
 0x172   :  { %2218 = vmatpush1.bf16.msra.mxu0 %v4680_v48  ;;  %v5280_v59 = vpop.f32.mrb[3].mxu1  ;;  %3454 = vmatprep.subr.bf16.mxu1 %v4727_v52  ;;  %v4778_v52 = vld [vmem:[#allocation8 + $0xcc] ss:$16 sps:$4 sm:$0xff]  }
 0x173   :  { %2219 = vmatprep.subr.bf16.mxu0 %v4685_v49  ;;  %v4770_v49 = vld [vmem:[#allocation8 + $0xa8] ss:$16 sps:$4 sm:$0xff]  }
 0x175   :  { %3455 = vmatpush1.bf16.msra.mxu1 %v4725_v58 }
 0x176   :  { %2220 = vmatpush1.bf16.msra.mxu0 %v4683_v57  ;;  %3456 = vmatprep.subr.bf16.mxu1 %v4733_v61 }
 0x177   :  { %2221 = vmatprep.subr.bf16.mxu0 %v4688_v60  ;;  %v1902_v60 = vadd.f32 %v5278_v56, %v396_v44  ;;  %v4865_v44 = vld [vmem:[#allocation8 + $0x324] ss:$16 sps:$4 sm:$0xff]  }
 0x179   :  { %3457 = vmatpush1.bf16.msra.mxu1 %v4731_v0 }
 0x17a   :  { %2222 = vmatpush1.bf16.msra.mxu0 %v4686_v62  ;;  %3458 = vmatprep.subr.bf16.mxu1 %v4739_v1 }
 0x17b   :  { %2223 = vmatprep.subr.bf16.mxu0 %v4694_v63 }
 0x17d   :  { %3459 = vmatpush1.bf16.msra.mxu1 %v4737_v4 }
 0x17e   :  { %2224 = vmatpush1.bf16.msra.mxu0 %v4692_v2  ;;  %3460 = vmatprep.subr.bf16.mxu1 %v4745_v5  ;;  %v4776_v2 = vld [vmem:[#allocation8 + $0xc8] ss:$16 sps:$4 sm:$0xff]   ;;  %v4784_v5 = vld [vmem:[#allocation8 + $0xec] ss:$16 sps:$4 sm:$0xff]  }
 0x17f   :  { %2225 = vmatprep.subr.bf16.mxu0 %v4700_v3 }
 0x181   :  { %3461 = vmatpush1.bf16.msra.mxu1 %v4743_v8 }
 0x182   :  { %2226 = vmatpush1.bf16.msra.mxu0 %v4698_v6  ;;  %3462 = vmatprep.subr.bf16.mxu1 %v4751_v9  ;;  %v4782_v9 = vld [vmem:[#allocation8 + $0xe8] ss:$16 sps:$4 sm:$0xff]  }
 0x183   :  { %2227 = vmatprep.subr.bf16.mxu0 %v4706_v7 }
 0x185   :  { %3463 = vmatpush1.bf16.msra.mxu1 %v4749_v11  ;;  %v4809_v11 = vld [vmem:[#allocation8 + $0x200] ss:$16 sps:$4 sm:$0xff]  }
 0x186   :  { %2228 = vmatpush1.bf16.msra.mxu0 %v4704_v10  ;;  %3464 = vmatprep.subr.bf16.mxu1 %v4757_v14  ;;  %v4785_v14 = vld [vmem:[#allocation8 + $0x108] ss:$16 sps:$4 sm:$0xff]  }
 0x187   :  { %2229 = vmatprep.subr.bf16.mxu0 %v4712_v13  ;;  %v4817_v13 = vld [vmem:[#allocation8 + $0x224] ss:$16 sps:$4 sm:$0xff]  }
 0x189   :  { %3465 = vmatpush1.bf16.msra.mxu1 %v4755_v17  ;;  %v4815_v17 = vld [vmem:[#allocation8 + $0x220] ss:$16 sps:$4 sm:$0xff]  }
 0x18a   :  { %2230 = vmatpush1.bf16.msra.mxu0 %v4710_v16  ;;  %3466 = vmatprep.subr.bf16.mxu1 %v4763_v19  ;;  %v4790_v16 = vld [vmem:[#allocation8 + $0x12c] ss:$16 sps:$4 sm:$0xff]   ;;  %v4788_v19 = vld [vmem:[#allocation8 + $0x128] ss:$16 sps:$4 sm:$0xff]  }
 0x18b   :  { %2231 = vmatprep.subr.bf16.mxu0 %v4718_v18  ;;  %v4823_v18 = vld [vmem:[#allocation8 + $0x244] ss:$16 sps:$4 sm:$0xff]  }
 0x18d   :  { %3467 = vmatpush1.bf16.msra.mxu1 %v4761_v21  ;;  %v4821_v21 = vld [vmem:[#allocation8 + $0x240] ss:$16 sps:$4 sm:$0xff]  }
 0x18e   :  { %2232 = vmatpush1.bf16.msra.mxu0 %v4716_v20  ;;  %3468 = vmatprep.subr.bf16.mxu1 %v4769_v24  ;;  %v4793_v20 = vld [vmem:[#allocation8 + $0x14c] ss:$16 sps:$4 sm:$0xff]   ;;  %v4791_v24 = vld [vmem:[#allocation8 + $0x148] ss:$16 sps:$4 sm:$0xff]  }
 0x18f   :  { %2233 = vmatprep.subr.bf16.mxu0 %v4724_v22  ;;  %v4829_v22 = vld [vmem:[#allocation8 + $0x264] ss:$16 sps:$4 sm:$0xff]  }
 0x191   :  { %3469 = vmatpush1.bf16.msra.mxu1 %v4767_v26  ;;  %v4827_v26 = vld [vmem:[#allocation8 + $0x260] ss:$16 sps:$4 sm:$0xff]  }
 0x192   :  { %2234 = vmatpush1.bf16.msra.mxu0 %v4722_v25  ;;  %3470 = vmatprep.subr.bf16.mxu1 %v4775_v28  ;;  %v4796_v25 = vld [vmem:[#allocation8 + $0x16c] ss:$16 sps:$4 sm:$0xff]   ;;  %v4794_v28 = vld [vmem:[#allocation8 + $0x168] ss:$16 sps:$4 sm:$0xff]  }
 0x193   :  { %2235 = vmatprep.subr.bf16.mxu0 %v4730_v27  ;;  %v4835_v27 = vld [vmem:[#allocation8 + $0x284] ss:$16 sps:$4 sm:$0xff]  }
 0x195   :  { %3471 = vmatpush1.bf16.msra.mxu1 %v4773_v30  ;;  %v4833_v30 = vld [vmem:[#allocation8 + $0x280] ss:$16 sps:$4 sm:$0xff]  }
 0x196   :  { %2236 = vmatpush1.bf16.msra.mxu0 %v4728_v29  ;;  %3472 = vmatprep.subr.bf16.mxu1 %v4781_v32  ;;  %v4799_v29 = vld [vmem:[#allocation8 + $0x18c] ss:$16 sps:$4 sm:$0xff]   ;;  %v4797_v32 = vld [vmem:[#allocation8 + $0x188] ss:$16 sps:$4 sm:$0xff]  }
 0x197   :  { %2237 = vmatprep.subr.bf16.mxu0 %v4736_v31  ;;  %v4841_v31 = vld [vmem:[#allocation8 + $0x2a4] ss:$16 sps:$4 sm:$0xff]  }
 0x199   :  { %3473 = vmatpush1.bf16.msra.mxu1 %v4779_v34  ;;  %v4839_v34 = vld [vmem:[#allocation8 + $0x2a0] ss:$16 sps:$4 sm:$0xff]  }
 0x19a   :  { %2238 = vmatpush1.bf16.msra.mxu0 %v4734_v33  ;;  %3485 = vmatprep.subr.bf16.mxu1 %v4811_v36  ;;  %v4802_v33 = vld [vmem:[#allocation8 + $0x1ac] ss:$16 sps:$4 sm:$0xff]   ;;  %v4800_v36 = vld [vmem:[#allocation8 + $0x1a8] ss:$16 sps:$4 sm:$0xff]  }
 0x19b   :  { %3571 = vmatprep.subr.bf16.mxu0 %v4742_v35  ;;  %v4847_v35 = vld [vmem:[#allocation8 + $0x2c4] ss:$16 sps:$4 sm:$0xff]  }
 0x19d   :  { %2240 = vmatmul.mubr.bf16.vlgmr.msra.gmra.mrb[4].mxu0 %v5261_v23  ;;  %v399_v23 = vsub.s32 1, %v5283_v50 }
 0x19e   :  { %3572 = vmatpush1.bf16.msra.mxu0 %v4740_v37  ;;  %v4805_v37 = vld [vmem:[#allocation8 + $0x1cc] ss:$16 sps:$4 sm:$0xff]  }
 0x19f   :  { %3573 = vmatprep.subr.bf16.mxu0 %v4748_v38  ;;  %v400_v48 = vrot.slane %v5286_v45, %v399_v23  ;;  %v4845_v38 = vld [vmem:[#allocation8 + $0x2c0] ss:$16 sps:$4 sm:$0xff]  }
 0x1a1   :  { %v1900_v57 = vadd.f32 %v5276_v54, %v400_v48  ;;  %v1904_v63 = vadd.f32 %v5280_v59, %v400_v48  ;;  %v4787_v59 = vld [vmem:[#allocation8 + $0x10c] ss:$16 sps:$4 sm:$0xff]  }
 0x1a2   :  { %3574 = vmatpush1.bf16.msra.mxu0 %v4746_v39  ;;  %v4853_v39 = vld [vmem:[#allocation8 + $0x2e4] ss:$16 sps:$4 sm:$0xff]   ;;  %v4820_v48 = vld [vmem:[#allocation8 + $0x22c] ss:$16 sps:$4 sm:$0xff]  }
 0x1a3   :  { %3575 = vmatprep.subr.bf16.mxu0 %v4754_v40  ;;  %v4808_v40 = vld [vmem:[#allocation8 + $0x1ec] ss:$16 sps:$4 sm:$0xff]  }
 0x1a6   :  { %3576 = vmatpush1.bf16.msra.mxu0 %v4752_v41  ;;  %v4851_v41 = vld [vmem:[#allocation8 + $0x2e0] ss:$16 sps:$4 sm:$0xff]  }
 0x1a7   :  { %3577 = vmatprep.subr.bf16.mxu0 %v4760_v15  ;;  %v4859_v15 = vld [vmem:[#allocation8 + $0x304] ss:$16 sps:$4 sm:$0xff]  }
 0x1aa   :  { %3578 = vmatpush1.bf16.msra.mxu0 %v4758_v42  ;;  %v4806_v42 = vld [vmem:[#allocation8 + $0x1e8] ss:$16 sps:$4 sm:$0xff]  }
 0x1ab   :  { %3579 = vmatprep.subr.bf16.mxu0 %v4766_v55  ;;  %v4814_v55 = vld [vmem:[#allocation8 + $0x20c] ss:$16 sps:$4 sm:$0xff]  }
 0x1ae   :  { %3580 = vmatpush1.bf16.msra.mxu0 %v4764_v46  ;;  %v4857_v46 = vld [vmem:[#allocation8 + $0x300] ss:$16 sps:$4 sm:$0xff]  }
 0x1af   :  { %3581 = vmatprep.subr.bf16.mxu0 %v4772_v47  ;;  %v4812_v47 = vld [vmem:[#allocation8 + $0x208] ss:$16 sps:$4 sm:$0xff]  }
 0x1b0   :  { %v1983_v58 = vpop.f32.mrb[0].mxu0 }
 0x1b1   :  { %v4208_v61 = vadd.f32 %v1983_v58, %v1898_v51  ;;  %v1985_v62 = vpop.f32.mrb[1].mxu0  ;;  %v4871_v51 = vld [vmem:[#allocation8 + $0x344] ss:$16 sps:$4 sm:$0xff]   ;;  %v4869_v58 = vld [vmem:[#allocation8 + $0x340] ss:$16 sps:$4 sm:$0xff]  }
 0x1b2   :  { %v4210_v0 = vadd.f32 %v1985_v62, %v1900_v57  ;;  %v1987_v1 = vpop.f32.mrb[2].mxu0  ;;  %3582 = vmatpush1.bf16.msra.mxu0 %v4770_v49  ;;  %v4863_v49 = vld [vmem:[#allocation8 + $0x320] ss:$16 sps:$4 sm:$0xff]   ;;  %v4826_v57 = vld [vmem:[#allocation8 + $0x24c] ss:$16 sps:$4 sm:$0xff]  }
 0x1b3   :  { %v4212_v3 = vadd.f32 %v1987_v1, %v1902_v60  ;;  %v1989_v4 = vpop.f32.mrb[3].mxu0  ;;  %3583 = vmatprep.subr.bf16.mxu0 %v4778_v52  ;;  %v2250_v6 = vmax.f32 %v4208_v61, 0.0  ;;  %v4818_v52 = vld [vmem:[#allocation8 + $0x228] ss:$16 sps:$4 sm:$0xff]   ;;  %v4877_v60 = vld [vmem:[#allocation8 + $0x364] ss:$16 sps:$4 sm:$0xff]  }
 0x1b4   :  { %v4214_v53 = vadd.f32 %v1989_v4, %v1904_v63  ;;  %v2251_v8 = vmax.f32 %v4210_v0, 0.0  ;;  %v4824_v61 = vld [vmem:[#allocation8 + $0x248] ss:$16 sps:$4 sm:$0xff]   ;;  %v4832_v62 = vld [vmem:[#allocation8 + $0x26c] ss:$16 sps:$4 sm:$0xff]  }
 0x1b5   :  { %v2256_v7 = vmax.f32 %v4212_v3, 0.0  ;;  %v4875_v63 = vld [vmem:[#allocation8 + $0x360] ss:$16 sps:$4 sm:$0xff]   ;;  %v4883_v0 = vld [vmem:[#allocation8 + $0x384] ss:$16 sps:$4 sm:$0xff]  }
 0x1b6   :  { %v2257_v54 = vmax.f32 %v4214_v53, 0.0  ;;  %3584 = vmatpush1.bf16.msra.mxu0 %v4776_v2  ;;  %v4830_v1 = vld [vmem:[#allocation8 + $0x268] ss:$16 sps:$4 sm:$0xff]   ;;  %v4838_v2 = vld [vmem:[#allocation8 + $0x28c] ss:$16 sps:$4 sm:$0xff]  }
 0x1b7   :  { %v5299_v56 = vpack.c.bf16 %v2256_v7, %v2250_v6  ;;  %3585 = vmatprep.subr.bf16.mxu0 %v4784_v5  ;;  %v4881_v3 = vld [vmem:[#allocation8 + $0x380] ss:$16 sps:$4 sm:$0xff]   ;;  %v4889_v4 = vld [vmem:[#allocation8 + $0x3a4] ss:$16 sps:$4 sm:$0xff]   ;;  %v4836_v5 = vld [vmem:[#allocation8 + $0x288] ss:$16 sps:$4 sm:$0xff]  }
 0x1b8   :  { %v2263_v10 = vpack.c.bf16 %v2257_v54, %v2251_v8  ;;  %v4844_v53 = vld [vmem:[#allocation8 + $0x2ac] ss:$16 sps:$4 sm:$0xff]   ;;  %v4887_v6 = vld [vmem:[#allocation8 + $0x3a0] ss:$16 sps:$4 sm:$0xff]   ;;  %v4895_v7 = vld [vmem:[#allocation8 + $0x3c4] ss:$16 sps:$4 sm:$0xff]  }
 0x1b9   :  { %v4842_v8 = vld [vmem:[#allocation8 + $0x2a8] ss:$16 sps:$4 sm:$0xff]   ;;  %v4850_v54 = vld [vmem:[#allocation8 + $0x2cc] ss:$16 sps:$4 sm:$0xff]  }
 0x1ba   :  { %3474 = vmatprep.mubr.bf16.mxu1 %v2263_v10  ;;  %3586 = vmatpush1.bf16.msra.mxu0 %v4782_v9  ;;  %v4893_v9 = vld [vmem:[#allocation8 + $0x3c0] ss:$16 sps:$4 sm:$0xff]  }
 0x1bb   :  { %3603 = vmatprep.mubr.bf16.mxu0 %v2263_v10  ;;  %3475 = vmatmul.mubr.bf16.vlgmr.msra.gmra.mrb[8].mxu1 %v5299_v56  ;;  %v4848_v10 = vld [vmem:[#allocation8 + $0x2c8] ss:$16 sps:$4 sm:$0xff]  }
 0x1bc   :  { %3587 = vmatprep.subr.bf16.mxu0 %v4787_v59  ;;  %3486 = vmatpush1.bf16.msra.mxu1 %v4809_v11  ;;  %v4856_v59 = vld [vmem:[#allocation8 + $0x2ec] ss:$16 sps:$4 sm:$0xff]   ;;  %v4899_v11 = vld [vmem:[#allocation8 + $0x3e0] ss:$16 sps:$4 sm:$0xff]  }
 0x1bd   :  { %3487 = vmatprep.subr.bf16.mxu1 %v4817_v13  ;;  %v4907_v13 = vld [vmem:[#allocation8 + $0x404] ss:$16 sps:$4 sm:$0xff]  }
 0x1be   :  { %3588 = vmatpush1.bf16.msra.mxu0 %v4785_v14  ;;  %v4854_v14 = vld [vmem:[#allocation8 + $0x2e8] ss:$16 sps:$4 sm:$0xff]  }
 0x1bf   :  { %3589 = vmatprep.subr.bf16.mxu0 %v4790_v16  ;;  %v4862_v16 = vld [vmem:[#allocation8 + $0x30c] ss:$16 sps:$4 sm:$0xff]  }
 0x1c0   :  { %3488 = vmatpush1.bf16.msra.mxu1 %v4815_v17  ;;  %v4860_v17 = vld [vmem:[#allocation8 + $0x308] ss:$16 sps:$4 sm:$0xff]  }
 0x1c1   :  { %3489 = vmatprep.subr.bf16.mxu1 %v4823_v18  ;;  %v4868_v18 = vld [vmem:[#allocation8 + $0x32c] ss:$16 sps:$4 sm:$0xff]  }
 0x1c2   :  { %3590 = vmatpush1.bf16.msra.mxu0 %v4788_v19  ;;  %v4866_v19 = vld [vmem:[#allocation8 + $0x328] ss:$16 sps:$4 sm:$0xff]  }
 0x1c3   :  { %3591 = vmatprep.subr.bf16.mxu0 %v4793_v20  ;;  %v4874_v20 = vld [vmem:[#allocation8 + $0x34c] ss:$16 sps:$4 sm:$0xff]  }
 0x1c4   :  { %3490 = vmatpush1.bf16.msra.mxu1 %v4821_v21  ;;  %v4872_v21 = vld [vmem:[#allocation8 + $0x348] ss:$16 sps:$4 sm:$0xff]  }
 0x1c5   :  { %3491 = vmatprep.subr.bf16.mxu1 %v4829_v22  ;;  %v4880_v22 = vld [vmem:[#allocation8 + $0x36c] ss:$16 sps:$4 sm:$0xff]  }
 0x1c6   :  { %3592 = vmatpush1.bf16.msra.mxu0 %v4791_v24  ;;  %v4878_v24 = vld [vmem:[#allocation8 + $0x368] ss:$16 sps:$4 sm:$0xff]  }
 0x1c7   :  { %3593 = vmatprep.subr.bf16.mxu0 %v4796_v25  ;;  %v4886_v25 = vld [vmem:[#allocation8 + $0x38c] ss:$16 sps:$4 sm:$0xff]  }
 0x1c8   :  { %3492 = vmatpush1.bf16.msra.mxu1 %v4827_v26  ;;  %v4884_v26 = vld [vmem:[#allocation8 + $0x388] ss:$16 sps:$4 sm:$0xff]  }
 0x1c9   :  { %3493 = vmatprep.subr.bf16.mxu1 %v4835_v27  ;;  %v4892_v27 = vld [vmem:[#allocation8 + $0x3ac] ss:$16 sps:$4 sm:$0xff]  }
 0x1ca   :  { %3594 = vmatpush1.bf16.msra.mxu0 %v4794_v28  ;;  %v4890_v28 = vld [vmem:[#allocation8 + $0x3a8] ss:$16 sps:$4 sm:$0xff]  }
 0x1cb   :  { %3595 = vmatprep.subr.bf16.mxu0 %v4799_v29  ;;  %v4898_v29 = vld [vmem:[#allocation8 + $0x3cc] ss:$16 sps:$4 sm:$0xff]  }
 0x1cc   :  { %3494 = vmatpush1.bf16.msra.mxu1 %v4833_v30  ;;  %v4896_v30 = vld [vmem:[#allocation8 + $0x3c8] ss:$16 sps:$4 sm:$0xff]  }
 0x1cd   :  { %3495 = vmatprep.subr.bf16.mxu1 %v4841_v31  ;;  %v4904_v31 = vld [vmem:[#allocation8 + $0x3ec] ss:$16 sps:$4 sm:$0xff]  }
 0x1ce   :  { %3596 = vmatpush1.bf16.msra.mxu0 %v4797_v32  ;;  %v4902_v32 = vld [vmem:[#allocation8 + $0x3e8] ss:$16 sps:$4 sm:$0xff]  }
 0x1cf   :  { %3597 = vmatprep.subr.bf16.mxu0 %v4802_v33  ;;  %v4910_v33 = vld [vmem:[#allocation8 + $0x40c] ss:$16 sps:$4 sm:$0xff]  }
 0x1d0   :  { %3496 = vmatpush1.bf16.msra.mxu1 %v4839_v34  ;;  %v403_v34 = vsub.s32 2, %v5283_v50 }
 0x1d1   :  { %3497 = vmatprep.subr.bf16.mxu1 %v4847_v35  ;;  %v407_v35 = vsub.s32 3, %v5283_v50 }
 0x1d2   :  { %3598 = vmatpush1.bf16.msra.mxu0 %v4800_v36  ;;  %v404_v36 = vrot.slane %v5286_v45, %v403_v34 }
 0x1d3   :  { %3599 = vmatprep.subr.bf16.mxu0 %v4805_v37  ;;  %v408_v37 = vrot.slane %v5286_v45, %v407_v35 }
 0x1d4   :  { %3498 = vmatpush1.bf16.msra.mxu1 %v4845_v38 }
 0x1d5   :  { %3499 = vmatprep.subr.bf16.mxu1 %v4853_v39 }
 0x1d6   :  { %3600 = vmatpush1.bf16.msra.mxu0 %v4803_v12 }
 0x1d7   :  { %3601 = vmatprep.subr.bf16.mxu0 %v4808_v40 }
 0x1d8   :  { %3500 = vmatpush1.bf16.msra.mxu1 %v4851_v41 }
 0x1d9   :  { %3501 = vmatprep.subr.bf16.mxu1 %v4859_v15 }
 0x1da   :  { %3602 = vmatpush1.bf16.msra.mxu0 %v4806_v42 }
 0x1db   :  { %3614 = vmatprep.subr.bf16.mxu0 %v4814_v55 }
 0x1dc   :  { %3502 = vmatpush1.bf16.msra.mxu1 %v4857_v46 }
 0x1dd   :  { %3604 = vmatmul.mubr.bf16.vlgmr.msra.gmra.mrb[8].mxu0 %v5299_v56  ;;  %3503 = vmatprep.subr.bf16.mxu1 %v4865_v44  ;;  %v4901_v56 = vld [vmem:[#allocation8 + $0x3e4] ss:$16 sps:$4 sm:$0xff]  }
 0x1de   :  { %3615 = vmatpush1.bf16.msra.mxu0 %v4812_v47 }
 0x1df   :  { %3616 = vmatprep.subr.bf16.mxu0 %v4820_v48 }
 0x1e0   :  { %3504 = vmatpush1.bf16.msra.mxu1 %v4863_v49 }
 0x1e1   :  { %3505 = vmatprep.subr.bf16.mxu1 %v4871_v51 }
 0x1e2   :  { %3617 = vmatpush1.bf16.msra.mxu0 %v4818_v52  ;;  %v4905_v52 = vld [vmem:[#allocation8 + $0x400] ss:$16 sps:$4 sm:$0xff]  }
 0x1e3   :  { %3618 = vmatprep.subr.bf16.mxu0 %v4826_v57  ;;  %v4908_v57 = vld [vmem:[#allocation8 + $0x408] ss:$16 sps:$4 sm:$0xff]  }
 0x1e4   :  { %3506 = vmatpush1.bf16.msra.mxu1 %v4869_v58  ;;  %v4913_v58 = vld [vmem:[#allocation8 + $0x424] ss:$16 sps:$4 sm:$0xff]  }
 0x1e5   :  { %3507 = vmatprep.subr.bf16.mxu1 %v4877_v60  ;;  %v4916_v60 = vld [vmem:[#allocation8 + $0x42c] ss:$16 sps:$4 sm:$0xff]  }
 0x1e6   :  { %3619 = vmatpush1.bf16.msra.mxu0 %v4824_v61  ;;  %v4911_v61 = vld [vmem:[#allocation8 + $0x420] ss:$16 sps:$4 sm:$0xff]  }
 0x1e7   :  { %3620 = vmatprep.subr.bf16.mxu0 %v4832_v62  ;;  %v4914_v62 = vld [vmem:[#allocation8 + $0x428] ss:$16 sps:$4 sm:$0xff]  }
 0x1e8   :  { %3508 = vmatpush1.bf16.msra.mxu1 %v4875_v63  ;;  %v4919_v63 = vld [vmem:[#allocation8 + $0x444] ss:$16 sps:$4 sm:$0xff]  }
 0x1e9   :  { %3509 = vmatprep.subr.bf16.mxu1 %v4883_v0  ;;  %v4922_v0 = vld [vmem:[#allocation8 + $0x44c] ss:$16 sps:$4 sm:$0xff]  }
 0x1ea   :  { %3621 = vmatpush1.bf16.msra.mxu0 %v4830_v1  ;;  %v4917_v1 = vld [vmem:[#allocation8 + $0x440] ss:$16 sps:$4 sm:$0xff]  }
 0x1eb   :  { %3622 = vmatprep.subr.bf16.mxu0 %v4838_v2  ;;  %v4920_v2 = vld [vmem:[#allocation8 + $0x448] ss:$16 sps:$4 sm:$0xff]  }
 0x1ec   :  { %3510 = vmatpush1.bf16.msra.mxu1 %v4881_v3  ;;  %v4925_v3 = vld [vmem:[#allocation8 + $0x464] ss:$16 sps:$4 sm:$0xff]  }
 0x1ed   :  { %3511 = vmatprep.subr.bf16.mxu1 %v4889_v4  ;;  %v4928_v4 = vld [vmem:[#allocation8 + $0x46c] ss:$16 sps:$4 sm:$0xff]  }
 0x1ee   :  { %3623 = vmatpush1.bf16.msra.mxu0 %v4836_v5  ;;  %v4923_v5 = vld [vmem:[#allocation8 + $0x460] ss:$16 sps:$4 sm:$0xff]  }
 0x1ef   :  { %3624 = vmatprep.subr.bf16.mxu0 %v4844_v53  ;;  %v4926_v53 = vld [vmem:[#allocation8 + $0x468] ss:$16 sps:$4 sm:$0xff]  }
 0x1f0   :  { %3512 = vmatpush1.bf16.msra.mxu1 %v4887_v6  ;;  %v4931_v6 = vld [vmem:[#allocation8 + $0x484] ss:$16 sps:$4 sm:$0xff]  }
 0x1f1   :  { %3513 = vmatprep.subr.bf16.mxu1 %v4895_v7  ;;  %v4934_v7 = vld [vmem:[#allocation8 + $0x48c] ss:$16 sps:$4 sm:$0xff]  }
 0x1f2   :  { %3625 = vmatpush1.bf16.msra.mxu0 %v4842_v8  ;;  %v4929_v8 = vld [vmem:[#allocation8 + $0x480] ss:$16 sps:$4 sm:$0xff]  }
 0x1f3   :  { %3626 = vmatprep.subr.bf16.mxu0 %v4850_v54  ;;  %v4932_v54 = vld [vmem:[#allocation8 + $0x488] ss:$16 sps:$4 sm:$0xff]  }
 0x1f4   :  { %3514 = vmatpush1.bf16.msra.mxu1 %v4893_v9  ;;  %v4937_v9 = vld [vmem:[#allocation8 + $0x4a4] ss:$16 sps:$4 sm:$0xff]  }
 0x1f5   :  { %3515 = vmatprep.subr.bf16.mxu1 %v4901_v56  ;;  %v4940_v56 = vld [vmem:[#allocation8 + $0x4ac] ss:$16 sps:$4 sm:$0xff]  }
 0x1f6   :  { %3627 = vmatpush1.bf16.msra.mxu0 %v4848_v10  ;;  %v4935_v10 = vld [vmem:[#allocation8 + $0x4a0] ss:$16 sps:$4 sm:$0xff]  }
 0x1f7   :  { %3628 = vmatprep.subr.bf16.mxu0 %v4856_v59  ;;  %v4938_v59 = vld [vmem:[#allocation8 + $0x4a8] ss:$16 sps:$4 sm:$0xff]  }
 0x1f8   :  { %3516 = vmatpush1.bf16.msra.mxu1 %v4899_v11  ;;  %v4943_v11 = vld [vmem:[#allocation8 + $0x4c4] ss:$16 sps:$4 sm:$0xff]  }
 0x1f9   :  { %3528 = vmatprep.subr.bf16.mxu1 %v4907_v13  ;;  %v4946_v13 = vld [vmem:[#allocation8 + $0x4cc] ss:$16 sps:$4 sm:$0xff]  }
 0x1fa   :  { %3629 = vmatpush1.bf16.msra.mxu0 %v4854_v14  ;;  %v4941_v14 = vld [vmem:[#allocation8 + $0x4c0] ss:$16 sps:$4 sm:$0xff]  }
 0x1fb   :  { %3630 = vmatprep.subr.bf16.mxu0 %v4862_v16  ;;  %v4944_v16 = vld [vmem:[#allocation8 + $0x4c8] ss:$16 sps:$4 sm:$0xff]  }
 0x1fe   :  { %3631 = vmatpush1.bf16.msra.mxu0 %v4860_v17  ;;  %v4949_v17 = vld [vmem:[#allocation8 + $0x4e4] ss:$16 sps:$4 sm:$0xff]  }
 0x1ff   :  { %3632 = vmatprep.subr.bf16.mxu0 %v4868_v18  ;;  %v4952_v18 = vld [vmem:[#allocation8 + $0x4ec] ss:$16 sps:$4 sm:$0xff]  }
 0x202   :  { %3633 = vmatpush1.bf16.msra.mxu0 %v4866_v19  ;;  %v4947_v19 = vld [vmem:[#allocation8 + $0x4e0] ss:$16 sps:$4 sm:$0xff]  }
 0x203   :  { %3634 = vmatprep.subr.bf16.mxu0 %v4874_v20  ;;  %v4950_v20 = vld [vmem:[#allocation8 + $0x4e8] ss:$16 sps:$4 sm:$0xff]  }
 0x206   :  { %3635 = vmatpush1.bf16.msra.mxu0 %v4872_v21  ;;  %v4955_v21 = vld [vmem:[#allocation8 + $0x504] ss:$16 sps:$4 sm:$0xff]  }
 0x207   :  { %3636 = vmatprep.subr.bf16.mxu0 %v4880_v22  ;;  %v4958_v22 = vld [vmem:[#allocation8 + $0x50c] ss:$16 sps:$4 sm:$0xff]  }
 0x20a   :  { %3637 = vmatpush1.bf16.msra.mxu0 %v4878_v24  ;;  %v4953_v24 = vld [vmem:[#allocation8 + $0x500] ss:$16 sps:$4 sm:$0xff]  }
 0x20b   :  { %3638 = vmatprep.subr.bf16.mxu0 %v4886_v25  ;;  %v4956_v25 = vld [vmem:[#allocation8 + $0x508] ss:$16 sps:$4 sm:$0xff]  }
 0x20e   :  { %3639 = vmatpush1.bf16.msra.mxu0 %v4884_v26  ;;  %v4961_v26 = vld [vmem:[#allocation8 + $0x524] ss:$16 sps:$4 sm:$0xff]  }
 0x20f   :  { %3640 = vmatprep.subr.bf16.mxu0 %v4892_v27  ;;  %v4964_v27 = vld [vmem:[#allocation8 + $0x52c] ss:$16 sps:$4 sm:$0xff]  }
 0x212   :  { %3641 = vmatpush1.bf16.msra.mxu0 %v4890_v28  ;;  %v4959_v28 = vld [vmem:[#allocation8 + $0x520] ss:$16 sps:$4 sm:$0xff]  }
 0x213   :  { %3642 = vmatprep.subr.bf16.mxu0 %v4898_v29  ;;  %v4962_v29 = vld [vmem:[#allocation8 + $0x528] ss:$16 sps:$4 sm:$0xff]  }
 0x216   :  { %3643 = vmatpush1.bf16.msra.mxu0 %v4896_v30  ;;  %v4967_v30 = vld [vmem:[#allocation8 + $0x544] ss:$16 sps:$4 sm:$0xff]  }
 0x217   :  { %3644 = vmatprep.subr.bf16.mxu0 %v4904_v31  ;;  %v4970_v31 = vld [vmem:[#allocation8 + $0x54c] ss:$16 sps:$4 sm:$0xff]  }
 0x21a   :  { %3645 = vmatpush1.bf16.msra.mxu0 %v4902_v32  ;;  %v4965_v32 = vld [vmem:[#allocation8 + $0x540] ss:$16 sps:$4 sm:$0xff]  }
 0x21b   :  { %3657 = vmatprep.subr.bf16.mxu0 %v4910_v33  ;;  %v4968_v33 = vld [vmem:[#allocation8 + $0x548] ss:$16 sps:$4 sm:$0xff]  }
 0x22f   :  { %v2112_v38 = vpop.f32.mrb[4].mxu1 }
 0x230   :  { %v4215_v39 = vadd.f32 %v2112_v38, %v404_v36  ;;  %v2114_v12 = vpop.f32.mrb[5].mxu1  ;;  %v4971_v38 = vld [vmem:[#allocation8 + $0x560] ss:$16 sps:$4 sm:$0xff]  }
 0x231   :  { %v4216_v40 = vadd.f32 %v2114_v12, %v408_v37  ;;  %v2116_v41 = vpop.f32.mrb[6].mxu1  ;;  %v4979_v12 = vld [vmem:[#allocation8 + $0x584] ss:$16 sps:$4 sm:$0xff]  }
 0x232   :  { %v4217_v15 = vadd.f32 %v2116_v41, %v404_v36  ;;  %v2118_v42 = vpop.f32.mrb[7].mxu1  ;;  %v2252_v46 = vmax.f32 %v4215_v39, 0.0  ;;  %v4973_v36 = vld [vmem:[#allocation8 + $0x564] ss:$16 sps:$4 sm:$0xff]   ;;  %v4974_v39 = vld [vmem:[#allocation8 + $0x568] ss:$16 sps:$4 sm:$0xff]  }
 0x233   :  { %v4218_v55 = vadd.f32 %v2118_v42, %v408_v37  ;;  %v2253_v47 = vmax.f32 %v4216_v40, 0.0  ;;  %v4976_v37 = vld [vmem:[#allocation8 + $0x56c] ss:$16 sps:$4 sm:$0xff]   ;;  %v4977_v41 = vld [vmem:[#allocation8 + $0x580] ss:$16 sps:$4 sm:$0xff]  }
 0x234   :  { %v2258_v44 = vmax.f32 %v4217_v15, 0.0  ;;  %v4982_v40 = vld [vmem:[#allocation8 + $0x58c] ss:$16 sps:$4 sm:$0xff]   ;;  %v4980_v15 = vld [vmem:[#allocation8 + $0x588] ss:$16 sps:$4 sm:$0xff]  }
 0x235   :  { %v2259_v48 = vmax.f32 %v4218_v55, 0.0  ;;  %v4985_v42 = vld [vmem:[#allocation8 + $0x5a4] ss:$16 sps:$4 sm:$0xff]   ;;  %v4988_v55 = vld [vmem:[#allocation8 + $0x5ac] ss:$16 sps:$4 sm:$0xff]  }
 0x236   :  { %v2264_v49 = vpack.c.bf16 %v2258_v44, %v2252_v46  ;;  %v411_v46 = vsub.s32 4, %v5283_v50  ;;  %v415_v44 = vsub.s32 5, %v5283_v50 }
 0x237   :  { %v2265_v51 = vpack.c.bf16 %v2259_v48, %v2253_v47  ;;  %v4983_v47 = vld [vmem:[#allocation8 + $0x5a0] ss:$16 sps:$4 sm:$0xff]   ;;  %v4986_v48 = vld [vmem:[#allocation8 + $0x5a8] ss:$16 sps:$4 sm:$0xff]  }
 0x239   :  { %3517 = vmatprep.mubr.bf16.mxu1 %v2265_v51  ;;  %3646 = vmatprep.mubr.bf16.mxu0 %v2265_v51  ;;  %v4991_v51 = vld [vmem:[#allocation8 + $0x5c4] ss:$16 sps:$4 sm:$0xff]  }
 0x23a   :  { %3518 = vmatmul.mubr.bf16.vlgmr.msra.gmra.mrb[8].mxu1 %v2264_v49  ;;  %3647 = vmatmul.mubr.bf16.vlgmr.msra.gmra.mrb[8].mxu0 %v2264_v49  ;;  %v412_v49 = vrot.slane %v5286_v45, %v411_v46 }
 0x23b   :  { %3529 = vmatpush1.bf16.msra.mxu1 %v4905_v52  ;;  %3658 = vmatpush1.bf16.msra.mxu0 %v4908_v57  ;;  %v4994_v52 = vld [vmem:[#allocation8 + $0x5cc] ss:$16 sps:$4 sm:$0xff]   ;;  %v416_v57 = vrot.slane %v5286_v45, %v415_v44  ;;  %v4998_v45 = vld [vmem:[#allocation8 + $0x5e8] ss:$16 sps:$4 sm:$0xff]  }
 0x23c   :  { %3530 = vmatprep.subr.bf16.mxu1 %v4913_v58  ;;  %3659 = vmatprep.subr.bf16.mxu0 %v4916_v60  ;;  %v4989_v60 = vld [vmem:[#allocation8 + $0x5c0] ss:$16 sps:$4 sm:$0xff]  }
 0x23f   :  { %3531 = vmatpush1.bf16.msra.mxu1 %v4911_v61  ;;  %3660 = vmatpush1.bf16.msra.mxu0 %v4914_v62  ;;  %v4992_v61 = vld [vmem:[#allocation8 + $0x5c8] ss:$16 sps:$4 sm:$0xff]  }
 0x240   :  { %3532 = vmatprep.subr.bf16.mxu1 %v4919_v63  ;;  %3661 = vmatprep.subr.bf16.mxu0 %v4922_v0  ;;  %v4997_v0 = vld [vmem:[#allocation8 + $0x5e4] ss:$16 sps:$4 sm:$0xff]  }
 0x243   :  { %3533 = vmatpush1.bf16.msra.mxu1 %v4917_v1  ;;  %3662 = vmatpush1.bf16.msra.mxu0 %v4920_v2  ;;  %v5000_v1 = vld [vmem:[#allocation8 + $0x5ec] ss:$16 sps:$4 sm:$0xff]  }
 0x244   :  { %3534 = vmatprep.subr.bf16.mxu1 %v4925_v3  ;;  %3663 = vmatprep.subr.bf16.mxu0 %v4928_v4 }
 0x247   :  { %3535 = vmatpush1.bf16.msra.mxu1 %v4923_v5  ;;  %3664 = vmatpush1.bf16.msra.mxu0 %v4926_v53 }
 0x248   :  { %3536 = vmatprep.subr.bf16.mxu1 %v4931_v6  ;;  %3665 = vmatprep.subr.bf16.mxu0 %v4934_v7  ;;  %v4995_v6 = vld [vmem:[#allocation8 + $0x5e0] ss:$16 sps:$4 sm:$0xff]  }
 0x24b   :  { %3537 = vmatpush1.bf16.msra.mxu1 %v4929_v8  ;;  %3666 = vmatpush1.bf16.msra.mxu0 %v4932_v54 }
 0x24c   :  { %3538 = vmatprep.subr.bf16.mxu1 %v4937_v9  ;;  %3667 = vmatprep.subr.bf16.mxu0 %v4940_v56 }
 0x24f   :  { %3539 = vmatpush1.bf16.msra.mxu1 %v4935_v10  ;;  %3668 = vmatpush1.bf16.msra.mxu0 %v4938_v59  ;;  %v2460_v59 = vld [vmem:[#allocation10] sm:$0xf] }
 0x250   :  { %3540 = vmatprep.subr.bf16.mxu1 %v4943_v11  ;;  %3669 = vmatprep.subr.bf16.mxu0 %v4946_v13  ;;  %v2465_v11 = vrot.slane %v2460_v59, %v395_v43  ;;  %v2473_v13 = vrot.slane %v2460_v59, %v403_v34 }
 0x253   :  { %3541 = vmatpush1.bf16.msra.mxu1 %v4941_v14  ;;  %3670 = vmatpush1.bf16.msra.mxu0 %v4944_v16  ;;  %v2469_v14 = vrot.slane %v2460_v59, %v399_v23  ;;  %v2477_v16 = vrot.slane %v2460_v59, %v407_v35 }
 0x254   :  { %3542 = vmatprep.subr.bf16.mxu1 %v4949_v17  ;;  %3671 = vmatprep.subr.bf16.mxu0 %v4952_v18 }
 0x257   :  { %3543 = vmatpush1.bf16.msra.mxu1 %v4947_v19  ;;  %3672 = vmatpush1.bf16.msra.mxu0 %v4950_v20 }
 0x258   :  { %3544 = vmatprep.subr.bf16.mxu1 %v4955_v21  ;;  %3673 = vmatprep.subr.bf16.mxu0 %v4958_v22 }
 0x25b   :  { %3545 = vmatpush1.bf16.msra.mxu1 %v4953_v24  ;;  %3674 = vmatpush1.bf16.msra.mxu0 %v4956_v25 }
 0x25c   :  { %3546 = vmatprep.subr.bf16.mxu1 %v4961_v26  ;;  %3675 = vmatprep.subr.bf16.mxu0 %v4964_v27 }
 0x25f   :  { %3547 = vmatpush1.bf16.msra.mxu1 %v4959_v28  ;;  %3676 = vmatpush1.bf16.msra.mxu0 %v4962_v29 }
 0x260   :  { %3548 = vmatprep.subr.bf16.mxu1 %v4967_v30  ;;  %3677 = vmatprep.subr.bf16.mxu0 %v4970_v31 }
 0x263   :  { %3549 = vmatpush1.bf16.msra.mxu1 %v4965_v32  ;;  %3678 = vmatpush1.bf16.msra.mxu0 %v4968_v33 }
 0x264   :  { %3550 = vmatprep.subr.bf16.mxu1 %v4973_v36  ;;  %3679 = vmatprep.subr.bf16.mxu0 %v4976_v37 }
 0x267   :  { %3551 = vmatpush1.bf16.msra.mxu1 %v4971_v38  ;;  %3680 = vmatpush1.bf16.msra.mxu0 %v4974_v39 }
 0x268   :  { %3552 = vmatprep.subr.bf16.mxu1 %v4979_v12  ;;  %3681 = vmatprep.subr.bf16.mxu0 %v4982_v40 }
 0x26b   :  { %3553 = vmatpush1.bf16.msra.mxu1 %v4977_v41  ;;  %3682 = vmatpush1.bf16.msra.mxu0 %v4980_v15 }
 0x26c   :  { %3554 = vmatprep.subr.bf16.mxu1 %v4985_v42  ;;  %3683 = vmatprep.subr.bf16.mxu0 %v4988_v55 }
 0x26f   :  { %3555 = vmatpush1.bf16.msra.mxu1 %v4983_v47  ;;  %3684 = vmatpush1.bf16.msra.mxu0 %v4986_v48 }
 0x270   :  { %v2241_v58 = vpop.f32.mrb[4].mxu0  ;;  %3556 = vmatprep.subr.bf16.mxu1 %v4991_v51  ;;  %3685 = vmatprep.subr.bf16.mxu0 %v4994_v52 }
 0x271   :  { %v4219_v62 = vadd.f32 %v2241_v58, %v412_v49  ;;  %v2243_v63 = vpop.f32.mrb[5].mxu0 }
 0x272   :  { %v4220_v2 = vadd.f32 %v2243_v63, %v416_v57  ;;  %v2245_v3 = vpop.f32.mrb[6].mxu0 }
 0x273   :  { %v4221_v4 = vadd.f32 %v2245_v3, %v412_v49  ;;  %v2247_v5 = vpop.f32.mrb[7].mxu0  ;;  %3557 = vmatpush1.bf16.msra.mxu1 %v4989_v60  ;;  %3686 = vmatpush1.bf16.msra.mxu0 %v4992_v61  ;;  %v2254_v7 = vmax.f32 %v4219_v62, 0.0 }
 0x274   :  { %v4222_v53 = vadd.f32 %v2247_v5, %v416_v57  ;;  %3558 = vmatprep.subr.bf16.mxu1 %v4997_v0  ;;  %3687 = vmatprep.subr.bf16.mxu0 %v5000_v1  ;;  %v2255_v54 = vmax.f32 %v4220_v2, 0.0 }
 0x275   :  { %v2260_v8 = vmax.f32 %v4221_v4, 0.0 }
 0x276   :  { %v2261_v9 = vmax.f32 %v4222_v53, 0.0 }
 0x277   :  { %v2266_v56 = vpack.c.bf16 %v2260_v8, %v2254_v7  ;;  %3559 = vmatpush1.bf16.msra.mxu1 %v4995_v6  ;;  %3688 = vmatpush1.bf16.msra.mxu0 %v4998_v45 }
 0x278   :  { %v2267_v10 = vpack.c.bf16 %v2261_v9, %v2255_v54 }
 0x27a   :  { %3560 = vmatprep.mubr.bf16.mxu1 %v2267_v10  ;;  %3689 = vmatprep.mubr.bf16.mxu0 %v2267_v10 }
 0x27b   :  { %3561 = vmatmul.mubr.bf16.vlgmr.msra.gmra.mrb[8].mxu1 %v2266_v56  ;;  %3690 = vmatmul.mubr.bf16.vlgmr.msra.gmra.mrb[8].mxu0 %v2266_v56 }
 0x34e   :  { %v3562_v17 = vpop.f32.mrb[8].mxu1  ;;  %v3691_v18 = vpop.f32.mrb[8].mxu0 }
 0x34f   :  { %v4223_v19 = vadd.f32 %v3562_v17, %v2465_v11  ;;  %v4227_v20 = vadd.f32 %v3691_v18, %v2473_v13  ;;  %v3564_v21 = vpop.f32.mrb[9].mxu1  ;;  %v3693_v22 = vpop.f32.mrb[9].mxu0 }
 0x350   :  { %v4224_v24 = vadd.f32 %v3564_v21, %v2469_v14  ;;  %v4228_v25 = vadd.f32 %v3693_v22, %v2477_v16  ;;  %v3566_v43 = vpop.f32.mrb[10].mxu1  ;;  %v3695_v26 = vpop.f32.mrb[10].mxu0 }
 0x351   :  { %3700 = vst [vmem:[#allocation11] sm:$0xff] %v4223_v19  ;;  %3702 = vst [vmem:[#allocation11 + $0x10] sm:$0xff] %v4227_v20  ;;  %v4225_v34 = vadd.f32 %v3566_v43, %v2465_v11  ;;  %v4229_v27 = vadd.f32 %v3695_v26, %v2473_v13  ;;  %v3568_v23 = vpop.f32.mrb[11].mxu1  ;;  %v3697_v28 = vpop.f32.mrb[11].mxu0 }
 0x352   :  { %3701 = vst [vmem:[#allocation11 + $0x8] sm:$0xff] %v4224_v24  ;;  %3703 = vst [vmem:[#allocation11 + $0x18] sm:$0xff] %v4228_v25  ;;  %v4226_v50 = vadd.f32 %v3568_v23, %v2469_v14  ;;  %v4230_v35 = vadd.f32 %v3697_v28, %v2477_v16 }
 0x353   :  { %3704 = vst [vmem:[#allocation11 + $0x20] sm:$0xff] %v4225_v34  ;;  %3706 = vst [vmem:[#allocation11 + $0x30] sm:$0xff] %v4229_v27 }
 0x354   :  { %3705 = vst [vmem:[#allocation11 + $0x28] sm:$0xff] %v4226_v50  ;;  %3707 = vst [vmem:[#allocation11 + $0x38] sm:$0xff] %v4230_v35 }
 0x355   :  { %5122 = shalt.err (!%p5119_p2)
}
 0x356   :  { %s5123_s7 = scalar_lea.hbm %s5340_s5, 1024 }
 0x357   :  { %p5124_p3 = scmp.ne.s32.totalorder %s5340_s5, %s5123_s7  ;;  %p5127_p4 = scmp.lt.u32.totalorder %s5123_s7, %s5340_s5 }
 0x359   :  { %p5129_p5 = pnand %p5127_p4, %p5124_p3 }
 0x35b   :  { %5132 = shalt.err (!%p5129_p5)
}
 0x35c   :  { %s5153_s12 = smov 512   ;;  %s5154_s13 = smov 32  }
 0x35d   :  { %3719 = dma.vmem_to_hbm [thread:$0]  %s3714_s29, 1024, %s5340_s5, [#allocation4], %s5153_s12, %s5153_s12, %s5154_s13  }
 0x35e   :  { %5139 = dma.done.wait [#allocation4], 1024  }
 0x35f   :  { %5140 = vsyncadd [#allocation4], 4294966272 }
 0x360   :  { %3723 = vsyncpa [#allocation3], 1 }
 0x361   :  { %3724 = vsyncpa [#allocation6], 1 }
 0x362   :  { %3725 = vsyncpa [#allocation9], 1 }
 0x363   :  { %3726 = vsyncpa [#allocation4], 1 }

</bundles_post_ra>
